<compile_context>
chip_gen: v7x
topology: tpu7x:2x2x1
jax: 0.10.0
libtpu: 0.0.40
codegen_flags: <defaults>
</compile_context>

<pallas_src>
import jax
import jax.numpy as jnp
from jax import lax
from jax.experimental import pallas as pl
from jax.experimental.pallas import tpu as pltpu

C_IN = 2048     # channel dim fixed by the nn.Parameter(torch.randn(2048)) shapes
D_ENC = 128     # finger_encode output dim / GAT hidden dim
N_FINGERS = 4


def _ceil_div(a, b):
    return -(-a // b)


def _round_up(x, m):
    return _ceil_div(x, m) * m


def _nt_dot(a, b):
    """a @ b.T without an explicit transpose (contract last dims), f32 accum."""
    return lax.dot_general(a, b, (((1,), (1,)), ((), ())),
                           preferred_element_type=jnp.float32)


def point_kernel(feat_ref, fingers_ref, w_enc_ref, b_enc_ref,
                 w_gat_ref, a_src_ref, a_dst_ref, out_ref):
    bt = feat_ref.shape[0]          # batch elements in this grid step (static)

    def body(b, carry):
        feat_b = feat_ref[b]                                   # (C, HW)  bf16

        # ---- attention_finger_feat (all 4 fingers at once) ----
        # scores[f, s] = <finger_f, feat[:, s]>   (bf16 MXU, f32 accumulation)
        scores = lax.dot_general(fingers_ref[...], feat_b,
                                 (((1,), (0,)), ((), ())),
                                 preferred_element_type=jnp.float32)   # (4, HW)
        m = jnp.max(scores, axis=-1, keepdims=True)
        p = jnp.exp(scores - m)
        # exact reciprocal: the pooled features feed the adj>0 mask decision.
        attn = p * pl.reciprocal(jnp.sum(p, axis=-1, keepdims=True), approx=False)

        # pooled[f, c] = sum_s attn[f, s] * feat[c, s]
        # Cast only the tiny (4, HW) attn to bf16; feat stays bf16 (no f32
        # upcast of the dominant operand), f32 accumulation on the MXU.
        pooled = _nt_dot(attn.astype(jnp.bfloat16), feat_b)              # (4, C) f32

        # finger_encode: Linear(2048 -> 128); w_enc stays bf16, only the small
        # (4, 2048) pooled operand is rounded.
        ff = jnp.dot(pooled.astype(jnp.bfloat16), w_enc_ref[...],
                     preferred_element_type=jnp.float32) + b_enc_ref[...]  # (4, 128)

        # ---- adjacency: finger_feat @ finger_feat.T ----
        adj = _nt_dot(ff, ff)                                            # (4, 4)

        # ---- GAT (single-head GraphAttentionLayer) ----
        wh = jnp.dot(ff, w_gat_ref[...],
                     preferred_element_type=jnp.float32)                 # (4, 128)
        att_src = jnp.dot(wh, a_src_ref[...],
                          preferred_element_type=jnp.float32)            # (4, 1)
        att_dst = _nt_dot(a_dst_ref[...], wh)                            # (1, 4)
        e = att_src + att_dst                                            # (4, 4)
        e = jnp.where(e > 0, e, 0.2 * e)                                 # LeakyReLU(0.2)
        e = jnp.where(adj > 0, e, jnp.float32(-9e15))                    # mask by adj > 0
        m2 = jnp.max(e, axis=-1, keepdims=True)
        pe = jnp.exp(e - m2)
        # post-mask softmax: approx reciprocal uses the otherwise idle EUP slot.
        alpha = pe * pl.reciprocal(jnp.sum(pe, axis=-1, keepdims=True), approx=True)
        h = jnp.dot(alpha, wh, preferred_element_type=jnp.float32)       # (4, 128)
        out_ref[b] = jnp.where(h > 0, h, jnp.exp(h) - 1.0)               # ELU
        return carry

    lax.fori_loop(0, bt, body, 0)


def _vmem_capacity_bytes():
    """Per-core VMEM capacity, with a conservative fallback (v7x per-TC size)."""
    try:
        cap = int(pltpu.get_tpu_info().vmem_capacity_bytes)
        if cap > 0:
            return cap
    except Exception:
        pass
    return 64 * 1024 * 1024


def _choose_tiling(B, HW, *, itemsize=2, bt_cap=32):
    """Pick (bt, n_steps, vmem_limit_bytes) from the real padded VMEM footprint."""
    # Trailing (lane) dim of the feat block pads to a multiple of 128 in VMEM.
    per_batch = C_IN * _round_up(HW, 128) * itemsize
    cap = _vmem_capacity_bytes()                      # 128 MiB v5e/v6e, 64 MiB v7x
    vmem_limit = min((cap * 3) // 4, 96 * 1024 * 1024)  # 96 MiB big parts, 48 MiB v7x
    # feat is double-buffered by the pipeline; keep 2*bt*per_batch inside ~60%
    # of the limit, leaving room for weights, output buffers and temporaries.
    feat_budget = (vmem_limit * 3) // 5
    bt = max(1, min(B, bt_cap, feat_budget // (2 * per_batch)))
    n_steps = _ceil_div(B, bt)
    if B > 1:
        # >= 2 steps, rounded up to an even count, so the two TensorCores of a
        # v7x megacore get a balanced share of the "parallel" batch axis.
        n_steps += n_steps & 1
        bt = _ceil_div(B, n_steps)
    return int(bt), int(n_steps), int(vmem_limit)


def point_forward(feat_nchw, params, *, bt=None):
    B, C, H, W = feat_nchw.shape
    assert C == C_IN
    HW = H * W
    # Native NCHW layout: only flatten spatial dims (matches torch's
    # feat.reshape(B, C, -1)); no host transpose, and the big feat stream
    # moves over HBM in bf16 (half the bytes of f32).
    feat = feat_nchw.reshape(B, C, HW).astype(jnp.bfloat16)

    auto_bt, auto_steps, vmem_limit = _choose_tiling(B, HW)
    if bt is None:
        bt, n_steps = auto_bt, auto_steps
    else:
        bt = int(bt)
        n_steps = _ceil_div(B, bt)
    b_pad = n_steps * bt
    if b_pad != B:
        feat = jnp.pad(feat, ((0, b_pad - B), (0, 0), (0, 0)))

    fingers = params["fingers"].astype(jnp.bfloat16)
    w_enc = params["w_enc"].astype(jnp.bfloat16)

    grid_spec = pltpu.PrefetchScalarGridSpec(
        num_scalar_prefetch=0,
        grid=(n_steps,),
        in_specs=[
            pl.BlockSpec((bt, C_IN, HW), lambda i: (i, 0, 0)),      # feat (bt batches)
            pl.BlockSpec((N_FINGERS, C_IN), lambda i: (0, 0)),       # fingers (bf16)
            pl.BlockSpec((C_IN, D_ENC), lambda i: (0, 0)),           # finger_encode W^T (bf16)
            pl.BlockSpec((1, D_ENC), lambda i: (0, 0)),              # finger_encode bias
            pl.BlockSpec((D_ENC, D_ENC), lambda i: (0, 0)),          # GAT W
            pl.BlockSpec((D_ENC, 1), lambda i: (0, 0)),              # GAT a_src
            pl.BlockSpec((1, D_ENC), lambda i: (0, 0)),              # GAT a_dst
        ],
        out_specs=pl.BlockSpec((bt, N_FINGERS, D_ENC), lambda i: (i, 0, 0)),
    )
    out = pl.pallas_call(
        point_kernel,
        out_shape=jax.ShapeDtypeStruct((b_pad, N_FINGERS, D_ENC), jnp.float32),
        grid_spec=grid_spec,
        compiler_params=pltpu.CompilerParams(
            dimension_semantics=("parallel",),
            vmem_limit_bytes=vmem_limit),
    )(feat, fingers, w_enc, params["b_enc"], params["w_gat"],
      params["a_src"], params["a_dst"])
    return out[:B]


def point_reference(feat_nchw, params):
    """Pure-JAX reference mirroring the PyTorch forward pass and the kernel's
    bf16 roundings (feat / fingers / w_enc inputs, attn and pooled operands)."""
    def r(x):
        return x.astype(jnp.bfloat16).astype(jnp.float32)

    B, C, H, W = feat_nchw.shape
    with jax.default_matmul_precision("highest"):
        feat = r(feat_nchw.reshape(B, C, -1))                           # (B, C, HW)
        fingers = r(params["fingers"])                                  # (4, C)
        w_enc = r(params["w_enc"])                                      # (C, 128)
        scores = jnp.einsum("fc,bcs->bfs", fingers, feat)               # (B, 4, HW)
        attn = r(jax.nn.softmax(scores, axis=-1))                       # kernel feeds attn bf16
        pooled = r(jnp.einsum("bfs,bcs->bfc", attn, feat))              # kernel rounds pooled
        ff = pooled @ w_enc + params["b_enc"]                           # (B, 4, 128)
        adj = jnp.einsum("bfd,bgd->bfg", ff, ff)                        # (B, 4, 4)
        wh = ff @ params["w_gat"]                                       # (B, 4, 128)
        att_src = wh @ params["a_src"]                                  # (B, 4, 1)
        att_dst = jnp.einsum("od,bfd->bof", params["a_dst"], wh)        # (B, 1, 4)
        e = att_src + att_dst
        e = jnp.where(e > 0, e, 0.2 * e)
        e = jnp.where(adj > 0, e, -9e15)
        alpha = jax.nn.softmax(e, axis=-1)
        h = alpha @ wh
        return jnp.where(h > 0, h, jnp.exp(h) - 1.0)


def init_params(key):
    ks = jax.random.split(key, 6)
    # fingers are scaled by 1/sqrt(C) so the demo's spatial softmax is smooth
    # rather than a degenerate one-hot; this keeps the kernel/reference
    # comparison away from bf16 rounding cliffs (module semantics unchanged).
    fingers = jax.random.normal(ks[0], (N_FINGERS, C_IN), jnp.float32) / (C_IN ** 0.5)
    w_enc = jax.random.normal(ks[1], (C_IN, D_ENC), jnp.float32) / (C_IN ** 0.5)
    b_enc = jax.random.normal(ks[2], (1, D_ENC), jnp.float32) * 0.01
    w_gat = jax.random.normal(ks[3], (D_ENC, D_ENC), jnp.float32) / (D_ENC ** 0.5)
    a_src = jax.random.normal(ks[4], (D_ENC, 1), jnp.float32) / (D_ENC ** 0.5)
    a_dst = jax.random.normal(ks[5], (1, D_ENC), jnp.float32) / (D_ENC ** 0.5)
    return {"fingers": fingers, "w_enc": w_enc, "b_enc": b_enc,
            "w_gat": w_gat, "a_src": a_src, "a_dst": a_dst}


if __name__ == "__main__":
    key = jax.random.PRNGKey(0)
    k_feat, k_feat2, k_params = jax.random.split(key, 3)
    params = init_params(k_params)

    # Case 1: lane-dense spatial extent (16x16 = 256 lanes), B=2 -> bt=1, grid=(2,).
    B, H, W = 2, 16, 16
    feat = jax.random.normal(k_feat, (B, C_IN, H, W), jnp.float32)
    out = jax.block_until_ready(point_forward(feat, params))
    ref = point_reference(feat, params)
    assert out.shape == (B, N_FINGERS, D_ENC), out.shape
    err = float(jnp.max(jnp.abs(out - ref)))
    assert err < 2e-2, err

    # Case 2: small spatial extent (4x4 = 16, lane-padded path), B=5 -> bt=3,
    # batch padded to 6, grid=(2,), exercises bt>1 and the padded-batch rows.
    B2, H2, W2 = 5, 4, 4
    feat2 = jax.random.normal(k_feat2, (B2, C_IN, H2, W2), jnp.float32)
    out2 = jax.block_until_ready(point_forward(feat2, params))
    ref2 = point_reference(feat2, params)
    assert out2.shape == (B2, N_FINGERS, D_ENC), out2.shape
    err2 = float(jnp.max(jnp.abs(out2 - ref2)))
    assert err2 < 2e-2, err2

    print("KERNEL_OK")
</pallas_src>

<mosaic_0001>
module attributes {stable_mosaic.version = 11 : i64} {
  func.func @point_kernel(%arg0: i32, %arg1: memref<1x2048x256xbf16, #tpu.memory_space<vmem>>, %arg2: memref<4x2048xbf16, #tpu.memory_space<vmem>>, %arg3: memref<2048x128xbf16, #tpu.memory_space<vmem>>, %arg4: memref<1x128xf32, #tpu.memory_space<vmem>>, %arg5: memref<128x128xf32, #tpu.memory_space<vmem>>, %arg6: memref<128x1xf32, #tpu.memory_space<vmem>>, %arg7: memref<1x128xf32, #tpu.memory_space<vmem>>, %arg8: memref<1x4x128xf32, #tpu.memory_space<vmem>>) attributes {dimension_semantics = [#tpu.dimension_semantics<parallel>], iteration_bounds = array<i64: 2>, scalar_prefetch = 0 : i64, scratch_operands = 0 : i64, tpu.core_type = #tpu.core_type<tc>, window_params = [{transform_indices = @transform_0, window_bounds = array<i64: 1, 2048, 256>}, {pipeline_mode = #tpu.pipeline_mode<synchronous>, transform_indices = @transform_1, window_bounds = array<i64: 4, 2048>}, {pipeline_mode = #tpu.pipeline_mode<synchronous>, transform_indices = @transform_2, window_bounds = array<i64: 2048, 128>}, {pipeline_mode = #tpu.pipeline_mode<synchronous>, transform_indices = @transform_3, window_bounds = array<i64: 1, 128>}, {pipeline_mode = #tpu.pipeline_mode<synchronous>, transform_indices = @transform_4, window_bounds = array<i64: 128, 128>}, {pipeline_mode = #tpu.pipeline_mode<synchronous>, transform_indices = @transform_5, window_bounds = array<i64: 128, 1>}, {pipeline_mode = #tpu.pipeline_mode<synchronous>, transform_indices = @transform_6, window_bounds = array<i64: 1, 128>}, {transform_indices = @transform_7, window_bounds = array<i64: 1, 4, 128>}]} {
    %c0_i32 = arith.constant 0 : i32
    %0 = arith.index_cast %c0_i32 : i32 to index
    %c0 = arith.constant 0 : index
    %c0_0 = arith.constant 0 : index
    %1 = vector.load %arg1[%0, %c0, %c0_0] : memref<1x2048x256xbf16, #tpu.memory_space<vmem>>, vector<1x2048x256xbf16>
    %2 = vector.shape_cast %1 : vector<1x2048x256xbf16> to vector<2048x256xbf16>
    %c0_1 = arith.constant 0 : index
    %c0_2 = arith.constant 0 : index
    %3 = vector.load %arg2[%c0_1, %c0_2] : memref<4x2048xbf16, #tpu.memory_space<vmem>>, vector<4x2048xbf16>
    %cst = arith.constant dense<0.000000e+00> : vector<4x256xf32>
    %4 = tpu.matmul %3, %2, %cst {dimension_numbers = #tpu.dot_dimension_numbers<[1], [0], [0], [1], [0, 0, 1, 1], [], []>} : vector<4x2048xbf16>, vector<2048x256xbf16>, vector<4x256xf32> -> vector<4x256xf32>
    %cst_3 = arith.constant dense<0xFF800000> : vector<4xf32>
    %5 = vector.multi_reduction <maximumf>, %4, %cst_3 [1] : vector<4x256xf32> to vector<4xf32>
    %6 = vector.shape_cast %5 : vector<4xf32> to vector<4x1xf32>
    %7 = vector.broadcast %6 : vector<4x1xf32> to vector<4x256xf32>
    %8 = arith.subf %4, %7 : vector<4x256xf32>
    %9 = math.exp %8 : vector<4x256xf32>
    %cst_4 = arith.constant dense<0.000000e+00> : vector<4xf32>
    %10 = vector.multi_reduction <add>, %9, %cst_4 [1] : vector<4x256xf32> to vector<4xf32>
    %11 = vector.shape_cast %10 : vector<4xf32> to vector<4x1xf32>
    %12 = tpu.reciprocal %11 : vector<4x1xf32> -> vector<4x1xf32>
    %13 = vector.broadcast %12 : vector<4x1xf32> to vector<4x256xf32>
    %14 = arith.mulf %9, %13 : vector<4x256xf32>
    %15 = arith.truncf %14 : vector<4x256xf32> to vector<4x256xbf16>
    %cst_5 = arith.constant dense<0.000000e+00> : vector<4x2048xf32>
    %16 = tpu.matmul %15, %2, %cst_5 {dimension_numbers = #tpu.dot_dimension_numbers<[1], [1], [0], [0], [0, 0, 1, 0], [], []>} : vector<4x256xbf16>, vector<2048x256xbf16>, vector<4x2048xf32> -> vector<4x2048xf32>
    %17 = arith.truncf %16 : vector<4x2048xf32> to vector<4x2048xbf16>
    %c0_6 = arith.constant 0 : index
    %c0_7 = arith.constant 0 : index
    %18 = vector.load %arg3[%c0_6, %c0_7] : memref<2048x128xbf16, #tpu.memory_space<vmem>>, vector<2048x128xbf16>
    %cst_8 = arith.constant dense<0.000000e+00> : vector<4x128xf32>
    %19 = tpu.matmul %17, %18, %cst_8 {dimension_numbers = #tpu.dot_dimension_numbers<[1], [0], [0], [1], [0, 0, 1, 1], [], []>} : vector<4x2048xbf16>, vector<2048x128xbf16>, vector<4x128xf32> -> vector<4x128xf32>
    %c0_9 = arith.constant 0 : index
    %c0_10 = arith.constant 0 : index
    %20 = vector.load %arg4[%c0_9, %c0_10] : memref<1x128xf32, #tpu.memory_space<vmem>>, vector<1x128xf32>
    %21 = vector.broadcast %20 : vector<1x128xf32> to vector<4x128xf32>
    %22 = arith.addf %19, %21 : vector<4x128xf32>
    %cst_11 = arith.constant dense<0.000000e+00> : vector<4x4xf32>
    %23 = tpu.matmul %22, %22, %cst_11 {dimension_numbers = #tpu.dot_dimension_numbers<[1], [1], [0], [0], [0, 0, 1, 0], [], []>} : vector<4x128xf32>, vector<4x128xf32>, vector<4x4xf32> -> vector<4x4xf32>
    %c0_12 = arith.constant 0 : index
    %c0_13 = arith.constant 0 : index
    %24 = vector.load %arg5[%c0_12, %c0_13] : memref<128x128xf32, #tpu.memory_space<vmem>>, vector<128x128xf32>
    %cst_14 = arith.constant dense<0.000000e+00> : vector<4x128xf32>
    %25 = tpu.matmul %22, %24, %cst_14 {dimension_numbers = #tpu.dot_dimension_numbers<[1], [0], [0], [1], [0, 0, 1, 1], [], []>} : vector<4x128xf32>, vector<128x128xf32>, vector<4x128xf32> -> vector<4x128xf32>
    %c0_15 = arith.constant 0 : index
    %c0_16 = arith.constant 0 : index
    %26 = vector.load %arg6[%c0_15, %c0_16] : memref<128x1xf32, #tpu.memory_space<vmem>>, vector<128x1xf32>
    %cst_17 = arith.constant dense<0.000000e+00> : vector<4x1xf32>
    %27 = tpu.matmul %25, %26, %cst_17 {dimension_numbers = #tpu.dot_dimension_numbers<[1], [0], [0], [1], [0, 0, 1, 1], [], []>} : vector<4x128xf32>, vector<128x1xf32>, vector<4x1xf32> -> vector<4x1xf32>
    %c0_18 = arith.constant 0 : index
    %c0_19 = arith.constant 0 : index
    %28 = vector.load %arg7[%c0_18, %c0_19] : memref<1x128xf32, #tpu.memory_space<vmem>>, vector<1x128xf32>
    %cst_20 = arith.constant dense<0.000000e+00> : vector<1x4xf32>
    %29 = tpu.matmul %28, %25, %cst_20 {dimension_numbers = #tpu.dot_dimension_numbers<[1], [1], [0], [0], [0, 0, 1, 0], [], []>} : vector<1x128xf32>, vector<4x128xf32>, vector<1x4xf32> -> vector<1x4xf32>
    %30 = vector.broadcast %27 : vector<4x1xf32> to vector<4x4xf32>
    %31 = vector.broadcast %29 : vector<1x4xf32> to vector<4x4xf32>
    %32 = arith.addf %30, %31 : vector<4x4xf32>
    %cst_21 = arith.constant 0.000000e+00 : f32
    %33 = vector.broadcast %cst_21 : f32 to vector<4x4xf32>
    %34 = arith.cmpf ogt, %32, %33 : vector<4x4xf32>
    %cst_22 = arith.constant 2.000000e-01 : f32
    %35 = vector.broadcast %cst_22 : f32 to vector<4x4xf32>
    %36 = arith.mulf %35, %32 : vector<4x4xf32>
    %37 = arith.select %34, %32, %36 : vector<4x4xi1>, vector<4x4xf32>
    %cst_23 = arith.constant 0.000000e+00 : f32
    %38 = vector.broadcast %cst_23 : f32 to vector<4x4xf32>
    %39 = arith.cmpf ogt, %23, %38 : vector<4x4xf32>
    %cst_24 = arith.constant -9.000000e+15 : f32
    %40 = vector.broadcast %cst_24 : f32 to vector<4x4xf32>
    %41 = arith.select %39, %37, %40 : vector<4x4xi1>, vector<4x4xf32>
    %cst_25 = arith.constant dense<0xFF800000> : vector<4xf32>
    %42 = vector.multi_reduction <maximumf>, %41, %cst_25 [1] : vector<4x4xf32> to vector<4xf32>
    %43 = vector.shape_cast %42 : vector<4xf32> to vector<4x1xf32>
    %44 = vector.broadcast %43 : vector<4x1xf32> to vector<4x4xf32>
    %45 = arith.subf %41, %44 : vector<4x4xf32>
    %46 = math.exp %45 : vector<4x4xf32>
    %cst_26 = arith.constant dense<0.000000e+00> : vector<4xf32>
    %47 = vector.multi_reduction <add>, %46, %cst_26 [1] : vector<4x4xf32> to vector<4xf32>
    %48 = vector.shape_cast %47 : vector<4xf32> to vector<4x1xf32>
    %49 = tpu.reciprocal %48 {approx = true} : vector<4x1xf32> -> vector<4x1xf32>
    %50 = vector.broadcast %49 : vector<4x1xf32> to vector<4x4xf32>
    %51 = arith.mulf %46, %50 : vector<4x4xf32>
    %cst_27 = arith.constant dense<0.000000e+00> : vector<4x128xf32>
    %52 = tpu.matmul %51, %25, %cst_27 {dimension_numbers = #tpu.dot_dimension_numbers<[1], [0], [0], [1], [0, 0, 1, 1], [], []>} : vector<4x4xf32>, vector<4x128xf32>, vector<4x128xf32> -> vector<4x128xf32>
    %cst_28 = arith.constant 0.000000e+00 : f32
    %53 = vector.broadcast %cst_28 : f32 to vector<4x128xf32>
    %54 = arith.cmpf ogt, %52, %53 : vector<4x128xf32>
    %55 = math.exp %52 : vector<4x128xf32>
    %cst_29 = arith.constant 1.000000e+00 : f32
    %56 = vector.broadcast %cst_29 : f32 to vector<4x128xf32>
    %57 = arith.subf %55, %56 : vector<4x128xf32>
    %58 = arith.select %54, %52, %57 : vector<4x128xi1>, vector<4x128xf32>
    %59 = arith.index_cast %c0_i32 : i32 to index
    %c0_30 = arith.constant 0 : index
    %c0_31 = arith.constant 0 : index
    %60 = vector.load %arg8[%59, %c0_30, %c0_31] : memref<1x4x128xf32, #tpu.memory_space<vmem>>, vector<1x4x128xf32>
    %61 = vector.shape_cast %60 : vector<1x4x128xf32> to vector<4x128xf32>
    %62 = vector.shape_cast %58 : vector<4x128xf32> to vector<1x4x128xf32>
    tpu.vector_store %arg8[%59, %c0_30, %c0_31], %62 {strides = array<i32>} : memref<1x4x128xf32, #tpu.memory_space<vmem>>, vector<1x4x128xf32>,
    %c1_i32 = arith.constant 1 : i32
    return
  }
  func.func @transform_0(%arg0: i32) -> (i32, i32, i32) {
    %c0_i32 = arith.constant 0 : i32
    %c0_i32_0 = arith.constant 0 : i32
    %c0_i32_1 = arith.constant 0 : i32
    return %arg0, %c0_i32, %c0_i32_0 : i32, i32, i32
  }
  func.func @transform_1(%arg0: i32) -> (i32, i32) {
    %c0_i32 = arith.constant 0 : i32
    %c0_i32_0 = arith.constant 0 : i32
    %c0_i32_1 = arith.constant 0 : i32
    return %c0_i32, %c0_i32_0 : i32, i32
  }
  func.func @transform_2(%arg0: i32) -> (i32, i32) {
    %c0_i32 = arith.constant 0 : i32
    %c0_i32_0 = arith.constant 0 : i32
    %c0_i32_1 = arith.constant 0 : i32
    return %c0_i32, %c0_i32_0 : i32, i32
  }
  func.func @transform_3(%arg0: i32) -> (i32, i32) {
    %c0_i32 = arith.constant 0 : i32
    %c0_i32_0 = arith.constant 0 : i32
    %c0_i32_1 = arith.constant 0 : i32
    return %c0_i32, %c0_i32_0 : i32, i32
  }
  func.func @transform_4(%arg0: i32) -> (i32, i32) {
    %c0_i32 = arith.constant 0 : i32
    %c0_i32_0 = arith.constant 0 : i32
    %c0_i32_1 = arith.constant 0 : i32
    return %c0_i32, %c0_i32_0 : i32, i32
  }
  func.func @transform_5(%arg0: i32) -> (i32, i32) {
    %c0_i32 = arith.constant 0 : i32
    %c0_i32_0 = arith.constant 0 : i32
    %c0_i32_1 = arith.constant 0 : i32
    return %c0_i32, %c0_i32_0 : i32, i32
  }
  func.func @transform_6(%arg0: i32) -> (i32, i32) {
    %c0_i32 = arith.constant 0 : i32
    %c0_i32_0 = arith.constant 0 : i32
    %c0_i32_1 = arith.constant 0 : i32
    return %c0_i32, %c0_i32_0 : i32, i32
  }
  func.func @transform_7(%arg0: i32) -> (i32, i32, i32) {
    %c0_i32 = arith.constant 0 : i32
    %c0_i32_0 = arith.constant 0 : i32
    %c0_i32_1 = arith.constant 0 : i32
    return %arg0, %c0_i32, %c0_i32_0 : i32, i32, i32
  }
}

</mosaic_0001>

<bundles_post_ra>
// kernel: tpu_custom_call.1
= control target key start
LH: loop header
LB: loop body
LE: loop exit
PB: predicated region body
PF: predicated region fallthrough
CT: control target
= control target key end

     0   :  { %12 = vsyncpa [#allocation3], 0  ;;  %s7828_s0 = inlined_call_operand.hbm [shape: bf16[2,2048,256], index: 0, kind: input, shape index: {}]   ;;  %s7829_s1 = inlined_call_operand.hbm [shape: bf16[4,2048], index: 1, kind: input, shape index: {}]   ;;  %s7830_s2 = inlined_call_operand.hbm [shape: bf16[2048,128], index: 2, kind: input, shape index: {}]   ;;  %s7831_s3 = inlined_call_operand.hbm [shape: f32[1,128], index: 3, kind: input, shape index: {}]   ;;  %s7832_s4 = inlined_call_operand.hbm [shape: f32[128,128], index: 4, kind: input, shape index: {}]   ;;  %s7833_s5 = inlined_call_operand.vmem [shape: f32[128,1], index: 5, kind: input, shape index: {}]   ;;  %s7834_s6 = inlined_call_operand.hbm [shape: f32[1,128], index: 6, kind: input, shape index: {}]   ;;  %s7835_s7 = inlined_call_operand.hbm [shape: f32[2,4,128], index: 7, kind: output, shape index: {}]  }
   0x1   :  { %14 = vsyncpa [#allocation3 + $0x1], 0 }
   0x2   :  { %15 = vsyncpa [#allocation6], 0 }
   0x3   :  { %16 = vsyncpa [#allocation9], 0 }
   0x4   :  { %17 = vsyncpa [#allocation12], 0 }
   0x5   :  { %18 = vsyncpa [#allocation4], 0 }
   0x6   :  { %20 = vsyncpa [#allocation4 + $0x1], 0  ;;  %s6420_s24 = smov 0   ;;  %s6422_s25 = smov 0  }
   0x7   :  { %s6424_s26 = smov 0   ;;  %s6426_s27 = smov 0  }
   0x8 LB: > { %s6364_s28 = smov [#allocation5]   ;;  %s6441_s30 = sadd.s32 4294967295, %s6362_s27   ;;  %s6362_s27 = sphi %s6426_s27, %s8057_s27   ;;  %s6358_s26 = sphi %s6424_s26, %s8056_s26   ;;  %s6354_s25 = sphi %s6422_s25, %s8055_s25   ;;  %s6350_s24 = sphi %s6420_s24, %s8054_s24  }
   0x9   : > { %s222_s29 = sshll.u32 %s6364_s28, 4  ;;  %p4594_p0 = scmp.ge.s32.totalorder %s6362_s27, 1  ;;  %s223_s29 = int_to_ptr.vmem [resolvable:$true] %s222_s29 }
   0xa   : > { %p7836_p1 = scmp.eq.s32.totalorder %s6441_s30, 0  ;;  %p209_p2 = scmp.lt.s32.totalorder %s6362_s27, 3 }
   0xb   : > { %s6365_s9 = smov [#allocation8]   ;;  %s6366_s11 = smov [#allocation7]  }
   0xc   : > { %p6446_p3 = pnand %p4594_p0, %p209_p2  ;;  %s246_s10 = sshll.u32 %s6365_s9, 4  ;;  %s6453_s10 = int_to_ptr.vmem [resolvable:$true] %s246_s10 }
   0xd   : > { %s232_s12 = sshll.u32 %s6366_s11, 4  ;;  %s6114_s16 = scalar_lea.hbm %s7829_s1, 512  ;;  %s6461_s12 = int_to_ptr.vmem [resolvable:$true] %s232_s12 }
   0xe   : > { %s7905_s8 = scalar_select %p6446_p3, 1, 0 }
   0xf   : > { %p5406_p5 = pneg %p6446_p3  ;;  %p6115_p7 = scmp.ne.s32.totalorder %s7829_s1, %s6114_s16 }
  0x10   : > { %p6121_p11 = scmp.lt.u32.totalorder %s6114_s16, %s7829_s1 }
  0x11   : > { %p6457_p6 = pnand %p5406_p5, %p7836_p1 }
  0x13   : > { %p6471_p8 = pneg %p6457_p6 }
  0x15   : > { %p6117_p9 = pnand %p6471_p8, %p6115_p7 }
  0x17   : > { %p6118_p10 = pneg %p6117_p9 }
  0x19   : > { %p6123_p12 = pnand %p6121_p11, %p6118_p10 }
  0x1b   : > { %6126 = shalt.err (!%p6123_p12)
}
  0x1c   : > { %s6127_s22 = scalar_lea.vmem %s223_s29, 512  ;;  %p6135_p5 = scmp.lt.s32.totalorder %s223_s29, %s223_s29 }
  0x1d   : > { %p6128_p13 = scmp.ne.s32.totalorder %s223_s29, %s6127_s22  ;;  %p6136_p4 = scmp.lt.s32.totalorder %s6127_s22, %s6127_s22 }
  0x1f   : > { %p6130_p0 = pnand %p6128_p13, %p6471_p8  ;;  %p6137_p1 = por %p6136_p4, %p6135_p5 }
  0x21   : > { %p6131_p2 = pneg %p6130_p0 }
  0x23   : > { %p6138_p3 = pnand %p6137_p1, %p6131_p2 }
  0x25   : > { %6141 = shalt.err (!%p6138_p3)
}
  0x26   : > { %5409 = dma.hbm_to_vmem [thread:$0]  (!%p6457_p6), %s7829_s1, 512, %s223_s29, [#allocation6]  }
  0x27   : > { %s6142_s14 = scalar_lea.hbm %s7831_s3, 16 }
  0x28   : > { %p6143_p7 = scmp.ne.s32.totalorder %s7831_s3, %s6142_s14  ;;  %p6149_p1 = scmp.lt.u32.totalorder %s6142_s14, %s7831_s3 }
  0x2a   : > { %p6145_p9 = pnand %p6143_p7, %p6471_p8 }
  0x2c   : > { %p6146_p4 = pneg %p6145_p9 }
  0x2e   : > { %p6151_p3 = pnand %p6149_p1, %p6146_p4 }
  0x30   : > { %6154 = shalt.err (!%p6151_p3)
}
  0x31   : > { %s6155_s29 = scalar_lea.vmem %s6453_s10, 16  ;;  %s6162_s20 = scalar_lea.vmem %s6453_s10, 32 }
  0x32   : > { %p6156_p10 = scmp.ne.s32.totalorder %s6453_s10, %s6155_s29  ;;  %p6163_p13 = scmp.lt.s32.totalorder %s6453_s10, %s6453_s10 }
  0x33   : > { %p6164_p0 = scmp.lt.s32.totalorder %s6162_s20, %s6155_s29 }
  0x34   : > { %p6158_p11 = pnand %p6156_p10, %p6471_p8 }
  0x35   : > { %p6165_p2 = por %p6164_p0, %p6163_p13 }
  0x36   : > { %p6159_p12 = pneg %p6158_p11 }
  0x38   : > { %p6166_p5 = pnand %p6165_p2, %p6159_p12 }
  0x3a   : > { %6169 = shalt.err (!%p6166_p5)
}
  0x3b   : > { %5415 = dma.hbm_to_vmem [thread:$0]  (!%p6457_p6), %s7831_s3, 16, %s6453_s10, [#allocation9]  }
  0x3c   : > { %s6170_s9 = scalar_lea.hbm %s7830_s2, 16384 }
  0x3d   : > { %p6171_p7 = scmp.ne.s32.totalorder %s7830_s2, %s6170_s9  ;;  %p6177_p1 = scmp.lt.u32.totalorder %s6170_s9, %s7830_s2 }
  0x3f   : > { %p6173_p9 = pnand %p6171_p7, %p6471_p8 }
  0x41   : > { %p6174_p4 = pneg %p6173_p9 }
  0x43   : > { %p6179_p3 = pnand %p6177_p1, %p6174_p4 }
  0x45   : > { %6182 = shalt.err (!%p6179_p3)
}
  0x46   : > { %s6183_s10 = scalar_lea.vmem %s6461_s12, 16384  ;;  %p6191_p13 = scmp.lt.s32.totalorder %s6461_s12, %s6461_s12 }
  0x47   : > { %p6184_p10 = scmp.ne.s32.totalorder %s6461_s12, %s6183_s10  ;;  %p6192_p0 = scmp.lt.s32.totalorder %s6183_s10, %s6183_s10 }
  0x49   : > { %p6186_p11 = pnand %p6184_p10, %p6471_p8  ;;  %p6193_p2 = por %p6192_p0, %p6191_p13 }
  0x4b   : > { %p6187_p12 = pneg %p6186_p11 }
  0x4d   : > { %p6194_p5 = pnand %p6193_p2, %p6187_p12 }
  0x4f   : > { %6197 = shalt.err (!%p6194_p5)
}
  0x50   : > { %s6367_s17 = smov 64   ;;  %s6368_s18 = smov 4  }
  0x51   : > { %5412 = dma.hbm_to_vmem [thread:$0]  (!%p6457_p6), %s7830_s2, 16384, %s6461_s12, [#allocation6], %s6367_s17, %s6367_s17, %s6368_s18  }
  0x52   : > { %s6369_s21 = smov [#allocation10]   ;;  %s6198_s9 = scalar_lea.hbm %s7832_s4, 2048 }
  0x53   : > { %s256_s22 = sshll.u32 %s6369_s21, 4  ;;  %p6199_p7 = scmp.ne.s32.totalorder %s7832_s4, %s6198_s9  ;;  %s257_s22 = int_to_ptr.vmem [resolvable:$true] %s256_s22 }
  0x54   : > { %p6205_p1 = scmp.lt.u32.totalorder %s6198_s9, %s7832_s4 }
  0x55   : > { %p6201_p9 = pnand %p6199_p7, %p6471_p8 }
  0x57   : > { %p6202_p4 = pneg %p6201_p9 }
  0x59   : > { %p6207_p3 = pnand %p6205_p1, %p6202_p4 }
  0x5b   : > { %6210 = shalt.err (!%p6207_p3)
}
  0x5c   : > { %s6211_s12 = scalar_lea.vmem %s257_s22, 2048  ;;  %p6219_p13 = scmp.lt.s32.totalorder %s257_s22, %s257_s22 }
  0x5d   : > { %p6212_p10 = scmp.ne.s32.totalorder %s257_s22, %s6211_s12  ;;  %p6220_p0 = scmp.lt.s32.totalorder %s6211_s12, %s6211_s12 }
  0x5f   : > { %p6214_p11 = pnand %p6212_p10, %p6471_p8  ;;  %p6221_p2 = por %p6220_p0, %p6219_p13 }
  0x61   : > { %p6215_p12 = pneg %p6214_p11 }
  0x63   : > { %p6222_p5 = pnand %p6221_p2, %p6215_p12 }
  0x65   : > { %6225 = shalt.err (!%p6222_p5)
}
  0x66   : > { %s7838_s10 = smov 128   ;;  %s6371_s17 = smov 8  }
  0x67   : > { %5418 = dma.hbm_to_vmem [thread:$0]  (!%p6457_p6), %s7832_s4, 2048, %s257_s22, [#allocation9], %s7838_s10, %s7838_s10, %s6371_s17  }
  0x68   : > { %s6372_s20 = smov [#allocation11]   ;;  %s6226_s9 = scalar_lea.hbm %s7834_s6, 16 }
  0x69   : > { %s273_s21 = sshll.u32 %s6372_s20, 4  ;;  %p6227_p7 = scmp.ne.s32.totalorder %s7834_s6, %s6226_s9  ;;  %s274_s21 = int_to_ptr.vmem [resolvable:$true] %s273_s21 }
  0x6a   : > { %p6233_p1 = scmp.lt.u32.totalorder %s6226_s9, %s7834_s6 }
  0x6b   : > { %p6229_p9 = pnand %p6227_p7, %p6471_p8 }
  0x6d   : > { %p6230_p4 = pneg %p6229_p9 }
  0x6f   : > { %p6235_p3 = pnand %p6233_p1, %p6230_p4 }
  0x71   : > { %6238 = shalt.err (!%p6235_p3)
}
  0x72   : > { %s6239_s22 = scalar_lea.vmem %s274_s21, 16  ;;  %s6246_s12 = scalar_lea.vmem %s274_s21, 32 }
  0x73   : > { %p6240_p10 = scmp.ne.s32.totalorder %s274_s21, %s6239_s22  ;;  %p6247_p13 = scmp.lt.s32.totalorder %s274_s21, %s274_s21 }
  0x74   : > { %p6248_p0 = scmp.lt.s32.totalorder %s6246_s12, %s6239_s22 }
  0x75   : > { %p6242_p11 = pnand %p6240_p10, %p6471_p8 }
  0x76   : > { %p6249_p2 = por %p6248_p0, %p6247_p13 }
  0x77   : > { %p6243_p12 = pneg %p6242_p11 }
  0x79   : > { %p6250_p5 = pnand %p6249_p2, %p6243_p12 }
  0x7b   : > { %6253 = shalt.err (!%p6250_p5)
}
  0x7c   : > { %5421 = dma.hbm_to_vmem [thread:$0]  (!%p6457_p6), %s7834_s6, 16, %s274_s21, [#allocation12]  }
  0x7d   : > { %s4593_s19 = sadd.s32 4294967294, %s6362_s27   ;;  %s6575_s13 = sadd.s32 1, %s6362_s27  }
  0x7e   : > { %s33_s20 = sadd.s32 1, %s6358_s26  ;;  %s30_s23 = ssub.s32 %s6362_s27, %s6575_s13 }
  0x7f   : > { %p40_p8 = scmp.ne.s32.totalorder %s6358_s26, %s6354_s25  ;;  %p31_p7 = scmp.eq.s32.totalorder %s30_s23, 0 }
  0x80   : > { %p41_p9 = scmp.eq.s32.totalorder %s6362_s27, 0  ;;  %p46_p4 = scmp.ne.s32.totalorder %s6354_s25, %s6350_s24 }
  0x81   : > { %p196_p1 = scmp.eq.s32.totalorder %s6441_s30, 1  ;;  %p7908_p10 = scmp.eq.s32.totalorder %s6441_s30, 0 }
  0x82   : > { %s6587_s28 = scalar_select %p31_p7, %s6358_s26, %s33_s20  }
  0x83   : > { %p42_p3 = por %p41_p9, %p40_p8  ;;  %p6591_p11 = por %p7908_p10, %p46_p4 }
  0x84   : > { %p6595_p6 = por %p196_p1, %p40_p8  ;;  %p202_p12 = scmp.eq.s32.totalorder %s4593_s19, 1 }
  0x85   : > { %p5435_p13 = scmp.lt.s32.totalorder %s6362_s27, 2  ;;  %s284_s11 = sand.u32 1, %s6358_s26  }
  0x86   : > { %s7910_s21 = scalar_select %p6595_p6, 1, 0 }
  0x87   : > { %p6601_p0 = por %p202_p12, %p46_p4  ;;  %s4601_s15 = sshll.u32 %s284_s11, 11 }
  0x88   : > { %s5004_s16 = sshll.u32 %s6362_s27, 15  ;;  %s288_s29 = scalar_lea.vmem [#allocation2], %s4601_s15 }
  0x89   : > { %s7911_s14 = scalar_select %p6601_p0, 1, 0 }
  0x8a   : > { %s6609_s18 = scalar_lea.hbm %s7828_s0, %s5004_s16  ;;  %s295_s20 = sshll.u32 %s288_s29, 4  ;;  %s6615_s20 = int_to_ptr.vmem [resolvable:$true] %s295_s20 }
  0x8b   : > { %p6611_p2 = pnand %p5435_p13, %p42_p3  ;;  %s6617_s23 = scalar_lea.sflag [#allocation3], %s284_s11 }
  0x8c   : > { %s6254_s10 = scalar_lea.hbm %s6609_s18, 32768  ;;  %s6259_s22 = scalar_lea.hbm %s7828_s0, 65536 }
  0x8d   : > { %p6255_p5 = scmp.ne.s32.totalorder %s6609_s18, %s6254_s10  ;;  %p6256_p8 = pneg %p6611_p2 }
  0x8e   : > { %p6260_p4 = scmp.lt.u32.totalorder %s6609_s18, %s7828_s0  ;;  %p6261_p1 = scmp.lt.u32.totalorder %s6259_s22, %s6254_s10 }
  0x8f   : > { %p6257_p7 = pnand %p6256_p8, %p6255_p5  ;;  %p6263_p10 = scmp.lt.u32.totalorder %s6254_s10, %s6609_s18 }
  0x90   : > { %p6262_p3 = por %p6261_p1, %p6260_p4 }
  0x91   : > { %p6258_p9 = pneg %p6257_p7 }
  0x92   : > { %p6264_p12 = por %p6263_p10, %p6262_p3 }
  0x94   : > { %p6265_p13 = pnand %p6264_p12, %p6258_p9 }
  0x96   : > { %6268 = shalt.err (!%p6265_p13)
}
  0x97   : > { %s6269_s11 = scalar_lea.vmem %s6615_s20, 32768  ;;  %s6373_s15 = smov [#allocation2]  }
  0x98   : > { %p6270_p5 = scmp.ne.s32.totalorder %s6615_s20, %s6269_s11  ;;  %s6274_s16 = sshll.u32 %s6373_s15, 4  ;;  %s6275_s16 = int_to_ptr.vmem [resolvable:$false] %s6274_s16 }
  0x99   : > { %s6276_s12 = scalar_lea.vmem %s6275_s16, 65536  ;;  %p6277_p6 = scmp.lt.s32.totalorder %s6615_s20, %s6275_s16 }
  0x9a   : > { %p6272_p7 = pnand %p6270_p5, %p6256_p8  ;;  %p6278_p4 = scmp.lt.s32.totalorder %s6276_s12, %s6269_s11 }
  0x9c   : > { %p6273_p0 = pneg %p6272_p7  ;;  %p6279_p1 = por %p6278_p4, %p6277_p6 }
  0x9e   : > { %p6280_p3 = pnand %p6279_p1, %p6273_p0 }
  0xa0   : > { %6283 = shalt.err (!%p6280_p3)
}
  0xa1   : > { %s7913_s10 = smov 128   ;;  %p7914_p8 = scmp.ne.s32.totalorder %s7905_s8, 0 }
  0xa2   : > { %5425 = dma.hbm_to_vmem [thread:$0]  (!%p6611_p2), %s6609_s18, 32768, %s6615_s20, %s6617_s23, %s7913_s10, %s7913_s10, %s6371_s17  }
  0xa3   : > { %307 = sbr.rel (%p7914_p8) target bundleno = 3420 (0xd5c), region = 48 }
  0xaa   : > { %s6651_s22 = sand.u32 1, %s6354_s25  }
  0xab   : > { %s4605_s29 = sshll.u32 %s6651_s22, 11  ;;  %s310_s11 = scalar_lea.sflag [#allocation3], %s6651_s22 }
  0xac   : > { %s6655_s15 = scalar_lea.vmem [#allocation2], %s4605_s29 }
  0xad   : > { %6329 = dma.done.wait (%p6591_p11), %s310_s11, 32768  }
  0xae   : > { %6331 = vsyncadd (%p6591_p11), %s310_s11, 4294934528  ;;  %p7915_p6 = scmp.eq.s32.totalorder %s6441_s30, 0 }
  0xb0   : > { %6333 = dma.done.wait (%p7915_p6), [#allocation6], 16896   ;;  %p7916_p0 = pmov %p7915_p6 }
  0xb2   : > { %6335 = vsyncadd (%p7916_p0), [#allocation6], 4294950400  ;;  %p7917_p2 = pmov %p7916_p0 }
  0xb3   : > { %p7918_p9 = pmov %p7916_p0 }
  0xb4   : > { %6337 = dma.done.wait (%p7917_p2), [#allocation9], 2064  }
  0xb5   : > { %6339 = vsyncadd (%p7918_p9), [#allocation9], 4294965232  ;;  %p7919_p10 = pmov %p7916_p0 }
  0xb6   : > { %p7920_p12 = pmov %p7916_p0 }
  0xb7   : > { %6341 = dma.done.wait (%p7919_p10), [#allocation12], 16  }
  0xb8   : > { %6343 = vsyncadd (%p7920_p12), [#allocation12], 4294967280  ;;  %v5490_v0 = vld [vmem:[%s6655_s15 + $0x4] ss:$8 sps:$4 sm:$0xff]   ;;  %v5492_v1 = vld [vmem:[%s6655_s15] ss:$8 sps:$4 sm:$0xff]   ;;  %v633_v9 = vlaneseq }
  0xb9   : > { %1993 = vmatprep.subr.bf16.mxu0 %v5490_v0  ;;  %v5493_v2 = vld [vmem:[%s6655_s15 + $0x14] ss:$8 sps:$4 sm:$0xff]   ;;  %2343 = vmatprep.subr.bf16.mxu1 %v5490_v0  ;;  %v5495_v3 = vld [vmem:[%s6655_s15 + $0x10] ss:$8 sps:$4 sm:$0xff]   ;;  %v5496_v4 = vld [vmem:[%s6655_s15 + $0x24] ss:$8 sps:$4 sm:$0xff]  }
  0xba   : > { %1994 = vmatpush1.bf16.msra.mxu0 %v5492_v1  ;;  %2344 = vmatpush1.bf16.xpose.msra.mxu1 %v5492_v1  ;;  %v5498_v5 = vld [vmem:[%s6655_s15 + $0x20] ss:$8 sps:$4 sm:$0xff]   ;;  %v5499_v6 = vld [vmem:[%s6655_s15 + $0x34] ss:$8 sps:$4 sm:$0xff]   ;;  %v6374_v7 = vmov 1983009808  }
  0xbb   : > { %1995 = vmatprep.subr.bf16.mxu0 %v5493_v2  ;;  %2345 = vmatprep.subr.bf16.mxu1 %v5493_v2  ;;  %v631_v8 = vunpack.c.l.s4 %v6374_v7  ;;  %v5501_v10 = vld [vmem:[%s6655_s15 + $0x30] ss:$8 sps:$4 sm:$0xff]   ;;  %v5502_v11 = vld [vmem:[%s6655_s15 + $0x44] ss:$8 sps:$4 sm:$0xff]   ;;  %v6682_v13 = vshrl.u32 %v633_v9, 7  ;;  %vm2321_vm0 = vcmask 1043456  }
  0xbc   : > { %v5504_v14 = vld [vmem:[%s6655_s15 + $0x40] ss:$8 sps:$4 sm:$0xff]   ;;  %v5505_v15 = vld [vmem:[%s6655_s15 + $0x54] ss:$8 sps:$4 sm:$0xff]   ;;  %v5507_v17 = vld [vmem:[%s6655_s15 + $0x50] ss:$8 sps:$4 sm:$0xff]  }
  0xbd   : > { %v632_v12 = vunpack.c.0.s8 %v631_v8  ;;  %7921 = vst [vmem:[#allocation19_spill] sm:$0xff] %v6682_v13  ;;  %v5508_v18 = vld [vmem:[%s6655_s15 + $0x64] ss:$8 sps:$4 sm:$0xff]   ;;  %v5510_v21 = vld [vmem:[%s6655_s15 + $0x60] ss:$8 sps:$4 sm:$0xff]   ;;  %vm6377_vm1 = vmmov 0  }
  0xbe   : > { %1996 = vmatpush1.bf16.msra.mxu0 %v5495_v3  ;;  %v621_v19 = vld [vmem:[#allocation5] sm:$0xff]  ;;  %v5511_v22 = vld [vmem:[%s6655_s15 + $0x74] ss:$8 sps:$4 sm:$0xff]   ;;  %v5513_v24 = vld [vmem:[%s6655_s15 + $0x70] ss:$8 sps:$4 sm:$0xff]   ;;  %vm4366_vm3 = vcmask 27648  }
  0xbf   : > { %1997 = vmatprep.subr.bf16.mxu0 %v5496_v4  ;;  %v6687_v16 = vsub.s32 %v632_v12, %v6682_v13  ;;  %v5514_v25 = vld [vmem:[%s6655_s15 + $0x84] ss:$8 sps:$4 sm:$0xff]   ;;  %v5516_v26 = vld [vmem:[%s6655_s15 + $0x80] ss:$8 sps:$4 sm:$0xff]   ;;  %v5517_v27 = vld [vmem:[%s6655_s15 + $0x94] ss:$8 sps:$4 sm:$0xff]   ;;  %v629_v39 = vcombine.high %v621_v19, %v621_v19 }
  0xc0   : > { %v5519_v28 = vld [vmem:[%s6655_s15 + $0x90] ss:$8 sps:$4 sm:$0xff]   ;;  %v5520_v29 = vld [vmem:[%s6655_s15 + $0xa4] ss:$8 sps:$4 sm:$0xff]   ;;  %v5522_v30 = vld [vmem:[%s6655_s15 + $0xa0] ss:$8 sps:$4 sm:$0xff]  }
  0xc1   : > { %v636_v20 = vrot.slane %v621_v19, %v6687_v16  ;;  %v5523_v31 = vld [vmem:[%s6655_s15 + $0xb4] ss:$8 sps:$4 sm:$0xff]   ;;  %v6703_v32 = vld [vmem:[%s6655_s15 + $0xb0] ss:$8 sps:$4 sm:$0xff]   ;;  %v6706_v33 = vld [vmem:[%s6655_s15 + $0xc4] ss:$8 sps:$4 sm:$0xff]   ;;  %v6737_v42 = vrot.slane %v629_v39, %v6687_v16 }
  0xc2   : > { %1998 = vmatpush1.bf16.msra.mxu0 %v5498_v5  ;;  %2346 = vmatpush1.bf16.xpose.msra.mxu1 %v5495_v3  ;;  %v6710_v34 = vld [vmem:[%s6655_s15 + $0xc0] ss:$8 sps:$4 sm:$0xff]   ;;  %v6714_v35 = vld [vmem:[%s6655_s15 + $0xd4] ss:$8 sps:$4 sm:$0xff]   ;;  %v6718_v36 = vld [vmem:[%s6655_s15 + $0xd0] ss:$8 sps:$4 sm:$0xff]  }
  0xc3   : > { %1999 = vmatprep.subr.bf16.mxu0 %v5499_v6  ;;  %2347 = vmatprep.subr.bf16.mxu1 %v5496_v4  ;;  %v644_v23 = vcombine.high %v636_v20, %v636_v20  ;;  %v6722_v37 = vld [vmem:[%s6655_s15 + $0xe4] ss:$8 sps:$4 sm:$0xff]   ;;  %v6726_v38 = vld [vmem:[%s6655_s15 + $0xe0] ss:$8 sps:$4 sm:$0xff]   ;;  %v6730_v40 = vld [vmem:[%s6655_s15 + $0xf4] ss:$8 sps:$4 sm:$0xff]   ;;  %v645_v45 = vcombine.high %v6737_v42, %v6737_v42 }
  0xc4   : > { %v6734_v41 = vld [vmem:[%s6655_s15 + $0xf0] ss:$8 sps:$4 sm:$0xff]   ;;  %v6741_v43 = vld [vmem:[%s6655_s15 + $0x104] ss:$8 sps:$4 sm:$0xff]   ;;  %v5539_v44 = vld [vmem:[%s6655_s15 + $0x100] ss:$8 sps:$4 sm:$0xff]  }
  0xc5   : > { %2025 = vmatprep.mubr.bf16.mxu0 %v644_v23  ;;  %v5544_v46 = vld [vmem:[%s6655_s15 + $0x114] ss:$8 sps:$4 sm:$0xff]   ;;  %v5542_v47 = vld [vmem:[%s6655_s15 + $0x110] ss:$8 sps:$4 sm:$0xff]   ;;  %v5547_v48 = vld [vmem:[%s6655_s15 + $0x124] ss:$8 sps:$4 sm:$0xff]  }
  0xc6   : > { %2000 = vmatpush1.bf16.msra.mxu0 %v5501_v10  ;;  %v5545_v49 = vld [vmem:[%s6655_s15 + $0x120] ss:$8 sps:$4 sm:$0xff]   ;;  %v5550_v50 = vld [vmem:[%s6655_s15 + $0x134] ss:$8 sps:$4 sm:$0xff]   ;;  %v5548_v51 = vld [vmem:[%s6655_s15 + $0x130] ss:$8 sps:$4 sm:$0xff]  }
  0xc7   : > { %2001 = vmatprep.subr.bf16.mxu0 %v5502_v11  ;;  %v5553_v52 = vld [vmem:[%s6655_s15 + $0x144] ss:$8 sps:$4 sm:$0xff]   ;;  %v5551_v53 = vld [vmem:[%s6655_s15 + $0x140] ss:$8 sps:$4 sm:$0xff]   ;;  %v5556_v54 = vld [vmem:[%s6655_s15 + $0x154] ss:$8 sps:$4 sm:$0xff]  }
  0xc8   : > { %v5554_v55 = vld [vmem:[%s6655_s15 + $0x150] ss:$8 sps:$4 sm:$0xff]   ;;  %v5559_v56 = vld [vmem:[%s6655_s15 + $0x164] ss:$8 sps:$4 sm:$0xff]   ;;  %v5557_v57 = vld [vmem:[%s6655_s15 + $0x160] ss:$8 sps:$4 sm:$0xff]  }
  0xc9   : > { %v5562_v58 = vld [vmem:[%s6655_s15 + $0x174] ss:$8 sps:$4 sm:$0xff]   ;;  %v5560_v59 = vld [vmem:[%s6655_s15 + $0x170] ss:$8 sps:$4 sm:$0xff]   ;;  %v5565_v60 = vld [vmem:[%s6655_s15 + $0x184] ss:$8 sps:$4 sm:$0xff]  }
  0xca   : > { %2002 = vmatpush1.bf16.msra.mxu0 %v5504_v14  ;;  %2348 = vmatpush1.bf16.xpose.msra.mxu1 %v5498_v5  ;;  %v5563_v61 = vld [vmem:[%s6655_s15 + $0x180] ss:$8 sps:$4 sm:$0xff]   ;;  %v5568_v62 = vld [vmem:[%s6655_s15 + $0x194] ss:$8 sps:$4 sm:$0xff]   ;;  %v5566_v63 = vld [vmem:[%s6655_s15 + $0x190] ss:$8 sps:$4 sm:$0xff]  }
  0xcb   : > { %2003 = vmatprep.subr.bf16.mxu0 %v5505_v15  ;;  %2349 = vmatprep.subr.bf16.mxu1 %v5499_v6  ;;  %v5571_v0 = vld [vmem:[%s6655_s15 + $0x1a4] ss:$8 sps:$4 sm:$0xff]   ;;  %v5569_v1 = vld [vmem:[%s6655_s15 + $0x1a0] ss:$8 sps:$4 sm:$0xff]   ;;  %v5574_v2 = vld [vmem:[%s6655_s15 + $0x1b4] ss:$8 sps:$4 sm:$0xff]  }
  0xcc   : > { %v5572_v3 = vld [vmem:[%s6655_s15 + $0x1b0] ss:$8 sps:$4 sm:$0xff]   ;;  %v5577_v4 = vld [vmem:[%s6655_s15 + $0x1c4] ss:$8 sps:$4 sm:$0xff]   ;;  %v5575_v5 = vld [vmem:[%s6655_s15 + $0x1c0] ss:$8 sps:$4 sm:$0xff]  }
  0xcd   : > { %v5580_v6 = vld [vmem:[%s6655_s15 + $0x1d4] ss:$8 sps:$4 sm:$0xff]   ;;  %v5578_v7 = vld [vmem:[%s6655_s15 + $0x1d0] ss:$8 sps:$4 sm:$0xff]   ;;  %v5583_v8 = vld [vmem:[%s6655_s15 + $0x1e4] ss:$8 sps:$4 sm:$0xff]  }
  0xce   : > { %2004 = vmatpush1.bf16.msra.mxu0 %v5507_v17  ;;  %v5581_v9 = vld [vmem:[%s6655_s15 + $0x1e0] ss:$8 sps:$4 sm:$0xff]   ;;  %v5584_v12 = vld [vmem:[%s6655_s15 + $0x1f0] ss:$8 sps:$4 sm:$0xff]   ;;  %v5598_v23 = vld [vmem:[%s6655_s15 + $0x234] ss:$8 sps:$4 sm:$0xff]  }
  0xcf   : > { %2005 = vmatprep.subr.bf16.mxu0 %v5508_v18  ;;  %v5622_v39 = vld [vmem:[%s6655_s15 + $0x2b4] ss:$8 sps:$4 sm:$0xff]   ;;  %v7130_v13 = vld [vmem:[%s6655_s15 + $0x5e0] ss:$8 sps:$4 sm:$0xff]   ;;  %vm4378_vm5 = vcmask 31744   ;;  %s4611_s23 = sshll.u32 %s6651_s22, 2 }
  0xd0   : > { %7951 = vst [vmem:[#allocation49_spill] sm:$0xff] %v7130_v13  ;;  %s5001_s16 = sshll.u32 %s6441_s30, 6  ;;  %s363_s12 = scalar_lea.vmem [#allocation13], %s4611_s23 }
  0xd1   : > { %s4475_s10 = sshll.u32 %s363_s12, 4  ;;  %s4462_s8 = scalar_lea.sflag [#allocation4], %s6651_s22  ;;  %s7786_s10 = int_to_ptr.vmem [resolvable:$true] %s4475_s10 }
  0xd2   : > { %2006 = vmatpush1.bf16.msra.mxu0 %v5510_v21  ;;  %2350 = vmatpush1.bf16.xpose.msra.mxu1 %v5501_v10  ;;  %v5586_v10 = vld [vmem:[%s6655_s15 + $0x1f4] ss:$8 sps:$4 sm:$0xff]   ;;  %s6284_s17 = scalar_lea.vmem %s7786_s10, 64  ;;  %p8051_p13 = scmp.ne.s32.totalorder %s7910_s21, 0 }
  0xd3   : > { %2007 = vmatprep.subr.bf16.mxu0 %v5511_v22  ;;  %2351 = vmatprep.subr.bf16.mxu1 %v5502_v11  ;;  %v6785_v11 = vld [vmem:[#allocation5 + $0x8] sm:$0xff]  ;;  %p6285_p11 = scmp.ne.s32.totalorder %s7786_s10, %s6284_s17  ;;  %s6379_s30 = smov [#allocation13]  }
  0xd4   : > { %s6288_s9 = sshll.u32 %s6379_s30, 4  ;;  %s6289_s9 = int_to_ptr.vmem [resolvable:$false] %s6288_s9 }
  0xd5   : > { %p6286_p5 = pnand %p6285_p11, %p8051_p13  ;;  %s6290_s18 = scalar_lea.vmem %s6289_s9, 128 }
  0xd6   : > { %2008 = vmatpush1.bf16.msra.mxu0 %v5513_v24  ;;  %p6291_p4 = scmp.lt.s32.totalorder %s7786_s10, %s6289_s9  ;;  %p6292_p1 = scmp.lt.s32.totalorder %s6290_s18, %s6284_s17 }
  0xd7   : > { %2009 = vmatprep.subr.bf16.mxu0 %v5514_v25  ;;  %p6287_p7 = pneg %p6286_p5 }
  0xd8   : > { %p6293_p3 = por %p6292_p1, %p6291_p4 }
  0xda   : > { %2010 = vmatpush1.bf16.msra.mxu0 %v5516_v26  ;;  %2352 = vmatpush1.bf16.xpose.msra.mxu1 %v5504_v14  ;;  %v5589_v14 = vld [vmem:[%s6655_s15 + $0x204] ss:$8 sps:$4 sm:$0xff]   ;;  %p6294_p8 = pnand %p6293_p3, %p6287_p7 }
  0xdb   : > { %2011 = vmatprep.subr.bf16.mxu0 %v5517_v27  ;;  %2353 = vmatprep.subr.bf16.mxu1 %v5505_v15  ;;  %v6791_v15 = vrot.slane %v6785_v11, %v6687_v16 }
  0xdd   : > { %v661_v19 = vcombine.high %v6791_v15, %v6791_v15 }
  0xde   : > { %2012 = vmatpush1.bf16.msra.mxu0 %v5519_v28 }
  0xdf   : > { %2013 = vmatprep.subr.bf16.mxu0 %v5520_v29 }
  0xe2   : > { %2014 = vmatpush1.bf16.msra.mxu0 %v5522_v30  ;;  %2354 = vmatpush1.bf16.xpose.msra.mxu1 %v5507_v17  ;;  %v5587_v17 = vld [vmem:[%s6655_s15 + $0x200] ss:$8 sps:$4 sm:$0xff]  }
  0xe3   : > { %2015 = vmatprep.subr.bf16.mxu0 %v5523_v31  ;;  %2355 = vmatprep.subr.bf16.mxu1 %v5508_v18  ;;  %v5592_v18 = vld [vmem:[%s6655_s15 + $0x214] ss:$8 sps:$4 sm:$0xff]  }
  0xe6   : > { %2016 = vmatpush1.bf16.msra.mxu0 %v6703_v32 }
  0xe7   : > { %2017 = vmatprep.subr.bf16.mxu0 %v6706_v33 }
  0xea   : > { %2018 = vmatpush1.bf16.msra.mxu0 %v6710_v34  ;;  %2356 = vmatpush1.bf16.xpose.msra.mxu1 %v5510_v21  ;;  %v5595_v21 = vld [vmem:[%s6655_s15 + $0x224] ss:$8 sps:$4 sm:$0xff]  }
  0xeb   : > { %2019 = vmatprep.subr.bf16.mxu0 %v6714_v35  ;;  %2357 = vmatprep.subr.bf16.mxu1 %v5511_v22  ;;  %v5593_v22 = vld [vmem:[%s6655_s15 + $0x220] ss:$8 sps:$4 sm:$0xff]  }
  0xee   : > { %2020 = vmatpush1.bf16.msra.mxu0 %v6718_v36 }
  0xef   : > { %2021 = vmatprep.subr.bf16.mxu0 %v6722_v37 }
  0xf2   : > { %2022 = vmatpush1.bf16.msra.mxu0 %v6726_v38  ;;  %2358 = vmatpush1.bf16.xpose.msra.mxu1 %v5513_v24  ;;  %v5596_v24 = vld [vmem:[%s6655_s15 + $0x230] ss:$8 sps:$4 sm:$0xff]  }
  0xf3   : > { %2023 = vmatprep.subr.bf16.mxu0 %v6730_v40  ;;  %2359 = vmatprep.subr.bf16.mxu1 %v5514_v25  ;;  %v5601_v25 = vld [vmem:[%s6655_s15 + $0x244] ss:$8 sps:$4 sm:$0xff]  }
  0xf6   : > { %2024 = vmatpush1.bf16.msra.mxu0 %v6734_v41 }
  0xf7   : > { %2034 = vmatprep.subr.bf16.mxu0 %v6741_v43 }
  0xf9   : > { %2026 = vmatmul.mubr.bf16.vlgmr.msra.gmra.mrb[0].mxu0 %v636_v20  ;;  %v5590_v20 = vld [vmem:[%s6655_s15 + $0x210] ss:$8 sps:$4 sm:$0xff]  }
  0xfa   : > { %2035 = vmatpush1.bf16.msra.mxu0 %v5539_v44  ;;  %2066 = vmatprep.mubr.bf16.mxu0 %v645_v45  ;;  %v5626_v44 = vld [vmem:[%s6655_s15 + $0x2d0] ss:$8 sps:$4 sm:$0xff]   ;;  %v5631_v45 = vld [vmem:[%s6655_s15 + $0x2e4] ss:$8 sps:$4 sm:$0xff]  }
  0xfb   : > { %2036 = vmatprep.subr.bf16.mxu0 %v5544_v46  ;;  %2360 = vmatpush1.bf16.xpose.msra.mxu1 %v5516_v26  ;;  %v5599_v26 = vld [vmem:[%s6655_s15 + $0x240] ss:$8 sps:$4 sm:$0xff]  }
  0xfc   : > { %2361 = vmatprep.subr.bf16.mxu1 %v5517_v27  ;;  %v5604_v27 = vld [vmem:[%s6655_s15 + $0x254] ss:$8 sps:$4 sm:$0xff]   ;;  %v5629_v46 = vld [vmem:[%s6655_s15 + $0x2e0] ss:$8 sps:$4 sm:$0xff]  }
  0xfe   : > { %2037 = vmatpush1.bf16.msra.mxu0 %v5542_v47  ;;  %v5634_v47 = vld [vmem:[%s6655_s15 + $0x2f4] ss:$8 sps:$4 sm:$0xff]  }
  0xff   : > { %2038 = vmatprep.subr.bf16.mxu0 %v5547_v48  ;;  %v646_v48 = vcombine.high %v6785_v11, %v6785_v11  ;;  %v5668_v11 = vld [vmem:[%s6655_s15 + $0x3b0] ss:$8 sps:$4 sm:$0xff]  }
 0x102   : > { %2039 = vmatpush1.bf16.msra.mxu0 %v5545_v49  ;;  %v5632_v49 = vld [vmem:[%s6655_s15 + $0x2f0] ss:$8 sps:$4 sm:$0xff]  }
 0x103   : > { %2040 = vmatprep.subr.bf16.mxu0 %v5550_v50  ;;  %2362 = vmatpush1.bf16.xpose.msra.mxu1 %v5519_v28  ;;  %v5602_v28 = vld [vmem:[%s6655_s15 + $0x250] ss:$8 sps:$4 sm:$0xff]   ;;  %v5637_v50 = vld [vmem:[%s6655_s15 + $0x304] ss:$8 sps:$4 sm:$0xff]  }
 0x104   : > { %2363 = vmatprep.subr.bf16.mxu1 %v5520_v29  ;;  %v5607_v29 = vld [vmem:[%s6655_s15 + $0x264] ss:$8 sps:$4 sm:$0xff]  }
 0x106   : > { %2041 = vmatpush1.bf16.msra.mxu0 %v5548_v51  ;;  %v6833_v51 = vrot.slane %v646_v48, %v6687_v16  ;;  %v6970_v48 = vld [vmem:[%s6655_s15 + $0x4b0] ss:$8 sps:$4 sm:$0xff]  }
 0x107   : > { %2042 = vmatprep.subr.bf16.mxu0 %v5553_v52  ;;  %v5635_v52 = vld [vmem:[%s6655_s15 + $0x300] ss:$8 sps:$4 sm:$0xff]  }
 0x10a   : > { %2043 = vmatpush1.bf16.msra.mxu0 %v5551_v53  ;;  %v5640_v53 = vld [vmem:[%s6655_s15 + $0x314] ss:$8 sps:$4 sm:$0xff]  }
 0x10b   : > { %2044 = vmatprep.subr.bf16.mxu0 %v5556_v54  ;;  %2364 = vmatpush1.bf16.xpose.msra.mxu1 %v5522_v30  ;;  %v5605_v30 = vld [vmem:[%s6655_s15 + $0x260] ss:$8 sps:$4 sm:$0xff]   ;;  %v662_v54 = vcombine.high %v6833_v51, %v6833_v51 }
 0x10c   : > { %2365 = vmatprep.subr.bf16.mxu1 %v5523_v31  ;;  %v5610_v31 = vld [vmem:[%s6655_s15 + $0x274] ss:$8 sps:$4 sm:$0xff]  }
 0x10e   : > { %2045 = vmatpush1.bf16.msra.mxu0 %v5554_v55  ;;  %v5638_v55 = vld [vmem:[%s6655_s15 + $0x310] ss:$8 sps:$4 sm:$0xff]  }
 0x10f   : > { %2046 = vmatprep.subr.bf16.mxu0 %v5559_v56  ;;  %v5643_v56 = vld [vmem:[%s6655_s15 + $0x324] ss:$8 sps:$4 sm:$0xff]  }
 0x112   : > { %2047 = vmatpush1.bf16.msra.mxu0 %v5557_v57  ;;  %v5641_v57 = vld [vmem:[%s6655_s15 + $0x320] ss:$8 sps:$4 sm:$0xff]  }
 0x113   : > { %2048 = vmatprep.subr.bf16.mxu0 %v5562_v58  ;;  %2366 = vmatpush1.bf16.xpose.msra.mxu1 %v6703_v32  ;;  %v5608_v32 = vld [vmem:[%s6655_s15 + $0x270] ss:$8 sps:$4 sm:$0xff]   ;;  %v5646_v58 = vld [vmem:[%s6655_s15 + $0x334] ss:$8 sps:$4 sm:$0xff]  }
 0x114   : > { %2367 = vmatprep.subr.bf16.mxu1 %v6706_v33  ;;  %v5613_v33 = vld [vmem:[%s6655_s15 + $0x284] ss:$8 sps:$4 sm:$0xff]  }
 0x116   : > { %2049 = vmatpush1.bf16.msra.mxu0 %v5560_v59  ;;  %v5644_v59 = vld [vmem:[%s6655_s15 + $0x330] ss:$8 sps:$4 sm:$0xff]  }
 0x117   : > { %2050 = vmatprep.subr.bf16.mxu0 %v5565_v60  ;;  %v5649_v60 = vld [vmem:[%s6655_s15 + $0x344] ss:$8 sps:$4 sm:$0xff]  }
 0x11a   : > { %2051 = vmatpush1.bf16.msra.mxu0 %v5563_v61  ;;  %v5647_v61 = vld [vmem:[%s6655_s15 + $0x340] ss:$8 sps:$4 sm:$0xff]  }
 0x11b   : > { %2052 = vmatprep.subr.bf16.mxu0 %v5568_v62  ;;  %2368 = vmatpush1.bf16.xpose.msra.mxu1 %v6710_v34  ;;  %v5611_v34 = vld [vmem:[%s6655_s15 + $0x280] ss:$8 sps:$4 sm:$0xff]   ;;  %v5652_v62 = vld [vmem:[%s6655_s15 + $0x354] ss:$8 sps:$4 sm:$0xff]  }
 0x11c   : > { %2369 = vmatprep.subr.bf16.mxu1 %v6714_v35  ;;  %v5616_v35 = vld [vmem:[%s6655_s15 + $0x294] ss:$8 sps:$4 sm:$0xff]  }
 0x11e   : > { %2053 = vmatpush1.bf16.msra.mxu0 %v5566_v63  ;;  %v5650_v63 = vld [vmem:[%s6655_s15 + $0x350] ss:$8 sps:$4 sm:$0xff]  }
 0x11f   : > { %2054 = vmatprep.subr.bf16.mxu0 %v5571_v0  ;;  %v5655_v0 = vld [vmem:[%s6655_s15 + $0x364] ss:$8 sps:$4 sm:$0xff]  }
 0x122   : > { %2055 = vmatpush1.bf16.msra.mxu0 %v5569_v1  ;;  %v5653_v1 = vld [vmem:[%s6655_s15 + $0x360] ss:$8 sps:$4 sm:$0xff]  }
 0x123   : > { %2056 = vmatprep.subr.bf16.mxu0 %v5574_v2  ;;  %2370 = vmatpush1.bf16.xpose.msra.mxu1 %v6718_v36  ;;  %v5614_v36 = vld [vmem:[%s6655_s15 + $0x290] ss:$8 sps:$4 sm:$0xff]   ;;  %v5658_v2 = vld [vmem:[%s6655_s15 + $0x374] ss:$8 sps:$4 sm:$0xff]  }
 0x124   : > { %2371 = vmatprep.subr.bf16.mxu1 %v6722_v37  ;;  %v5619_v37 = vld [vmem:[%s6655_s15 + $0x2a4] ss:$8 sps:$4 sm:$0xff]  }
 0x126   : > { %2057 = vmatpush1.bf16.msra.mxu0 %v5572_v3  ;;  %v5656_v3 = vld [vmem:[%s6655_s15 + $0x370] ss:$8 sps:$4 sm:$0xff]  }
 0x127   : > { %2058 = vmatprep.subr.bf16.mxu0 %v5577_v4  ;;  %v5661_v4 = vld [vmem:[%s6655_s15 + $0x384] ss:$8 sps:$4 sm:$0xff]  }
 0x12a   : > { %2059 = vmatpush1.bf16.msra.mxu0 %v5575_v5  ;;  %v5659_v5 = vld [vmem:[%s6655_s15 + $0x380] ss:$8 sps:$4 sm:$0xff]  }
 0x12b   : > { %2060 = vmatprep.subr.bf16.mxu0 %v5580_v6  ;;  %2372 = vmatpush1.bf16.xpose.msra.mxu1 %v6726_v38  ;;  %v5617_v38 = vld [vmem:[%s6655_s15 + $0x2a0] ss:$8 sps:$4 sm:$0xff]   ;;  %v5664_v6 = vld [vmem:[%s6655_s15 + $0x394] ss:$8 sps:$4 sm:$0xff]  }
 0x12c   : > { %2373 = vmatprep.subr.bf16.mxu1 %v6730_v40  ;;  %v5620_v40 = vld [vmem:[%s6655_s15 + $0x2b0] ss:$8 sps:$4 sm:$0xff]  }
 0x12e   : > { %2061 = vmatpush1.bf16.msra.mxu0 %v5578_v7  ;;  %v5662_v7 = vld [vmem:[%s6655_s15 + $0x390] ss:$8 sps:$4 sm:$0xff]  }
 0x12f   : > { %2062 = vmatprep.subr.bf16.mxu0 %v5583_v8  ;;  %v5667_v8 = vld [vmem:[%s6655_s15 + $0x3a4] ss:$8 sps:$4 sm:$0xff]  }
 0x132   : > { %2063 = vmatpush1.bf16.msra.mxu0 %v5581_v9  ;;  %v5665_v9 = vld [vmem:[%s6655_s15 + $0x3a0] ss:$8 sps:$4 sm:$0xff]  }
 0x133   : > { %2064 = vmatprep.subr.bf16.mxu0 %v5586_v10  ;;  %2374 = vmatpush1.bf16.xpose.msra.mxu1 %v6734_v41  ;;  %v5625_v41 = vld [vmem:[%s6655_s15 + $0x2c4] ss:$8 sps:$4 sm:$0xff]   ;;  %v5670_v10 = vld [vmem:[%s6655_s15 + $0x3b4] ss:$8 sps:$4 sm:$0xff]  }
 0x134   : > { %2384 = vmatprep.subr.bf16.mxu1 %v6741_v43  ;;  %v5628_v43 = vld [vmem:[%s6655_s15 + $0x2d4] ss:$8 sps:$4 sm:$0xff]  }
 0x136   : > { %2065 = vmatpush1.bf16.msra.mxu0 %v5584_v12  ;;  %v5673_v12 = vld [vmem:[%s6655_s15 + $0x3c4] ss:$8 sps:$4 sm:$0xff]  }
 0x137   : > { %2075 = vmatprep.subr.bf16.mxu0 %v5589_v14  ;;  %v5671_v14 = vld [vmem:[%s6655_s15 + $0x3c0] ss:$8 sps:$4 sm:$0xff]  }
 0x139   : > { %2067 = vmatmul.mubr.bf16.vlgmr.msra.gmra.mrb[0].mxu0 %v6737_v42  ;;  %v5623_v42 = vld [vmem:[%s6655_s15 + $0x2c0] ss:$8 sps:$4 sm:$0xff]  }
 0x13a   : > { %2076 = vmatpush1.bf16.msra.mxu0 %v5587_v17  ;;  %2107 = vmatprep.mubr.bf16.mxu0 %v661_v19  ;;  %v5674_v17 = vld [vmem:[%s6655_s15 + $0x3d0] ss:$8 sps:$4 sm:$0xff]   ;;  %v5677_v19 = vld [vmem:[%s6655_s15 + $0x3e0] ss:$8 sps:$4 sm:$0xff]  }
 0x13b   : > { %2077 = vmatprep.subr.bf16.mxu0 %v5592_v18  ;;  %v5679_v18 = vld [vmem:[%s6655_s15 + $0x3e4] ss:$8 sps:$4 sm:$0xff]  }
 0x13e   : > { %2078 = vmatpush1.bf16.msra.mxu0 %v5590_v20  ;;  %v5682_v20 = vld [vmem:[%s6655_s15 + $0x3f4] ss:$8 sps:$4 sm:$0xff]  }
 0x13f   : > { %2079 = vmatprep.subr.bf16.mxu0 %v5595_v21  ;;  %v6868_v21 = vld [vmem:[#allocation5 + $0x10] sm:$0xff] }
 0x142   : > { %2080 = vmatpush1.bf16.msra.mxu0 %v5593_v22  ;;  %v5680_v22 = vld [vmem:[%s6655_s15 + $0x3f0] ss:$8 sps:$4 sm:$0xff]  }
 0x143   : > { %2081 = vmatprep.subr.bf16.mxu0 %v5598_v23  ;;  %v6873_v23 = vrot.slane %v6868_v21, %v6687_v16 }
 0x146   : > { %2082 = vmatpush1.bf16.msra.mxu0 %v5596_v24  ;;  %v6876_v24 = vld [vmem:[%s6655_s15 + $0x404] ss:$8 sps:$4 sm:$0xff]  }
 0x147   : > { %2083 = vmatprep.subr.bf16.mxu0 %v5601_v25  ;;  %v6879_v25 = vld [vmem:[%s6655_s15 + $0x400] ss:$8 sps:$4 sm:$0xff]  }
 0x14a   : > { %2084 = vmatpush1.bf16.msra.mxu0 %v5599_v26  ;;  %v678_v26 = vcombine.high %v6873_v23, %v6873_v23 }
 0x14b   : > { %2085 = vmatprep.subr.bf16.mxu0 %v5604_v27  ;;  %v6885_v27 = vld [vmem:[%s6655_s15 + $0x414] ss:$8 sps:$4 sm:$0xff]  }
 0x14e   : > { %2086 = vmatpush1.bf16.msra.mxu0 %v5602_v28  ;;  %v6890_v28 = vld [vmem:[%s6655_s15 + $0x410] ss:$8 sps:$4 sm:$0xff]  }
 0x14f   : > { %2087 = vmatprep.subr.bf16.mxu0 %v5607_v29  ;;  %v6894_v29 = vld [vmem:[%s6655_s15 + $0x424] ss:$8 sps:$4 sm:$0xff]  }
 0x152   : > { %2088 = vmatpush1.bf16.msra.mxu0 %v5605_v30  ;;  %v6898_v30 = vld [vmem:[%s6655_s15 + $0x420] ss:$8 sps:$4 sm:$0xff]  }
 0x153   : > { %2089 = vmatprep.subr.bf16.mxu0 %v5610_v31  ;;  %v6902_v31 = vld [vmem:[%s6655_s15 + $0x434] ss:$8 sps:$4 sm:$0xff]  }
 0x156   : > { %2090 = vmatpush1.bf16.msra.mxu0 %v5608_v32  ;;  %v6906_v32 = vld [vmem:[%s6655_s15 + $0x430] ss:$8 sps:$4 sm:$0xff]  }
 0x157   : > { %2091 = vmatprep.subr.bf16.mxu0 %v5613_v33  ;;  %v6910_v33 = vld [vmem:[%s6655_s15 + $0x444] ss:$8 sps:$4 sm:$0xff]  }
 0x15a   : > { %2092 = vmatpush1.bf16.msra.mxu0 %v5611_v34  ;;  %v6914_v34 = vld [vmem:[%s6655_s15 + $0x440] ss:$8 sps:$4 sm:$0xff]  }
 0x15b   : > { %2093 = vmatprep.subr.bf16.mxu0 %v5616_v35  ;;  %v6918_v35 = vld [vmem:[%s6655_s15 + $0x454] ss:$8 sps:$4 sm:$0xff]  }
 0x15e   : > { %2094 = vmatpush1.bf16.msra.mxu0 %v5614_v36  ;;  %v6922_v36 = vld [vmem:[%s6655_s15 + $0x450] ss:$8 sps:$4 sm:$0xff]  }
 0x15f   : > { %2095 = vmatprep.subr.bf16.mxu0 %v5619_v37  ;;  %v6926_v37 = vld [vmem:[%s6655_s15 + $0x464] ss:$8 sps:$4 sm:$0xff]  }
 0x162   : > { %2096 = vmatpush1.bf16.msra.mxu0 %v5617_v38  ;;  %v6930_v38 = vld [vmem:[%s6655_s15 + $0x460] ss:$8 sps:$4 sm:$0xff]  }
 0x163   : > { %2097 = vmatprep.subr.bf16.mxu0 %v5622_v39  ;;  %v6934_v39 = vld [vmem:[%s6655_s15 + $0x474] ss:$8 sps:$4 sm:$0xff]  }
 0x166   : > { %2098 = vmatpush1.bf16.msra.mxu0 %v5620_v40  ;;  %v6938_v40 = vld [vmem:[%s6655_s15 + $0x470] ss:$8 sps:$4 sm:$0xff]  }
 0x167   : > { %2099 = vmatprep.subr.bf16.mxu0 %v5625_v41  ;;  %v6942_v41 = vld [vmem:[%s6655_s15 + $0x484] ss:$8 sps:$4 sm:$0xff]  }
 0x16a   : > { %2100 = vmatpush1.bf16.msra.mxu0 %v5623_v42  ;;  %v6946_v42 = vld [vmem:[%s6655_s15 + $0x480] ss:$8 sps:$4 sm:$0xff]  }
 0x16b   : > { %2101 = vmatprep.subr.bf16.mxu0 %v5628_v43  ;;  %v6950_v43 = vld [vmem:[%s6655_s15 + $0x494] ss:$8 sps:$4 sm:$0xff]  }
 0x16e   : > { %2102 = vmatpush1.bf16.msra.mxu0 %v5626_v44  ;;  %v6954_v44 = vld [vmem:[%s6655_s15 + $0x490] ss:$8 sps:$4 sm:$0xff]  }
 0x16f   : > { %2103 = vmatprep.subr.bf16.mxu0 %v5631_v45  ;;  %v6958_v45 = vld [vmem:[%s6655_s15 + $0x4a4] ss:$8 sps:$4 sm:$0xff]  }
 0x172   : > { %2104 = vmatpush1.bf16.msra.mxu0 %v5629_v46  ;;  %v6962_v46 = vld [vmem:[%s6655_s15 + $0x4a0] ss:$8 sps:$4 sm:$0xff]  }
 0x173   : > { %2105 = vmatprep.subr.bf16.mxu0 %v5634_v47  ;;  %v6966_v47 = vld [vmem:[%s6655_s15 + $0x4b4] ss:$8 sps:$4 sm:$0xff]  }
 0x176   : > { %2106 = vmatpush1.bf16.msra.mxu0 %v5632_v49  ;;  %v6974_v49 = vld [vmem:[%s6655_s15 + $0x4c4] ss:$8 sps:$4 sm:$0xff]  }
 0x177   : > { %2116 = vmatprep.subr.bf16.mxu0 %v5637_v50  ;;  %v6978_v50 = vld [vmem:[%s6655_s15 + $0x4c0] ss:$8 sps:$4 sm:$0xff]  }
 0x179   : > { %2108 = vmatmul.mubr.bf16.vlgmr.msra.gmra.mrb[0].mxu0 %v6791_v15  ;;  %v5676_v15 = vld [vmem:[%s6655_s15 + $0x3d4] ss:$8 sps:$4 sm:$0xff]  }
 0x17a   : > { %2117 = vmatpush1.bf16.msra.mxu0 %v5635_v52  ;;  %2148 = vmatprep.mubr.bf16.mxu0 %v662_v54  ;;  %v6986_v52 = vld [vmem:[%s6655_s15 + $0x4d0] ss:$8 sps:$4 sm:$0xff]   ;;  %v6994_v54 = vld [vmem:[%s6655_s15 + $0x4e0] ss:$8 sps:$4 sm:$0xff]  }
 0x17b   : > { %2118 = vmatprep.subr.bf16.mxu0 %v5640_v53  ;;  %v6990_v53 = vld [vmem:[%s6655_s15 + $0x4e4] ss:$8 sps:$4 sm:$0xff]  }
 0x17e   : > { %2119 = vmatpush1.bf16.msra.mxu0 %v5638_v55  ;;  %v663_v55 = vcombine.high %v6868_v21, %v6868_v21  ;;  %v7106_v21 = vld [vmem:[%s6655_s15 + $0x5b0] ss:$8 sps:$4 sm:$0xff]  }
 0x17f   : > { %2120 = vmatprep.subr.bf16.mxu0 %v5643_v56  ;;  %v7000_v56 = vld [vmem:[%s6655_s15 + $0x4f4] ss:$8 sps:$4 sm:$0xff]   ;;  %7945 = vst [vmem:[#allocation43_spill] sm:$0xff] %v7106_v21 }
 0x182   : > { %2121 = vmatpush1.bf16.msra.mxu0 %v5641_v57  ;;  %v7004_v57 = vld [vmem:[%s6655_s15 + $0x4f0] ss:$8 sps:$4 sm:$0xff]  }
 0x183   : > { %2122 = vmatprep.subr.bf16.mxu0 %v5646_v58  ;;  %v7007_v58 = vrot.slane %v663_v55, %v6687_v16  ;;  %v7122_v55 = vld [vmem:[%s6655_s15 + $0x5d0] ss:$8 sps:$4 sm:$0xff]  }
 0x184   : > { %7949 = vst [vmem:[#allocation47_spill] sm:$0xff] %v7122_v55 }
 0x186   : > { %2123 = vmatpush1.bf16.msra.mxu0 %v5644_v59  ;;  %v7011_v59 = vld [vmem:[%s6655_s15 + $0x504] ss:$8 sps:$4 sm:$0xff]  }
 0x187   : > { %2124 = vmatprep.subr.bf16.mxu0 %v5649_v60  ;;  %7922 = vst [vmem:[#allocation20_spill] sm:$0xff] %v7011_v59  ;;  %v7015_v60 = vld [vmem:[%s6655_s15 + $0x500] ss:$8 sps:$4 sm:$0xff]  }
 0x188   : > { %7923 = vst [vmem:[#allocation21_spill] sm:$0xff] %v7015_v60 }
 0x18a   : > { %2125 = vmatpush1.bf16.msra.mxu0 %v5647_v61  ;;  %v679_v61 = vcombine.high %v7007_v58, %v7007_v58 }
 0x18b   : > { %2126 = vmatprep.subr.bf16.mxu0 %v5652_v62  ;;  %v7021_v62 = vld [vmem:[%s6655_s15 + $0x514] ss:$8 sps:$4 sm:$0xff]  }
 0x18c   : > { %7924 = vst [vmem:[#allocation22_spill] sm:$0xff] %v7021_v62 }
 0x18e   : > { %2127 = vmatpush1.bf16.msra.mxu0 %v5650_v63  ;;  %v7026_v63 = vld [vmem:[%s6655_s15 + $0x510] ss:$8 sps:$4 sm:$0xff]  }
 0x18f   : > { %2128 = vmatprep.subr.bf16.mxu0 %v5655_v0  ;;  %7925 = vst [vmem:[#allocation23_spill] sm:$0xff] %v7026_v63  ;;  %v7030_v0 = vld [vmem:[%s6655_s15 + $0x524] ss:$8 sps:$4 sm:$0xff]  }
 0x190   : > { %7926 = vst [vmem:[#allocation24_spill] sm:$0xff] %v7030_v0 }
 0x192   : > { %2129 = vmatpush1.bf16.msra.mxu0 %v5653_v1  ;;  %v7034_v1 = vld [vmem:[%s6655_s15 + $0x520] ss:$8 sps:$4 sm:$0xff]  }
 0x193   : > { %2130 = vmatprep.subr.bf16.mxu0 %v5658_v2  ;;  %7927 = vst [vmem:[#allocation25_spill] sm:$0xff] %v7034_v1  ;;  %v7038_v2 = vld [vmem:[%s6655_s15 + $0x534] ss:$8 sps:$4 sm:$0xff]  }
 0x194   : > { %7928 = vst [vmem:[#allocation26_spill] sm:$0xff] %v7038_v2 }
 0x196   : > { %2131 = vmatpush1.bf16.msra.mxu0 %v5656_v3  ;;  %v7042_v3 = vld [vmem:[%s6655_s15 + $0x530] ss:$8 sps:$4 sm:$0xff]  }
 0x197   : > { %2132 = vmatprep.subr.bf16.mxu0 %v5661_v4  ;;  %7929 = vst [vmem:[#allocation27_spill] sm:$0xff] %v7042_v3  ;;  %v7046_v4 = vld [vmem:[%s6655_s15 + $0x544] ss:$8 sps:$4 sm:$0xff]  }
 0x198   : > { %7930 = vst [vmem:[#allocation28_spill] sm:$0xff] %v7046_v4 }
 0x19a   : > { %2133 = vmatpush1.bf16.msra.mxu0 %v5659_v5  ;;  %v7050_v5 = vld [vmem:[%s6655_s15 + $0x540] ss:$8 sps:$4 sm:$0xff]  }
 0x19b   : > { %2134 = vmatprep.subr.bf16.mxu0 %v5664_v6  ;;  %7931 = vst [vmem:[#allocation29_spill] sm:$0xff] %v7050_v5  ;;  %v7054_v6 = vld [vmem:[%s6655_s15 + $0x554] ss:$8 sps:$4 sm:$0xff]  }
 0x19c   : > { %7932 = vst [vmem:[#allocation30_spill] sm:$0xff] %v7054_v6 }
 0x19e   : > { %2135 = vmatpush1.bf16.msra.mxu0 %v5662_v7  ;;  %v7058_v7 = vld [vmem:[%s6655_s15 + $0x550] ss:$8 sps:$4 sm:$0xff]  }
 0x19f   : > { %2136 = vmatprep.subr.bf16.mxu0 %v5667_v8  ;;  %7933 = vst [vmem:[#allocation31_spill] sm:$0xff] %v7058_v7  ;;  %v7062_v8 = vld [vmem:[%s6655_s15 + $0x564] ss:$8 sps:$4 sm:$0xff]  }
 0x1a0   : > { %7934 = vst [vmem:[#allocation32_spill] sm:$0xff] %v7062_v8 }
 0x1a2   : > { %2137 = vmatpush1.bf16.msra.mxu0 %v5665_v9  ;;  %v7066_v9 = vld [vmem:[%s6655_s15 + $0x560] ss:$8 sps:$4 sm:$0xff]  }
 0x1a3   : > { %2138 = vmatprep.subr.bf16.mxu0 %v5670_v10  ;;  %7935 = vst [vmem:[#allocation33_spill] sm:$0xff] %v7066_v9  ;;  %v7070_v10 = vld [vmem:[%s6655_s15 + $0x574] ss:$8 sps:$4 sm:$0xff]  }
 0x1a4   : > { %7936 = vst [vmem:[#allocation34_spill] sm:$0xff] %v7070_v10 }
 0x1a6   : > { %2139 = vmatpush1.bf16.msra.mxu0 %v5668_v11  ;;  %v7074_v11 = vld [vmem:[%s6655_s15 + $0x570] ss:$8 sps:$4 sm:$0xff]  }
 0x1a7   : > { %2140 = vmatprep.subr.bf16.mxu0 %v5673_v12  ;;  %7937 = vst [vmem:[#allocation35_spill] sm:$0xff] %v7074_v11  ;;  %v7078_v12 = vld [vmem:[%s6655_s15 + $0x584] ss:$8 sps:$4 sm:$0xff]  }
 0x1a8   : > { %7938 = vst [vmem:[#allocation36_spill] sm:$0xff] %v7078_v12 }
 0x1aa   : > { %2141 = vmatpush1.bf16.msra.mxu0 %v5671_v14  ;;  %v7082_v14 = vld [vmem:[%s6655_s15 + $0x580] ss:$8 sps:$4 sm:$0xff]  }
 0x1ab   : > { %2142 = vmatprep.subr.bf16.mxu0 %v5676_v15  ;;  %7939 = vst [vmem:[#allocation37_spill] sm:$0xff] %v7082_v14  ;;  %v7086_v15 = vld [vmem:[%s6655_s15 + $0x594] ss:$8 sps:$4 sm:$0xff]  }
 0x1ac   : > { %7940 = vst [vmem:[#allocation38_spill] sm:$0xff] %v7086_v15 }
 0x1ae   : > { %2143 = vmatpush1.bf16.msra.mxu0 %v5674_v17  ;;  %v7090_v17 = vld [vmem:[%s6655_s15 + $0x590] ss:$8 sps:$4 sm:$0xff]  }
 0x1af   : > { %2144 = vmatprep.subr.bf16.mxu0 %v5679_v18  ;;  %7941 = vst [vmem:[#allocation39_spill] sm:$0xff] %v7090_v17  ;;  %v7094_v18 = vld [vmem:[%s6655_s15 + $0x5a4] ss:$8 sps:$4 sm:$0xff]  }
 0x1b0   : > { %7942 = vst [vmem:[#allocation40_spill] sm:$0xff] %v7094_v18 }
 0x1b2   : > { %2145 = vmatpush1.bf16.msra.mxu0 %v5677_v19  ;;  %v7098_v19 = vld [vmem:[%s6655_s15 + $0x5a0] ss:$8 sps:$4 sm:$0xff]  }
 0x1b3   : > { %2146 = vmatprep.subr.bf16.mxu0 %v5682_v20  ;;  %7943 = vst [vmem:[#allocation41_spill] sm:$0xff] %v7098_v19  ;;  %v7102_v20 = vld [vmem:[%s6655_s15 + $0x5b4] ss:$8 sps:$4 sm:$0xff]  }
 0x1b4   : > { %7944 = vst [vmem:[#allocation42_spill] sm:$0xff] %v7102_v20 }
 0x1b6   : > { %2147 = vmatpush1.bf16.msra.mxu0 %v5680_v22  ;;  %v7110_v22 = vld [vmem:[%s6655_s15 + $0x5c4] ss:$8 sps:$4 sm:$0xff]  }
 0x1b7   : > { %2157 = vmatprep.subr.bf16.mxu0 %v6876_v24  ;;  %7946 = vst [vmem:[#allocation44_spill] sm:$0xff] %v7110_v22 }
 0x1b9   : > { %2149 = vmatmul.mubr.bf16.vlgmr.msra.gmra.mrb[0].mxu0 %v6833_v51  ;;  %v6982_v51 = vld [vmem:[%s6655_s15 + $0x4d4] ss:$8 sps:$4 sm:$0xff]  }
 0x1ba   : > { %2158 = vmatpush1.bf16.msra.mxu0 %v6879_v25  ;;  %2189 = vmatprep.mubr.bf16.mxu0 %v678_v26  ;;  %v7118_v26 = vld [vmem:[%s6655_s15 + $0x5d4] ss:$8 sps:$4 sm:$0xff]  }
 0x1bb   : > { %2159 = vmatprep.subr.bf16.mxu0 %v6885_v27  ;;  %7948 = vst [vmem:[#allocation46_spill] sm:$0xff] %v7118_v26 }
 0x1be   : > { %2160 = vmatpush1.bf16.msra.mxu0 %v6890_v28 }
 0x1bf   : > { %2161 = vmatprep.subr.bf16.mxu0 %v6894_v29 }
 0x1c2   : > { %2162 = vmatpush1.bf16.msra.mxu0 %v6898_v30 }
 0x1c3   : > { %2163 = vmatprep.subr.bf16.mxu0 %v6902_v31 }
 0x1c6   : > { %2164 = vmatpush1.bf16.msra.mxu0 %v6906_v32 }
 0x1c7   : > { %2165 = vmatprep.subr.bf16.mxu0 %v6910_v33 }
 0x1ca   : > { %2166 = vmatpush1.bf16.msra.mxu0 %v6914_v34 }
 0x1cb   : > { %2167 = vmatprep.subr.bf16.mxu0 %v6918_v35 }
 0x1ce   : > { %2168 = vmatpush1.bf16.msra.mxu0 %v6922_v36 }
 0x1cf   : > { %2169 = vmatprep.subr.bf16.mxu0 %v6926_v37 }
 0x1d2   : > { %2170 = vmatpush1.bf16.msra.mxu0 %v6930_v38 }
 0x1d3   : > { %2171 = vmatprep.subr.bf16.mxu0 %v6934_v39 }
 0x1d6   : > { %2172 = vmatpush1.bf16.msra.mxu0 %v6938_v40 }
 0x1d7   : > { %2173 = vmatprep.subr.bf16.mxu0 %v6942_v41 }
 0x1da   : > { %2174 = vmatpush1.bf16.msra.mxu0 %v6946_v42 }
 0x1db   : > { %2175 = vmatprep.subr.bf16.mxu0 %v6950_v43 }
 0x1de   : > { %2176 = vmatpush1.bf16.msra.mxu0 %v6954_v44 }
 0x1df   : > { %2177 = vmatprep.subr.bf16.mxu0 %v6958_v45 }
 0x1e2   : > { %2178 = vmatpush1.bf16.msra.mxu0 %v6962_v46 }
 0x1e3   : > { %2179 = vmatprep.subr.bf16.mxu0 %v6966_v47 }
 0x1e6   : > { %2180 = vmatpush1.bf16.msra.mxu0 %v6970_v48 }
 0x1e7   : > { %2181 = vmatprep.subr.bf16.mxu0 %v6974_v49 }
 0x1ea   : > { %2182 = vmatpush1.bf16.msra.mxu0 %v6978_v50 }
 0x1eb   : > { %2183 = vmatprep.subr.bf16.mxu0 %v6982_v51 }
 0x1ee   : > { %2184 = vmatpush1.bf16.msra.mxu0 %v6986_v52 }
 0x1ef   : > { %2185 = vmatprep.subr.bf16.mxu0 %v6990_v53 }
 0x1f2   : > { %2186 = vmatpush1.bf16.msra.mxu0 %v6994_v54 }
 0x1f3   : > { %2187 = vmatprep.subr.bf16.mxu0 %v7000_v56 }
 0x1f6   : > { %2188 = vmatpush1.bf16.msra.mxu0 %v7004_v57 }
 0x1f7   : > { %2198 = vmatprep.subr.bf16.mxu0 %v7011_v59  ;;  %v7260_v59 = vld [vmem:[%s6655_s15 + $0x6e4] ss:$8 sps:$4 sm:$0xff]  }
 0x1f8   : > { %7959 = vst [vmem:[#allocation57_spill] sm:$0xff] %v7260_v59 }
 0x1f9   : > { %2190 = vmatmul.mubr.bf16.vlgmr.msra.gmra.mrb[0].mxu0 %v6873_v23  ;;  %v7114_v23 = vld [vmem:[%s6655_s15 + $0x5c0] ss:$8 sps:$4 sm:$0xff]  }
 0x1fa   : > { %2199 = vmatpush1.bf16.msra.mxu0 %v7015_v60  ;;  %2230 = vmatprep.mubr.bf16.mxu0 %v679_v61  ;;  %7947 = vst [vmem:[#allocation45_spill] sm:$0xff] %v7114_v23  ;;  %v7126_v61 = vld [vmem:[%s6655_s15 + $0x5e4] ss:$8 sps:$4 sm:$0xff]   ;;  %v7256_v60 = vld [vmem:[%s6655_s15 + $0x6d0] ss:$8 sps:$4 sm:$0xff]  }
 0x1fb   : > { %2200 = vmatprep.subr.bf16.mxu0 %v7021_v62  ;;  %7950 = vst [vmem:[#allocation48_spill] sm:$0xff] %v7126_v61  ;;  %v7252_v62 = vld [vmem:[%s6655_s15 + $0x6d4] ss:$8 sps:$4 sm:$0xff]   ;;  %7958 = vst [vmem:[#allocation56_spill] sm:$0xff] %v7256_v60 }
 0x1fc   : > { %7957 = vst [vmem:[#allocation55_spill] sm:$0xff] %v7252_v62 }
 0x1fe   : > { %2201 = vmatpush1.bf16.msra.mxu0 %v7026_v63  ;;  %v7248_v63 = vld [vmem:[%s6655_s15 + $0x6c0] ss:$8 sps:$4 sm:$0xff]  }
 0x1ff   : > { %2202 = vmatprep.subr.bf16.mxu0 %v7030_v0  ;;  %v7244_v0 = vld [vmem:[%s6655_s15 + $0x6c4] ss:$8 sps:$4 sm:$0xff]   ;;  %7956 = vst [vmem:[#allocation54_spill] sm:$0xff] %v7248_v63 }
 0x200   : > { %7955 = vst [vmem:[#allocation53_spill] sm:$0xff] %v7244_v0 }
 0x202   : > { %2203 = vmatpush1.bf16.msra.mxu0 %v7034_v1  ;;  %v7240_v1 = vld [vmem:[%s6655_s15 + $0x6b0] ss:$8 sps:$4 sm:$0xff]  }
 0x203   : > { %2204 = vmatprep.subr.bf16.mxu0 %v7038_v2  ;;  %v7236_v2 = vld [vmem:[%s6655_s15 + $0x6b4] ss:$8 sps:$4 sm:$0xff]   ;;  %7954 = vst [vmem:[#allocation52_spill] sm:$0xff] %v7240_v1 }
 0x204   : > { %7953 = vst [vmem:[#allocation51_spill] sm:$0xff] %v7236_v2 }
 0x206   : > { %2205 = vmatpush1.bf16.msra.mxu0 %v7042_v3  ;;  %v7232_v3 = vld [vmem:[%s6655_s15 + $0x6a0] ss:$8 sps:$4 sm:$0xff]  }
 0x207   : > { %2206 = vmatprep.subr.bf16.mxu0 %v7046_v4  ;;  %v7228_v4 = vld [vmem:[%s6655_s15 + $0x6a4] ss:$8 sps:$4 sm:$0xff]  }
 0x20a   : > { %2207 = vmatpush1.bf16.msra.mxu0 %v7050_v5  ;;  %v7224_v5 = vld [vmem:[%s6655_s15 + $0x690] ss:$8 sps:$4 sm:$0xff]  }
 0x20b   : > { %2208 = vmatprep.subr.bf16.mxu0 %v7054_v6  ;;  %v7220_v6 = vld [vmem:[%s6655_s15 + $0x694] ss:$8 sps:$4 sm:$0xff]  }
 0x20e   : > { %2209 = vmatpush1.bf16.msra.mxu0 %v7058_v7  ;;  %v7216_v7 = vld [vmem:[%s6655_s15 + $0x680] ss:$8 sps:$4 sm:$0xff]  }
 0x20f   : > { %2210 = vmatprep.subr.bf16.mxu0 %v7062_v8  ;;  %v7212_v8 = vld [vmem:[%s6655_s15 + $0x684] ss:$8 sps:$4 sm:$0xff]  }
 0x212   : > { %2211 = vmatpush1.bf16.msra.mxu0 %v7066_v9  ;;  %v7208_v9 = vld [vmem:[%s6655_s15 + $0x670] ss:$8 sps:$4 sm:$0xff]  }
 0x213   : > { %2212 = vmatprep.subr.bf16.mxu0 %v7070_v10  ;;  %v7204_v10 = vld [vmem:[%s6655_s15 + $0x674] ss:$8 sps:$4 sm:$0xff]  }
 0x216   : > { %2213 = vmatpush1.bf16.msra.mxu0 %v7074_v11  ;;  %v7200_v11 = vld [vmem:[%s6655_s15 + $0x660] ss:$8 sps:$4 sm:$0xff]  }
 0x217   : > { %2214 = vmatprep.subr.bf16.mxu0 %v7078_v12  ;;  %v7196_v12 = vld [vmem:[%s6655_s15 + $0x664] ss:$8 sps:$4 sm:$0xff]  }
 0x21a   : > { %2215 = vmatpush1.bf16.msra.mxu0 %v7082_v14  ;;  %v7192_v14 = vld [vmem:[%s6655_s15 + $0x650] ss:$8 sps:$4 sm:$0xff]  }
 0x21b   : > { %2216 = vmatprep.subr.bf16.mxu0 %v7086_v15  ;;  %v7188_v15 = vld [vmem:[%s6655_s15 + $0x654] ss:$8 sps:$4 sm:$0xff]  }
 0x21e   : > { %2217 = vmatpush1.bf16.msra.mxu0 %v7090_v17  ;;  %v7184_v17 = vld [vmem:[%s6655_s15 + $0x640] ss:$8 sps:$4 sm:$0xff]  }
 0x21f   : > { %2218 = vmatprep.subr.bf16.mxu0 %v7094_v18  ;;  %v7176_v18 = vld [vmem:[%s6655_s15 + $0x630] ss:$8 sps:$4 sm:$0xff]  }
 0x222   : > { %2219 = vmatpush1.bf16.msra.mxu0 %v7098_v19  ;;  %v7168_v19 = vld [vmem:[%s6655_s15 + $0x620] ss:$8 sps:$4 sm:$0xff]  }
 0x223   : > { %2220 = vmatprep.subr.bf16.mxu0 %v7102_v20 }
 0x226   : > { %2221 = vmatpush1.bf16.msra.mxu0 %v7106_v21  ;;  %v7136_v21 = vld [vmem:[#allocation5 + $0x18] sm:$0xff] }
 0x227   : > { %2222 = vmatprep.subr.bf16.mxu0 %v7110_v22  ;;  %v7134_v22 = vld [vmem:[%s6655_s15 + $0x5f4] ss:$8 sps:$4 sm:$0xff]  }
 0x228   : > { %7952 = vst [vmem:[#allocation50_spill] sm:$0xff] %v7134_v22 }
 0x22a   : > { %2223 = vmatpush1.bf16.msra.mxu0 %v7114_v23  ;;  %v5777_v23 = vld [vmem:[%s6655_s15 + $0x5f0] ss:$8 sps:$4 sm:$0xff]  }
 0x22b   : > { %2224 = vmatprep.subr.bf16.mxu0 %v7118_v26  ;;  %v7142_v26 = vrot.slane %v7136_v21, %v6687_v16 }
 0x22d   : > { %v695_v20 = vcombine.high %v7142_v26, %v7142_v26 }
 0x22e   : > { %2225 = vmatpush1.bf16.msra.mxu0 %v7122_v55  ;;  %v7146_v55 = vld [vmem:[%s6655_s15 + $0x604] ss:$8 sps:$4 sm:$0xff]  }
 0x22f   : > { %2226 = vmatprep.subr.bf16.mxu0 %v7126_v61  ;;  %v7149_v61 = vld [vmem:[%s6655_s15 + $0x600] ss:$8 sps:$4 sm:$0xff]  }
 0x232   : > { %2227 = vmatpush1.bf16.msra.mxu0 %v7130_v13  ;;  %v7155_v13 = vld [vmem:[%s6655_s15 + $0x614] ss:$8 sps:$4 sm:$0xff]  }
 0x233   : > { %2228 = vmatprep.subr.bf16.mxu0 %v7134_v22  ;;  %v7160_v22 = vld [vmem:[%s6655_s15 + $0x610] ss:$8 sps:$4 sm:$0xff]  }
 0x236   : > { %2229 = vmatpush1.bf16.msra.mxu0 %v5777_v23  ;;  %v7164_v23 = vld [vmem:[%s6655_s15 + $0x624] ss:$8 sps:$4 sm:$0xff]  }
 0x237   : > { %2239 = vmatprep.subr.bf16.mxu0 %v7146_v55 }
 0x239   : > { %2231 = vmatmul.mubr.bf16.vlgmr.msra.gmra.mrb[0].mxu0 %v7007_v58  ;;  %v7172_v58 = vld [vmem:[%s6655_s15 + $0x634] ss:$8 sps:$4 sm:$0xff]  }
 0x23a   : > { %2240 = vmatpush1.bf16.msra.mxu0 %v7149_v61  ;;  %2271 = vmatprep.mubr.bf16.mxu0 %v695_v20  ;;  %v7180_v20 = vld [vmem:[%s6655_s15 + $0x644] ss:$8 sps:$4 sm:$0xff]  }
 0x23b   : > { %2241 = vmatprep.subr.bf16.mxu0 %v7155_v13 }
 0x23e   : > { %2242 = vmatpush1.bf16.msra.mxu0 %v7160_v22 }
 0x23f   : > { %2243 = vmatprep.subr.bf16.mxu0 %v7164_v23 }
 0x242   : > { %2244 = vmatpush1.bf16.msra.mxu0 %v7168_v19 }
 0x243   : > { %2245 = vmatprep.subr.bf16.mxu0 %v7172_v58 }
 0x246   : > { %2246 = vmatpush1.bf16.msra.mxu0 %v7176_v18 }
 0x247   : > { %2247 = vmatprep.subr.bf16.mxu0 %v7180_v20 }
 0x24a   : > { %2248 = vmatpush1.bf16.msra.mxu0 %v7184_v17 }
 0x24b   : > { %2249 = vmatprep.subr.bf16.mxu0 %v7188_v15 }
 0x24e   : > { %2250 = vmatpush1.bf16.msra.mxu0 %v7192_v14 }
 0x24f   : > { %2251 = vmatprep.subr.bf16.mxu0 %v7196_v12 }
 0x252   : > { %2252 = vmatpush1.bf16.msra.mxu0 %v7200_v11 }
 0x253   : > { %2253 = vmatprep.subr.bf16.mxu0 %v7204_v10 }
 0x256   : > { %2254 = vmatpush1.bf16.msra.mxu0 %v7208_v9 }
 0x257   : > { %2255 = vmatprep.subr.bf16.mxu0 %v7212_v8 }
 0x25a   : > { %2256 = vmatpush1.bf16.msra.mxu0 %v7216_v7 }
 0x25b   : > { %2257 = vmatprep.subr.bf16.mxu0 %v7220_v6 }
 0x25e   : > { %2258 = vmatpush1.bf16.msra.mxu0 %v7224_v5 }
 0x25f   : > { %2259 = vmatprep.subr.bf16.mxu0 %v7228_v4 }
 0x262   : > { %2260 = vmatpush1.bf16.msra.mxu0 %v7232_v3 }
 0x263   : > { %2261 = vmatprep.subr.bf16.mxu0 %v7236_v2  ;;  %v7270_v2 = vld [vmem:[%s6655_s15 + $0x6f4] ss:$8 sps:$4 sm:$0xff]  }
 0x266   : > { %2262 = vmatpush1.bf16.msra.mxu0 %v7240_v1  ;;  %v7264_v1 = vld [vmem:[%s6655_s15 + $0x6e0] ss:$8 sps:$4 sm:$0xff]  }
 0x267   : > { %2263 = vmatprep.subr.bf16.mxu0 %v7244_v0  ;;  %7960 = vst [vmem:[#allocation58_spill] sm:$0xff] %v7264_v1  ;;  %v680_v0 = vcombine.high %v7136_v21, %v7136_v21  ;;  %v7285_v21 = vld [vmem:[%s6655_s15 + $0x700] ss:$8 sps:$4 sm:$0xff]  }
 0x268   : > { %7962 = vst [vmem:[#allocation60_spill] sm:$0xff] %v7285_v21 }
 0x26a   : > { %2264 = vmatpush1.bf16.msra.mxu0 %v7248_v63  ;;  %v7274_v63 = vld [vmem:[%s6655_s15 + $0x6f0] ss:$8 sps:$4 sm:$0xff]  }
 0x26b   : > { %2265 = vmatprep.subr.bf16.mxu0 %v7252_v62  ;;  %v7277_v62 = vrot.slane %v680_v0, %v6687_v16  ;;  %v7296_v16 = vld [vmem:[%s6655_s15 + $0x710] ss:$8 sps:$4 sm:$0xff]   ;;  %v7300_v0 = vld [vmem:[%s6655_s15 + $0x724] ss:$8 sps:$4 sm:$0xff]  }
 0x26c   : > { %7964 = vst [vmem:[#allocation62_spill] sm:$0xff] %v7296_v16  ;;  %7965 = vst [vmem:[#allocation63_spill] sm:$0xff] %v7300_v0 }
 0x26e   : > { %2266 = vmatpush1.bf16.msra.mxu0 %v7256_v60  ;;  %v7281_v60 = vld [vmem:[%s6655_s15 + $0x704] ss:$8 sps:$4 sm:$0xff]  }
 0x26f   : > { %2267 = vmatprep.subr.bf16.mxu0 %v7260_v59  ;;  %7961 = vst [vmem:[#allocation59_spill] sm:$0xff] %v7281_v60  ;;  %v696_v59 = vcombine.high %v7277_v62, %v7277_v62 }
 0x272   : > { %2268 = vmatpush1.bf16.msra.mxu0 %v7264_v1  ;;  %v7291_v1 = vld [vmem:[%s6655_s15 + $0x714] ss:$8 sps:$4 sm:$0xff]  }
 0x273   : > { %2269 = vmatprep.subr.bf16.mxu0 %v7270_v2  ;;  %7963 = vst [vmem:[#allocation61_spill] sm:$0xff] %v7291_v1 }
 0x276   : > { %2270 = vmatpush1.bf16.msra.mxu0 %v7274_v63 }
 0x277   : > { %2280 = vmatprep.subr.bf16.mxu0 %v7281_v60  ;;  %v7304_v60 = vld [vmem:[%s6655_s15 + $0x720] ss:$8 sps:$4 sm:$0xff]  }
 0x278   : > { %7966 = vst [vmem:[#allocation64_spill] sm:$0xff] %v7304_v60 }
 0x279   : > { %2272 = vmatmul.mubr.bf16.vlgmr.msra.gmra.mrb[0].mxu0 %v7142_v26  ;;  %v7308_v26 = vld [vmem:[%s6655_s15 + $0x734] ss:$8 sps:$4 sm:$0xff]  }
 0x27a   : > { %2281 = vmatpush1.bf16.msra.mxu0 %v7285_v21  ;;  %2312 = vmatprep.mubr.bf16.mxu0 %v696_v59  ;;  %7967 = vst [vmem:[#allocation65_spill] sm:$0xff] %v7308_v26  ;;  %v7312_v21 = vld [vmem:[%s6655_s15 + $0x730] ss:$8 sps:$4 sm:$0xff]   ;;  %v7316_v59 = vld [vmem:[%s6655_s15 + $0x744] ss:$8 sps:$4 sm:$0xff]  }
 0x27b   : > { %2282 = vmatprep.subr.bf16.mxu0 %v7291_v1  ;;  %7968 = vst [vmem:[#allocation66_spill] sm:$0xff] %v7312_v21  ;;  %7969 = vst [vmem:[#allocation67_spill] sm:$0xff] %v7316_v59  ;;  %v7388_v1 = vld [vmem:[%s6655_s15 + $0x7d4] ss:$8 sps:$4 sm:$0xff]  }
 0x27e   : > { %2283 = vmatpush1.bf16.msra.mxu0 %v7296_v16  ;;  %v7320_v16 = vld [vmem:[%s6655_s15 + $0x740] ss:$8 sps:$4 sm:$0xff]  }
 0x27f   : > { %2284 = vmatprep.subr.bf16.mxu0 %v7300_v0  ;;  %7970 = vst [vmem:[#allocation68_spill] sm:$0xff] %v7320_v16  ;;  %v7324_v0 = vld [vmem:[%s6655_s15 + $0x754] ss:$8 sps:$4 sm:$0xff]  }
 0x280   : > { %7971 = vst [vmem:[#allocation69_spill] sm:$0xff] %v7324_v0 }
 0x282   : > { %2285 = vmatpush1.bf16.msra.mxu0 %v7304_v60  ;;  %v7328_v60 = vld [vmem:[%s6655_s15 + $0x750] ss:$8 sps:$4 sm:$0xff]  }
 0x283   : > { %2286 = vmatprep.subr.bf16.mxu0 %v7308_v26  ;;  %7972 = vst [vmem:[#allocation70_spill] sm:$0xff] %v7328_v60  ;;  %v7332_v26 = vld [vmem:[%s6655_s15 + $0x764] ss:$8 sps:$4 sm:$0xff]  }
 0x284   : > { %7973 = vst [vmem:[#allocation71_spill] sm:$0xff] %v7332_v26 }
 0x286   : > { %2287 = vmatpush1.bf16.msra.mxu0 %v7312_v21  ;;  %v7336_v21 = vld [vmem:[%s6655_s15 + $0x760] ss:$8 sps:$4 sm:$0xff]  }
 0x287   : > { %2288 = vmatprep.subr.bf16.mxu0 %v7316_v59  ;;  %7974 = vst [vmem:[#allocation72_spill] sm:$0xff] %v7336_v21  ;;  %v7340_v59 = vld [vmem:[%s6655_s15 + $0x774] ss:$8 sps:$4 sm:$0xff]  }
 0x288   : > { %7975 = vst [vmem:[#allocation73_spill] sm:$0xff] %v7340_v59 }
 0x28a   : > { %2289 = vmatpush1.bf16.msra.mxu0 %v7320_v16  ;;  %v7344_v16 = vld [vmem:[%s6655_s15 + $0x770] ss:$8 sps:$4 sm:$0xff]  }
 0x28b   : > { %2290 = vmatprep.subr.bf16.mxu0 %v7324_v0  ;;  %7976 = vst [vmem:[#allocation74_spill] sm:$0xff] %v7344_v16  ;;  %v7348_v0 = vld [vmem:[%s6655_s15 + $0x784] ss:$8 sps:$4 sm:$0xff]  }
 0x28c   : > { %7977 = vst [vmem:[#allocation75_spill] sm:$0xff] %v7348_v0 }
 0x28e   : > { %2291 = vmatpush1.bf16.msra.mxu0 %v7328_v60  ;;  %v7352_v60 = vld [vmem:[%s6655_s15 + $0x780] ss:$8 sps:$4 sm:$0xff]  }
 0x28f   : > { %2292 = vmatprep.subr.bf16.mxu0 %v7332_v26  ;;  %7978 = vst [vmem:[#allocation76_spill] sm:$0xff] %v7352_v60  ;;  %v7356_v26 = vld [vmem:[%s6655_s15 + $0x794] ss:$8 sps:$4 sm:$0xff]  }
 0x290   : > { %7979 = vst [vmem:[#allocation77_spill] sm:$0xff] %v7356_v26 }
 0x292   : > { %2293 = vmatpush1.bf16.msra.mxu0 %v7336_v21  ;;  %v7360_v21 = vld [vmem:[%s6655_s15 + $0x790] ss:$8 sps:$4 sm:$0xff]  }
 0x293   : > { %2294 = vmatprep.subr.bf16.mxu0 %v7340_v59  ;;  %7980 = vst [vmem:[#allocation78_spill] sm:$0xff] %v7360_v21  ;;  %v7364_v59 = vld [vmem:[%s6655_s15 + $0x7a4] ss:$8 sps:$4 sm:$0xff]  }
 0x294   : > { %7981 = vst [vmem:[#allocation79_spill] sm:$0xff] %v7364_v59 }
 0x296   : > { %2295 = vmatpush1.bf16.msra.mxu0 %v7344_v16  ;;  %v7368_v16 = vld [vmem:[%s6655_s15 + $0x7a0] ss:$8 sps:$4 sm:$0xff]  }
 0x297   : > { %2296 = vmatprep.subr.bf16.mxu0 %v7348_v0  ;;  %7982 = vst [vmem:[#allocation80_spill] sm:$0xff] %v7368_v16  ;;  %v7372_v0 = vld [vmem:[%s6655_s15 + $0x7b4] ss:$8 sps:$4 sm:$0xff]  }
 0x298   : > { %7983 = vst [vmem:[#allocation81_spill] sm:$0xff] %v7372_v0 }
 0x29a   : > { %2297 = vmatpush1.bf16.msra.mxu0 %v7352_v60  ;;  %v7376_v60 = vld [vmem:[%s6655_s15 + $0x7b0] ss:$8 sps:$4 sm:$0xff]  }
 0x29b   : > { %2298 = vmatprep.subr.bf16.mxu0 %v7356_v26  ;;  %7984 = vst [vmem:[#allocation82_spill] sm:$0xff] %v7376_v60  ;;  %v7380_v26 = vld [vmem:[%s6655_s15 + $0x7c4] ss:$8 sps:$4 sm:$0xff]  }
 0x29c   : > { %7985 = vst [vmem:[#allocation83_spill] sm:$0xff] %v7380_v26 }
 0x29e   : > { %2299 = vmatpush1.bf16.msra.mxu0 %v7360_v21  ;;  %v7384_v21 = vld [vmem:[%s6655_s15 + $0x7c0] ss:$8 sps:$4 sm:$0xff]  }
 0x29f   : > { %2300 = vmatprep.subr.bf16.mxu0 %v7364_v59  ;;  %v7392_v59 = vld [vmem:[%s6655_s15 + $0x7d0] ss:$8 sps:$4 sm:$0xff]  }
 0x2a2   : > { %2301 = vmatpush1.bf16.msra.mxu0 %v7368_v16  ;;  %v7396_v16 = vld [vmem:[%s6655_s15 + $0x7e4] ss:$8 sps:$4 sm:$0xff]  }
 0x2a3   : > { %2302 = vmatprep.subr.bf16.mxu0 %v7372_v0  ;;  %v7400_v0 = vld [vmem:[%s6655_s15 + $0x7e0] ss:$8 sps:$4 sm:$0xff]  }
 0x2a6   : > { %2303 = vmatpush1.bf16.msra.mxu0 %v7376_v60  ;;  %v7404_v60 = vld [vmem:[%s6655_s15 + $0x7f4] ss:$8 sps:$4 sm:$0xff]  }
 0x2a7   : > { %2304 = vmatprep.subr.bf16.mxu0 %v7380_v26  ;;  %v7408_v26 = vld [vmem:[%s6655_s15 + $0x7f0] ss:$8 sps:$4 sm:$0xff]  }
 0x2aa   : > { %2305 = vmatpush1.bf16.msra.mxu0 %v7384_v21 }
 0x2ab   : > { %2306 = vmatprep.subr.bf16.mxu0 %v7388_v1 }
 0x2ae   : > { %2307 = vmatpush1.bf16.msra.mxu0 %v7392_v59 }
 0x2af   : > { %2308 = vmatprep.subr.bf16.mxu0 %v7396_v16 }
 0x2b2   : > { %2309 = vmatpush1.bf16.msra.mxu0 %v7400_v0 }
 0x2b3   : > { %2310 = vmatprep.subr.bf16.mxu0 %v7404_v60 }
 0x2b6   : > { %2311 = vmatpush1.bf16.msra.mxu0 %v7408_v26 }
 0x2b7   : > { %2507 = vmatprep.subr.bf16.mxu0 %v6876_v24 }
 0x2b9   : > { %2313 = vmatmul.mubr.bf16.vlgmr.msra.gmra.mrb[0].mxu0 %v7277_v62  ;;  %v6028_v62 = vld [vmem:[%s6655_s15 + $0x150] ss:$8 sps:$4 sm:$0xff]  }
 0x2bf   : > { %2508 = vmatpush1.bf16.xpose.msra.mxu0 %v6879_v25 }
 0x2c0   : > { %2509 = vmatprep.subr.bf16.mxu0 %v6885_v27 }
 0x2c7   : > { %2510 = vmatpush1.bf16.xpose.msra.mxu0 %v6890_v28 }
 0x2c8   : > { %2511 = vmatprep.subr.bf16.mxu0 %v6894_v29 }
 0x2cf   : > { %2512 = vmatpush1.bf16.xpose.msra.mxu0 %v6898_v30 }
 0x2d0   : > { %2513 = vmatprep.subr.bf16.mxu0 %v6902_v31 }
 0x2d7   : > { %2514 = vmatpush1.bf16.xpose.msra.mxu0 %v6906_v32 }
 0x2d8   : > { %2515 = vmatprep.subr.bf16.mxu0 %v6910_v33 }
 0x2df   : > { %2516 = vmatpush1.bf16.xpose.msra.mxu0 %v6914_v34 }
 0x2e0   : > { %2517 = vmatprep.subr.bf16.mxu0 %v6918_v35 }
 0x2e7   : > { %2518 = vmatpush1.bf16.xpose.msra.mxu0 %v6922_v36 }
 0x2e8   : > { %2519 = vmatprep.subr.bf16.mxu0 %v6926_v37 }
 0x2ef   : > { %2520 = vmatpush1.bf16.xpose.msra.mxu0 %v6930_v38 }
 0x2f0   : > { %2521 = vmatprep.subr.bf16.mxu0 %v6934_v39 }
 0x2f7   : > { %2522 = vmatpush1.bf16.xpose.msra.mxu0 %v6938_v40 }
 0x2f8   : > { %2523 = vmatprep.subr.bf16.mxu0 %v6942_v41 }
 0x2ff   : > { %2524 = vmatpush1.bf16.xpose.msra.mxu0 %v6946_v42 }
 0x300   : > { %2525 = vmatprep.subr.bf16.mxu0 %v6950_v43 }
 0x307   : > { %2526 = vmatpush1.bf16.xpose.msra.mxu0 %v6954_v44 }
 0x308   : > { %2527 = vmatprep.subr.bf16.mxu0 %v6958_v45 }
 0x30f   : > { %2528 = vmatpush1.bf16.xpose.msra.mxu0 %v6962_v46 }
 0x310   : > { %2529 = vmatprep.subr.bf16.mxu0 %v6966_v47 }
 0x317   : > { %2530 = vmatpush1.bf16.xpose.msra.mxu0 %v6970_v48  ;;  %v6018_v48 = vld [vmem:[%s6655_s15 + $0x100] ss:$8 sps:$4 sm:$0xff]  }
 0x318   : > { %2531 = vmatprep.subr.bf16.mxu0 %v6974_v49  ;;  %v6019_v49 = vld [vmem:[%s6655_s15 + $0x114] ss:$8 sps:$4 sm:$0xff]  }
 0x31f   : > { %2532 = vmatpush1.bf16.xpose.msra.mxu0 %v6978_v50  ;;  %v6020_v50 = vld [vmem:[%s6655_s15 + $0x110] ss:$8 sps:$4 sm:$0xff]  }
 0x320   : > { %2533 = vmatprep.subr.bf16.mxu0 %v6982_v51  ;;  %v6021_v51 = vld [vmem:[%s6655_s15 + $0x124] ss:$8 sps:$4 sm:$0xff]  }
 0x327   : > { %2534 = vmatpush1.bf16.xpose.msra.mxu0 %v6986_v52  ;;  %v6022_v52 = vld [vmem:[%s6655_s15 + $0x120] ss:$8 sps:$4 sm:$0xff]  }
 0x328   : > { %2535 = vmatprep.subr.bf16.mxu0 %v6990_v53  ;;  %v6023_v53 = vld [vmem:[%s6655_s15 + $0x134] ss:$8 sps:$4 sm:$0xff]  }
 0x32f   : > { %2536 = vmatpush1.bf16.xpose.msra.mxu0 %v6994_v54  ;;  %v6025_v54 = vld [vmem:[%s6655_s15 + $0x144] ss:$8 sps:$4 sm:$0xff]  }
 0x330   : > { %2537 = vmatprep.subr.bf16.mxu0 %v7000_v56  ;;  %v6026_v56 = vld [vmem:[%s6655_s15 + $0x140] ss:$8 sps:$4 sm:$0xff]  }
 0x337   : > { %2538 = vmatpush1.bf16.xpose.msra.mxu0 %v7004_v57  ;;  %v6027_v57 = vld [vmem:[%s6655_s15 + $0x154] ss:$8 sps:$4 sm:$0xff]  }
 0x338   : > { %2589 = vmatprep.subr.bf16.mxu0 %v7146_v55  ;;  %v7987_v55 = vld [vmem:[#allocation52_spill] sm:$0xff] }
 0x38c   : > { %v2314_v24 = vpop.f32.mrb[0].mxu0 }
 0x38d   : > { %v2316_v25 = vpop.f32.mrb[1].mxu0  ;;  %v2322_v27 = vsel %vm2321_vm0, %v2314_v24, -inf }
 0x38e   : > { %v2318_v28 = vpop.f32.mrb[2].mxu0  ;;  %v2323_v29 = vsel %vm2321_vm0, %v2316_v25, -inf }
 0x38f   : > { %v2319_v30 = vpop.f32.mrb[3].mxu0  ;;  %v2324_v31 = vmax.f32 %v2322_v27, %v2323_v29  ;;  %v7992_v27 = vld [vmem:[#allocation57_spill] sm:$0xff]  ;;  %v7993_v29 = vld [vmem:[#allocation58_spill] sm:$0xff] }
 0x390   : > { %v6046_v28 = vld [vmem:[%s6655_s15 + $0x1e0] ss:$8 sps:$4 sm:$0xff]   ;;  %v6047_v30 = vld [vmem:[%s6655_s15 + $0x1f4] ss:$8 sps:$4 sm:$0xff]  }
 0x391   : > { %2325 = vmax.xlane.f32.xlu0 %v2324_v31  ;;  %v5878_v31 = vld [vmem:[#allocation7 + $0x40] sm:$0xff]  }
 0x41e   : > { %v2326_v32 = vpop.xlane.xlu0 %2325 }
 0x41f   : > { %v2327_v33 = vsub.f32 %v2314_v24, %v2326_v32  ;;  %v2328_v34 = vsub.f32 %v2316_v25, %v2326_v32  ;;  %v7991_v24 = vld [vmem:[#allocation56_spill] sm:$0xff]  ;;  %v6045_v25 = vld [vmem:[%s6655_s15 + $0x1e4] ss:$8 sps:$4 sm:$0xff]  }
 0x420   : > { %v6048_v32 = vld [vmem:[%s6655_s15 + $0x1f0] ss:$8 sps:$4 sm:$0xff]  }
 0x421   : > { %v2329_v35 = vmul.f32 1.442695, %v2327_v33  ;;  %v2331_v36 = vmul.f32 1.442695, %v2328_v34  ;;  %v6049_v33 = vld [vmem:[%s6655_s15 + $0x204] ss:$8 sps:$4 sm:$0xff]  }
 0x422   : > { %v5879_v34 = vld [vmem:[#allocation7] sm:$0xff]  }
 0x423   : > { %6006 = vpow2.f32 %v2329_v35  ;;  %v5880_v35 = vld [vmem:[#allocation7 + $0x48] sm:$0xff]  }
 0x424   : > { %6008 = vpow2.f32 %v2331_v36  ;;  %v6050_v36 = vld [vmem:[%s6655_s15 + $0x200] ss:$8 sps:$4 sm:$0xff]  }
 0x42d   : > { %v6007_v37 = vpop.eup %6006 }
 0x42e   : > { %v6009_v38 = vpop.eup %6008  ;;  %v2333_v39 = vsel %vm2321_vm0, %v6007_v37, 0.0 }
 0x42f   : > { %v2334_v40 = vsel %vm2321_vm0, %v6009_v38, 0.0 }
 0x430   : > { %v2335_v41 = vadd.f32 %v2334_v40, %v2333_v39  ;;  %v5884_v39 = vld [vmem:[#allocation7 + $0x58] sm:$0xff]  }
 0x431   : > { %v6052_v40 = vld [vmem:[%s6655_s15 + $0x210] ss:$8 sps:$4 sm:$0xff]  }
 0x432   : > { %2336 = vadd.xlane.f32.xlu0 %v2335_v41  ;;  %v6053_v41 = vld [vmem:[%s6655_s15 + $0x224] ss:$8 sps:$4 sm:$0xff]  }
 0x4bf   : > { %v2337_v42 = vpop.xlane.xlu0 %2336 }
 0x4c0   : > { %6010 = vrcp.f32 %v2337_v42  ;;  %v5885_v42 = vld [vmem:[#allocation7 + $0x18] sm:$0xff]  }
 0x4ca   : > { %v6011_v43 = vpop.eup %6010 }
 0x4cb   : > { %v2339_v44 = vmul.f32 %v6011_v43, %v6007_v37  ;;  %v2340_v45 = vmul.f32 %v6011_v43, %v6009_v38  ;;  %v5881_v37 = vld [vmem:[#allocation7 + $0x8] sm:$0xff]   ;;  %v5883_v38 = vld [vmem:[#allocation7 + $0x10] sm:$0xff]   ;;  %v5886_v43 = vld [vmem:[#allocation7 + $0x60] sm:$0xff]  }
 0x4cd   : > { %v7450_v46 = vpack.c.bf16 %v2339_v44, %v2339_v44  ;;  %v7452_v47 = vpack.c.bf16 %v2340_v45, %v2340_v45  ;;  %v5887_v44 = vld [vmem:[#allocation7 + $0x20] sm:$0xff]   ;;  %v5888_v45 = vld [vmem:[#allocation7 + $0x68] sm:$0xff]  }
 0x4cf   : > { %2375 = vmatprep.mubr.bf16.mxu1 %v7452_v47  ;;  %2539 = vmatprep.mubr.bf16.mxu0 %v7452_v47 }
 0x4d0   : > { %2376 = vmatmul.mubr.bf16.vlgmr.msra.gmra.mrb[0].mxu1 %v7450_v46  ;;  %2540 = vmatmul.mubr.bf16.vlgmr.msra.gmra.mrb[4].mxu0 %v7450_v46 }
 0x4d1   : > { %2385 = vmatpush1.bf16.xpose.msra.mxu1 %v6018_v48  ;;  %2590 = vmatpush1.bf16.xpose.msra.mxu0 %v7149_v61  ;;  %v7988_v61 = vld [vmem:[#allocation53_spill] sm:$0xff] }
 0x4d2   : > { %2416 = vmatprep.mubr.bf16.mxu1 %v7452_v47  ;;  %2621 = vmatprep.mubr.bf16.mxu0 %v7452_v47  ;;  %v6054_v48 = vld [vmem:[%s6655_s15 + $0x220] ss:$8 sps:$4 sm:$0xff]  }
 0x4d3   : > { %2386 = vmatprep.subr.bf16.mxu1 %v6019_v49  ;;  %2591 = vmatprep.subr.bf16.mxu0 %v7155_v13  ;;  %v6024_v13 = vld [vmem:[%s6655_s15 + $0x130] ss:$8 sps:$4 sm:$0xff]   ;;  %v6055_v49 = vld [vmem:[%s6655_s15 + $0x234] ss:$8 sps:$4 sm:$0xff]  }
 0x4d9   : > { %2387 = vmatpush1.bf16.xpose.msra.mxu1 %v6020_v50  ;;  %2592 = vmatpush1.bf16.xpose.msra.mxu0 %v7160_v22  ;;  %v7986_v22 = vld [vmem:[#allocation51_spill] sm:$0xff] }
 0x4da   : > { %2388 = vmatprep.subr.bf16.mxu1 %v6021_v51  ;;  %2593 = vmatprep.subr.bf16.mxu0 %v7164_v23  ;;  %v7989_v23 = vld [vmem:[#allocation54_spill] sm:$0xff]  ;;  %v5890_v51 = vld [vmem:[#allocation7 + $0x70] sm:$0xff]  }
 0x4db   : > { %v5889_v50 = vld [vmem:[#allocation7 + $0x28] sm:$0xff]  }
 0x4e1   : > { %2389 = vmatpush1.bf16.xpose.msra.mxu1 %v6022_v52  ;;  %2594 = vmatpush1.bf16.xpose.msra.mxu0 %v7168_v19  ;;  %v6030_v19 = vld [vmem:[%s6655_s15 + $0x160] ss:$8 sps:$4 sm:$0xff]   ;;  %v5891_v52 = vld [vmem:[#allocation7 + $0x30] sm:$0xff]  }
 0x4e2   : > { %2390 = vmatprep.subr.bf16.mxu1 %v6023_v53  ;;  %2595 = vmatprep.subr.bf16.mxu0 %v7172_v58  ;;  %v7990_v58 = vld [vmem:[#allocation55_spill] sm:$0xff]  ;;  %v5892_v53 = vld [vmem:[#allocation7 + $0x78] sm:$0xff]  }
 0x4e9   : > { %2391 = vmatpush1.bf16.xpose.msra.mxu1 %v6024_v13  ;;  %2596 = vmatpush1.bf16.xpose.msra.mxu0 %v7176_v18  ;;  %v6029_v18 = vld [vmem:[%s6655_s15 + $0x164] ss:$8 sps:$4 sm:$0xff]   ;;  %v6056_v13 = vld [vmem:[%s6655_s15 + $0x230] ss:$8 sps:$4 sm:$0xff]  }
 0x4ea   : > { %2392 = vmatprep.subr.bf16.mxu1 %v6025_v54  ;;  %2597 = vmatprep.subr.bf16.mxu0 %v7180_v20  ;;  %v6044_v20 = vld [vmem:[%s6655_s15 + $0x1d0] ss:$8 sps:$4 sm:$0xff]   ;;  %v6057_v54 = vld [vmem:[%s6655_s15 + $0x244] ss:$8 sps:$4 sm:$0xff]  }
 0x4f1   : > { %2393 = vmatpush1.bf16.xpose.msra.mxu1 %v6026_v56  ;;  %2598 = vmatpush1.bf16.xpose.msra.mxu0 %v7184_v17  ;;  %v6031_v17 = vld [vmem:[%s6655_s15 + $0x174] ss:$8 sps:$4 sm:$0xff]  }
 0x4f2   : > { %2394 = vmatprep.subr.bf16.mxu1 %v6027_v57  ;;  %2599 = vmatprep.subr.bf16.mxu0 %v7188_v15  ;;  %v6032_v15 = vld [vmem:[%s6655_s15 + $0x170] ss:$8 sps:$4 sm:$0xff]   ;;  %v6058_v57 = vld [vmem:[%s6655_s15 + $0x240] ss:$8 sps:$4 sm:$0xff]  }
 0x4f3   : > { %v5893_v56 = vld [vmem:[#allocation7 + $0x38] sm:$0xff]  }
 0x4f9   : > { %2395 = vmatpush1.bf16.xpose.msra.mxu1 %v6028_v62  ;;  %2600 = vmatpush1.bf16.xpose.msra.mxu0 %v7192_v14  ;;  %v6033_v14 = vld [vmem:[%s6655_s15 + $0x184] ss:$8 sps:$4 sm:$0xff]   ;;  %v6059_v62 = vld [vmem:[%s6655_s15 + $0x254] ss:$8 sps:$4 sm:$0xff]  }
 0x4fa   : > { %2396 = vmatprep.subr.bf16.mxu1 %v6029_v18  ;;  %2601 = vmatprep.subr.bf16.mxu0 %v7196_v12  ;;  %v6034_v12 = vld [vmem:[%s6655_s15 + $0x180] ss:$8 sps:$4 sm:$0xff]   ;;  %v6060_v18 = vld [vmem:[%s6655_s15 + $0x250] ss:$8 sps:$4 sm:$0xff]  }
 0x501   : > { %2397 = vmatpush1.bf16.xpose.msra.mxu1 %v6030_v19  ;;  %2602 = vmatpush1.bf16.xpose.msra.mxu0 %v7200_v11  ;;  %v6035_v11 = vld [vmem:[%s6655_s15 + $0x194] ss:$8 sps:$4 sm:$0xff]   ;;  %v6061_v19 = vld [vmem:[%s6655_s15 + $0x264] ss:$8 sps:$4 sm:$0xff]  }
 0x502   : > { %2398 = vmatprep.subr.bf16.mxu1 %v6031_v17  ;;  %2603 = vmatprep.subr.bf16.mxu0 %v7204_v10  ;;  %v6036_v10 = vld [vmem:[%s6655_s15 + $0x190] ss:$8 sps:$4 sm:$0xff]   ;;  %v6062_v17 = vld [vmem:[%s6655_s15 + $0x260] ss:$8 sps:$4 sm:$0xff]  }
 0x509   : > { %2399 = vmatpush1.bf16.xpose.msra.mxu1 %v6032_v15  ;;  %2604 = vmatpush1.bf16.xpose.msra.mxu0 %v7208_v9  ;;  %v6037_v9 = vld [vmem:[%s6655_s15 + $0x1a4] ss:$8 sps:$4 sm:$0xff]   ;;  %v6063_v15 = vld [vmem:[%s6655_s15 + $0x274] ss:$8 sps:$4 sm:$0xff]  }
 0x50a   : > { %2400 = vmatprep.subr.bf16.mxu1 %v6033_v14  ;;  %2605 = vmatprep.subr.bf16.mxu0 %v7212_v8  ;;  %v6038_v8 = vld [vmem:[%s6655_s15 + $0x1a0] ss:$8 sps:$4 sm:$0xff]   ;;  %v6064_v14 = vld [vmem:[%s6655_s15 + $0x270] ss:$8 sps:$4 sm:$0xff]  }
 0x511   : > { %2401 = vmatpush1.bf16.xpose.msra.mxu1 %v6034_v12  ;;  %2606 = vmatpush1.bf16.xpose.msra.mxu0 %v7216_v7  ;;  %v6039_v7 = vld [vmem:[%s6655_s15 + $0x1b4] ss:$8 sps:$4 sm:$0xff]   ;;  %v6065_v12 = vld [vmem:[%s6655_s15 + $0x284] ss:$8 sps:$4 sm:$0xff]  }
 0x512   : > { %2402 = vmatprep.subr.bf16.mxu1 %v6035_v11  ;;  %2607 = vmatprep.subr.bf16.mxu0 %v7220_v6  ;;  %v6040_v6 = vld [vmem:[%s6655_s15 + $0x1b0] ss:$8 sps:$4 sm:$0xff]   ;;  %v6066_v11 = vld [vmem:[%s6655_s15 + $0x280] ss:$8 sps:$4 sm:$0xff]  }
 0x519   : > { %2403 = vmatpush1.bf16.xpose.msra.mxu1 %v6036_v10  ;;  %2608 = vmatpush1.bf16.xpose.msra.mxu0 %v7224_v5  ;;  %v6041_v5 = vld [vmem:[%s6655_s15 + $0x1c4] ss:$8 sps:$4 sm:$0xff]   ;;  %v6067_v10 = vld [vmem:[%s6655_s15 + $0x294] ss:$8 sps:$4 sm:$0xff]  }
 0x51a   : > { %2404 = vmatprep.subr.bf16.mxu1 %v6037_v9  ;;  %2609 = vmatprep.subr.bf16.mxu0 %v7228_v4  ;;  %v6042_v4 = vld [vmem:[%s6655_s15 + $0x1c0] ss:$8 sps:$4 sm:$0xff]   ;;  %v6068_v9 = vld [vmem:[%s6655_s15 + $0x290] ss:$8 sps:$4 sm:$0xff]  }
 0x521   : > { %2405 = vmatpush1.bf16.xpose.msra.mxu1 %v6038_v8  ;;  %2610 = vmatpush1.bf16.xpose.msra.mxu0 %v7232_v3  ;;  %v6043_v3 = vld [vmem:[%s6655_s15 + $0x1d4] ss:$8 sps:$4 sm:$0xff]   ;;  %v6069_v8 = vld [vmem:[%s6655_s15 + $0x2a4] ss:$8 sps:$4 sm:$0xff]  }
 0x522   : > { %2406 = vmatprep.subr.bf16.mxu1 %v6039_v7  ;;  %2611 = vmatprep.subr.bf16.mxu0 %v7986_v22  ;;  %v6070_v7 = vld [vmem:[%s6655_s15 + $0x2a0] ss:$8 sps:$4 sm:$0xff]   ;;  %v6071_v22 = vld [vmem:[%s6655_s15 + $0x2b4] ss:$8 sps:$4 sm:$0xff]  }
 0x529   : > { %2407 = vmatpush1.bf16.xpose.msra.mxu1 %v6040_v6  ;;  %2612 = vmatpush1.bf16.xpose.msra.mxu0 %v7987_v55 }
 0x52a   : > { %2408 = vmatprep.subr.bf16.mxu1 %v6041_v5  ;;  %2613 = vmatprep.subr.bf16.mxu0 %v7988_v61 }
 0x531   : > { %2409 = vmatpush1.bf16.xpose.msra.mxu1 %v6042_v4  ;;  %2614 = vmatpush1.bf16.xpose.msra.mxu0 %v7989_v23 }
 0x532   : > { %2410 = vmatprep.subr.bf16.mxu1 %v6043_v3  ;;  %2615 = vmatprep.subr.bf16.mxu0 %v7990_v58 }
 0x539   : > { %2411 = vmatpush1.bf16.xpose.msra.mxu1 %v6044_v20  ;;  %2616 = vmatpush1.bf16.xpose.msra.mxu0 %v7991_v24 }
 0x53a   : > { %2412 = vmatprep.subr.bf16.mxu1 %v6045_v25  ;;  %2617 = vmatprep.subr.bf16.mxu0 %v7992_v27  ;;  %v6072_v25 = vld [vmem:[%s6655_s15 + $0x2b0] ss:$8 sps:$4 sm:$0xff]   ;;  %v6073_v27 = vld [vmem:[%s6655_s15 + $0x2c4] ss:$8 sps:$4 sm:$0xff]  }
 0x541   : > { %2413 = vmatpush1.bf16.xpose.msra.mxu1 %v6046_v28  ;;  %2618 = vmatpush1.bf16.xpose.msra.mxu0 %v7993_v29  ;;  %v6074_v28 = vld [vmem:[%s6655_s15 + $0x2c0] ss:$8 sps:$4 sm:$0xff]   ;;  %v6075_v29 = vld [vmem:[%s6655_s15 + $0x2d4] ss:$8 sps:$4 sm:$0xff]  }
 0x542   : > { %2414 = vmatprep.subr.bf16.mxu1 %v6047_v30  ;;  %2619 = vmatprep.subr.bf16.mxu0 %v7270_v2  ;;  %v6051_v2 = vld [vmem:[%s6655_s15 + $0x214] ss:$8 sps:$4 sm:$0xff]   ;;  %v6076_v30 = vld [vmem:[%s6655_s15 + $0x2d0] ss:$8 sps:$4 sm:$0xff]  }
 0x549   : > { %2415 = vmatpush1.bf16.xpose.msra.mxu1 %v6048_v32  ;;  %2620 = vmatpush1.bf16.xpose.msra.mxu0 %v7274_v63  ;;  %v5882_v63 = vld [vmem:[#allocation7 + $0x50] sm:$0xff]   ;;  %v6078_v32 = vld [vmem:[%s6655_s15 + $0x2e0] ss:$8 sps:$4 sm:$0xff]  }
 0x54a   : > { %2425 = vmatprep.subr.bf16.mxu1 %v6049_v33  ;;  %5005 = vmatprep.subr.bf16.mxu0 %v5878_v31  ;;  %v6077_v31 = vld [vmem:[%s6655_s15 + $0x2e4] ss:$8 sps:$4 sm:$0xff]   ;;  %v6079_v33 = vld [vmem:[%s6655_s15 + $0x2f4] ss:$8 sps:$4 sm:$0xff]  }
 0x550   : > { %2417 = vmatmul.mubr.bf16.vlgmr.msra.gmra.mrb[4].mxu1 %v7450_v46  ;;  %2622 = vmatmul.mubr.bf16.vlgmr.msra.gmra.mrb[8].mxu0 %v7450_v46 }
 0x551   : > { %2426 = vmatpush1.bf16.xpose.msra.mxu1 %v6050_v36  ;;  %2457 = vmatprep.mubr.bf16.mxu1 %v7452_v47  ;;  %v6082_v36 = vld [vmem:[%s6655_s15 + $0x300] ss:$8 sps:$4 sm:$0xff]  }
 0x552   : > { %2427 = vmatprep.subr.bf16.mxu1 %v6051_v2  ;;  %5006 = vmatpush3.bf16.msra.mxu0 %v5879_v34  ;;  %v6080_v34 = vld [vmem:[%s6655_s15 + $0x2f0] ss:$8 sps:$4 sm:$0xff]   ;;  %v6083_v2 = vld [vmem:[%s6655_s15 + $0x314] ss:$8 sps:$4 sm:$0xff]  }
 0x553   : > { %5007 = vmatprep.subr.bf16.mxu0 %v5880_v35  ;;  %v6081_v35 = vld [vmem:[%s6655_s15 + $0x304] ss:$8 sps:$4 sm:$0xff]  }
 0x556   : > { %5008 = vmatpush3.bf16.msra.mxu0 %v5881_v37  ;;  %v6084_v37 = vld [vmem:[%s6655_s15 + $0x310] ss:$8 sps:$4 sm:$0xff]  }
 0x557   : > { %5009 = vmatprep.subr.bf16.mxu0 %v5882_v63  ;;  %v6085_v63 = vld [vmem:[%s6655_s15 + $0x324] ss:$8 sps:$4 sm:$0xff]  }
 0x559   : > { %2428 = vmatpush1.bf16.xpose.msra.mxu1 %v6052_v40  ;;  %v6088_v40 = vld [vmem:[%s6655_s15 + $0x330] ss:$8 sps:$4 sm:$0xff]  }
 0x55a   : > { %2429 = vmatprep.subr.bf16.mxu1 %v6053_v41  ;;  %5010 = vmatpush3.bf16.msra.mxu0 %v5883_v38  ;;  %v6086_v38 = vld [vmem:[%s6655_s15 + $0x320] ss:$8 sps:$4 sm:$0xff]   ;;  %v6089_v41 = vld [vmem:[%s6655_s15 + $0x344] ss:$8 sps:$4 sm:$0xff]  }
 0x55b   : > { %5011 = vmatprep.subr.bf16.mxu0 %v5884_v39  ;;  %v6087_v39 = vld [vmem:[%s6655_s15 + $0x334] ss:$8 sps:$4 sm:$0xff]  }
 0x55e   : > { %5012 = vmatpush3.bf16.msra.mxu0 %v5885_v42  ;;  %v6090_v42 = vld [vmem:[%s6655_s15 + $0x340] ss:$8 sps:$4 sm:$0xff]  }
 0x55f   : > { %5013 = vmatprep.subr.bf16.mxu0 %v5886_v43  ;;  %v6091_v43 = vld [vmem:[%s6655_s15 + $0x354] ss:$8 sps:$4 sm:$0xff]  }
 0x561   : > { %2430 = vmatpush1.bf16.xpose.msra.mxu1 %v6054_v48  ;;  %v6094_v48 = vld [vmem:[%s6655_s15 + $0x360] ss:$8 sps:$4 sm:$0xff]  }
 0x562   : > { %2431 = vmatprep.subr.bf16.mxu1 %v6055_v49  ;;  %5014 = vmatpush3.bf16.msra.mxu0 %v5887_v44  ;;  %v6092_v44 = vld [vmem:[%s6655_s15 + $0x350] ss:$8 sps:$4 sm:$0xff]   ;;  %v5894_v49 = vld [vmem:[#allocation7 + $0x140] sm:$0xff]  }
 0x563   : > { %5015 = vmatprep.subr.bf16.mxu0 %v5888_v45  ;;  %v6093_v45 = vld [vmem:[%s6655_s15 + $0x364] ss:$8 sps:$4 sm:$0xff]  }
 0x566   : > { %5016 = vmatpush3.bf16.msra.mxu0 %v5889_v50  ;;  %v6095_v50 = vld [vmem:[%s6655_s15 + $0x374] ss:$8 sps:$4 sm:$0xff]  }
 0x567   : > { %5017 = vmatprep.subr.bf16.mxu0 %v5890_v51  ;;  %v5895_v51 = vld [vmem:[#allocation7 + $0x100] sm:$0xff]  }
 0x569   : > { %2432 = vmatpush1.bf16.xpose.msra.mxu1 %v6056_v13  ;;  %v5897_v13 = vld [vmem:[#allocation7 + $0x108] sm:$0xff]  }
 0x56a   : > { %2433 = vmatprep.subr.bf16.mxu1 %v6057_v54  ;;  %5018 = vmatpush3.bf16.msra.mxu0 %v5891_v52  ;;  %v6096_v52 = vld [vmem:[%s6655_s15 + $0x370] ss:$8 sps:$4 sm:$0xff]  }
 0x56b   : > { %5019 = vmatprep.subr.bf16.mxu0 %v5892_v53  ;;  %v5896_v53 = vld [vmem:[#allocation7 + $0x148] sm:$0xff]   ;;  %v5898_v54 = vld [vmem:[#allocation7 + $0x150] sm:$0xff]  }
 0x56e   : > { %5020 = vmatpush3.bf16.msra.mxu0 %v5893_v56  ;;  %v6097_v56 = vld [vmem:[%s6655_s15 + $0x384] ss:$8 sps:$4 sm:$0xff]  }
 0x56f   : > { %5049 = vmatprep.subr.bf16.mxu0 %v5894_v49  ;;  %v8004_v49 = vld [vmem:[#allocation30_spill] sm:$0xff] }
 0x571   : > { %2434 = vmatpush1.bf16.xpose.msra.mxu1 %v6058_v57  ;;  %v5899_v57 = vld [vmem:[#allocation7 + $0x110] sm:$0xff]  }
 0x572   : > { %2435 = vmatprep.subr.bf16.mxu1 %v6059_v62  ;;  %v6098_v62 = vld [vmem:[%s6655_s15 + $0x380] ss:$8 sps:$4 sm:$0xff]  }
 0x579   : > { %2436 = vmatpush1.bf16.xpose.msra.mxu1 %v6060_v18  ;;  %v5900_v18 = vld [vmem:[#allocation7 + $0x158] sm:$0xff]  }
 0x57a   : > { %2437 = vmatprep.subr.bf16.mxu1 %v6061_v19  ;;  %v5901_v19 = vld [vmem:[#allocation7 + $0x118] sm:$0xff]  }
 0x581   : > { %2438 = vmatpush1.bf16.xpose.msra.mxu1 %v6062_v17  ;;  %v5902_v17 = vld [vmem:[#allocation7 + $0x160] sm:$0xff]  }
 0x582   : > { %2439 = vmatprep.subr.bf16.mxu1 %v6063_v15  ;;  %v6099_v15 = vld [vmem:[%s6655_s15 + $0x394] ss:$8 sps:$4 sm:$0xff]  }
 0x589   : > { %2440 = vmatpush1.bf16.xpose.msra.mxu1 %v6064_v14  ;;  %v5903_v14 = vld [vmem:[#allocation7 + $0x120] sm:$0xff]  }
 0x58a   : > { %2441 = vmatprep.subr.bf16.mxu1 %v6065_v12  ;;  %v6100_v12 = vld [vmem:[%s6655_s15 + $0x390] ss:$8 sps:$4 sm:$0xff]  }
 0x591   : > { %2442 = vmatpush1.bf16.xpose.msra.mxu1 %v6066_v11  ;;  %v5904_v11 = vld [vmem:[#allocation7 + $0x168] sm:$0xff]  }
 0x592   : > { %2443 = vmatprep.subr.bf16.mxu1 %v6067_v10  ;;  %v5905_v10 = vld [vmem:[#allocation7 + $0x128] sm:$0xff]  }
 0x599   : > { %2444 = vmatpush1.bf16.xpose.msra.mxu1 %v6068_v9  ;;  %v5906_v9 = vld [vmem:[#allocation7 + $0x170] sm:$0xff]  }
 0x59a   : > { %2445 = vmatprep.subr.bf16.mxu1 %v6069_v8  ;;  %v6101_v8 = vld [vmem:[%s6655_s15 + $0x3a4] ss:$8 sps:$4 sm:$0xff]  }
 0x5a1   : > { %2446 = vmatpush1.bf16.xpose.msra.mxu1 %v6070_v7  ;;  %v5907_v7 = vld [vmem:[#allocation7 + $0x130] sm:$0xff]  }
 0x5a2   : > { %2447 = vmatprep.subr.bf16.mxu1 %v6071_v22  ;;  %v6102_v22 = vld [vmem:[%s6655_s15 + $0x3a0] ss:$8 sps:$4 sm:$0xff]  }
 0x5a3   : > { %v2377_v6 = vpop.f32.mrb[0].mxu1  ;;  %v7548_v55 = vpop.f32.mrb[4].mxu0 }
 0x5a4   : > { %v2379_v5 = vpop.f32.mrb[1].mxu1  ;;  %v7550_v61 = vpop.f32.mrb[5].mxu0  ;;  %v2671_v58 = vpack.c.bf16 %v2377_v6, %v2377_v6  ;;  %v5908_v6 = vld [vmem:[#allocation7 + $0x178] sm:$0xff]  }
 0x5a5   : > { %v2672_v4 = vpack.c.bf16 %v2379_v5, %v2379_v5  ;;  %v2381_v23 = vpop.f32.mrb[2].mxu1  ;;  %v2545_v3 = vpop.f32.mrb[6].mxu0  ;;  %v6103_v5 = vld [vmem:[%s6655_s15 + $0x3b4] ss:$8 sps:$4 sm:$0xff]  }
 0x5a6   : > { %v2382_v20 = vpop.f32.mrb[3].mxu1  ;;  %v2546_v24 = vpop.f32.mrb[7].mxu0 }
 0x5a7   : > { %3750 = vmatprep.mubr.bf16.mxu0 %v2672_v4  ;;  %v5909_v4 = vld [vmem:[#allocation7 + $0x138] sm:$0xff]  }
 0x5a8   : > { %3751 = vmatmul.mubr.bf16.vlgmr.msra.gmra.mrb[12].mxu0 %v2671_v58 }
 0x5a9   : > { %2448 = vmatpush1.bf16.xpose.msra.mxu1 %v6072_v25  ;;  %5050 = vmatpush3.bf16.msra.mxu0 %v5895_v51  ;;  %v8006_v51 = vld [vmem:[#allocation32_spill] sm:$0xff] }
 0x5aa   : > { %2449 = vmatprep.subr.bf16.mxu1 %v6073_v27  ;;  %5051 = vmatprep.subr.bf16.mxu0 %v5896_v53  ;;  %v5910_v27 = vld [vmem:[#allocation7 + $0x240] sm:$0xff]  }
 0x5ad   : > { %5052 = vmatpush3.bf16.msra.mxu0 %v5897_v13 }
 0x5ae   : > { %5053 = vmatprep.subr.bf16.mxu0 %v5898_v54 }
 0x5b1   : > { %2450 = vmatpush1.bf16.xpose.msra.mxu1 %v6074_v28  ;;  %5054 = vmatpush3.bf16.msra.mxu0 %v5899_v57  ;;  %v8007_v57 = vld [vmem:[#allocation33_spill] sm:$0xff] }
 0x5b2   : > { %2451 = vmatprep.subr.bf16.mxu1 %v6075_v29  ;;  %5055 = vmatprep.subr.bf16.mxu0 %v5900_v18  ;;  %v8009_v18 = vld [vmem:[#allocation35_spill] sm:$0xff] }
 0x5b5   : > { %5056 = vmatpush3.bf16.msra.mxu0 %v5901_v19  ;;  %v8010_v19 = vld [vmem:[#allocation36_spill] sm:$0xff] }
 0x5b6   : > { %5057 = vmatprep.subr.bf16.mxu0 %v5902_v17  ;;  %v8011_v17 = vld [vmem:[#allocation37_spill] sm:$0xff] }
 0x5b9   : > { %2452 = vmatpush1.bf16.xpose.msra.mxu1 %v6076_v30  ;;  %5058 = vmatpush3.bf16.msra.mxu0 %v5903_v14  ;;  %v6104_v30 = vld [vmem:[%s6655_s15 + $0x3b0] ss:$8 sps:$4 sm:$0xff]  }
 0x5ba   : > { %2453 = vmatprep.subr.bf16.mxu1 %v6077_v31  ;;  %5059 = vmatprep.subr.bf16.mxu0 %v5904_v11  ;;  %v6105_v31 = vld [vmem:[%s6655_s15 + $0x3c4] ss:$8 sps:$4 sm:$0xff]   ;;  %v8015_v11 = vld [vmem:[#allocation41_spill] sm:$0xff] }
 0x5bb   : > { %v8013_v14 = vld [vmem:[#allocation39_spill] sm:$0xff] }
 0x5bd   : > { %5060 = vmatpush3.bf16.msra.mxu0 %v5905_v10  ;;  %v8016_v10 = vld [vmem:[#allocation42_spill] sm:$0xff] }
 0x5be   : > { %5061 = vmatprep.subr.bf16.mxu0 %v5906_v9 }
 0x5c1   : > { %2454 = vmatpush1.bf16.xpose.msra.mxu1 %v6078_v32  ;;  %5062 = vmatpush3.bf16.msra.mxu0 %v5907_v7  ;;  %v6106_v32 = vld [vmem:[%s6655_s15 + $0x3c0] ss:$8 sps:$4 sm:$0xff]  }
 0x5c2   : > { %2455 = vmatprep.subr.bf16.mxu1 %v6079_v33  ;;  %5063 = vmatprep.subr.bf16.mxu0 %v5908_v6  ;;  %v6107_v33 = vld [vmem:[%s6655_s15 + $0x3d4] ss:$8 sps:$4 sm:$0xff]   ;;  %v5911_v6 = vld [vmem:[#allocation7 + $0x200] sm:$0xff]  }
 0x5c5   : > { %5064 = vmatpush3.bf16.msra.mxu0 %v5909_v4 }
 0x5c6   : > { %5093 = vmatprep.subr.bf16.mxu0 %v5910_v27  ;;  %v8017_v27 = vld [vmem:[#allocation43_spill] sm:$0xff] }
 0x5c9   : > { %2456 = vmatpush1.bf16.xpose.msra.mxu1 %v6080_v34  ;;  %v6108_v34 = vld [vmem:[%s6655_s15 + $0x3d0] ss:$8 sps:$4 sm:$0xff]  }
 0x5ca   : > { %2466 = vmatprep.subr.bf16.mxu1 %v6081_v35  ;;  %v6109_v35 = vld [vmem:[%s6655_s15 + $0x3e4] ss:$8 sps:$4 sm:$0xff]  }
 0x5d0   : > { %2458 = vmatmul.mubr.bf16.vlgmr.msra.gmra.mrb[8].mxu1 %v7450_v46 }
 0x5d1   : > { %2467 = vmatpush1.bf16.xpose.msra.mxu1 %v6082_v36  ;;  %2498 = vmatprep.mubr.bf16.mxu1 %v7452_v47  ;;  %v6110_v36 = vld [vmem:[%s6655_s15 + $0x3e0] ss:$8 sps:$4 sm:$0xff]  }
 0x5d2   : > { %2468 = vmatprep.subr.bf16.mxu1 %v6083_v2  ;;  %v6111_v2 = vld [vmem:[%s6655_s15 + $0x3f4] ss:$8 sps:$4 sm:$0xff]  }
 0x5d9   : > { %2469 = vmatpush1.bf16.xpose.msra.mxu1 %v6084_v37  ;;  %v6112_v37 = vld [vmem:[%s6655_s15 + $0x3f0] ss:$8 sps:$4 sm:$0xff]  }
 0x5da   : > { %2470 = vmatprep.subr.bf16.mxu1 %v6085_v63  ;;  %v7994_v63 = vld [vmem:[#allocation20_spill] sm:$0xff] }
 0x5e1   : > { %2471 = vmatpush1.bf16.xpose.msra.mxu1 %v6086_v38  ;;  %v7995_v38 = vld [vmem:[#allocation21_spill] sm:$0xff] }
 0x5e2   : > { %2472 = vmatprep.subr.bf16.mxu1 %v6087_v39  ;;  %v7996_v39 = vld [vmem:[#allocation22_spill] sm:$0xff] }
 0x5e9   : > { %2473 = vmatpush1.bf16.xpose.msra.mxu1 %v6088_v40  ;;  %v7997_v40 = vld [vmem:[#allocation23_spill] sm:$0xff] }
 0x5ea   : > { %2474 = vmatprep.subr.bf16.mxu1 %v6089_v41  ;;  %v7998_v41 = vld [vmem:[#allocation24_spill] sm:$0xff] }
 0x5f1   : > { %2475 = vmatpush1.bf16.xpose.msra.mxu1 %v6090_v42  ;;  %v7999_v42 = vld [vmem:[#allocation25_spill] sm:$0xff] }
 0x5f2   : > { %2476 = vmatprep.subr.bf16.mxu1 %v6091_v43  ;;  %v8000_v43 = vld [vmem:[#allocation26_spill] sm:$0xff] }
 0x5f9   : > { %2477 = vmatpush1.bf16.xpose.msra.mxu1 %v6092_v44  ;;  %v8001_v44 = vld [vmem:[#allocation27_spill] sm:$0xff] }
 0x5fa   : > { %2478 = vmatprep.subr.bf16.mxu1 %v6093_v45  ;;  %v8002_v45 = vld [vmem:[#allocation28_spill] sm:$0xff] }
 0x601   : > { %2479 = vmatpush1.bf16.xpose.msra.mxu1 %v6094_v48  ;;  %v8003_v48 = vld [vmem:[#allocation29_spill] sm:$0xff] }
 0x602   : > { %2480 = vmatprep.subr.bf16.mxu1 %v6095_v50  ;;  %v8005_v50 = vld [vmem:[#allocation31_spill] sm:$0xff] }
 0x609   : > { %2481 = vmatpush1.bf16.xpose.msra.mxu1 %v6096_v52 }
 0x60a   : > { %2482 = vmatprep.subr.bf16.mxu1 %v6097_v56 }
 0x611   : > { %2483 = vmatpush1.bf16.xpose.msra.mxu1 %v6098_v62  ;;  %v8008_v62 = vld [vmem:[#allocation34_spill] sm:$0xff] }
 0x612   : > { %2484 = vmatprep.subr.bf16.mxu1 %v6099_v15  ;;  %v8012_v15 = vld [vmem:[#allocation38_spill] sm:$0xff] }
 0x619   : > { %2485 = vmatpush1.bf16.xpose.msra.mxu1 %v6100_v12  ;;  %v8014_v12 = vld [vmem:[#allocation40_spill] sm:$0xff] }
 0x61a   : > { %2486 = vmatprep.subr.bf16.mxu1 %v6101_v8 }
 0x621   : > { %2487 = vmatpush1.bf16.xpose.msra.mxu1 %v6102_v22 }
 0x622   : > { %2488 = vmatprep.subr.bf16.mxu1 %v6103_v5 }
 0x623   : > { %v7586_v23 = vpop.f32.mrb[4].mxu1  ;;  %v7588_v3 = vpop.f32.mrb[8].mxu0 }
 0x624   : > { %v7590_v58 = vpop.f32.mrb[5].mxu1  ;;  %v7592_v20 = vpop.f32.mrb[9].mxu0 }
 0x625   : > { %v2422_v24 = vpop.f32.mrb[6].mxu1  ;;  %v2627_v25 = vpop.f32.mrb[10].mxu0 }
 0x626   : > { %v2423_v28 = vpop.f32.mrb[7].mxu1  ;;  %v2628_v29 = vpop.f32.mrb[11].mxu0  ;;  %v5912_v24 = vld [vmem:[#allocation7 + $0x248] sm:$0xff]   ;;  %v2680_v25 = vpack.c.bf16 %v7550_v61, %v7550_v61  ;;  %v5918_v61 = vld [vmem:[#allocation7 + $0x260] sm:$0xff]  }
 0x627   : > { %v5913_v28 = vld [vmem:[#allocation7 + $0x208] sm:$0xff]   ;;  %v5914_v29 = vld [vmem:[#allocation7 + $0x250] sm:$0xff]  }
 0x629   : > { %2489 = vmatpush1.bf16.xpose.msra.mxu1 %v6104_v30  ;;  %v8018_v30 = vld [vmem:[#allocation44_spill] sm:$0xff] }
 0x62a   : > { %2490 = vmatprep.subr.bf16.mxu1 %v6105_v31  ;;  %v5915_v31 = vld [vmem:[#allocation7 + $0x210] sm:$0xff]  }
 0x631   : > { %2491 = vmatpush1.bf16.xpose.msra.mxu1 %v6106_v32  ;;  %v5916_v32 = vld [vmem:[#allocation7 + $0x258] sm:$0xff]  }
 0x632   : > { %2492 = vmatprep.subr.bf16.mxu1 %v6107_v33  ;;  %v8019_v33 = vld [vmem:[#allocation45_spill] sm:$0xff] }
 0x639   : > { %2493 = vmatpush1.bf16.xpose.msra.mxu1 %v6108_v34  ;;  %v5917_v34 = vld [vmem:[#allocation7 + $0x218] sm:$0xff]  }
 0x63a   : > { %2494 = vmatprep.subr.bf16.mxu1 %v6109_v35  ;;  %v8020_v35 = vld [vmem:[#allocation46_spill] sm:$0xff] }
 0x641   : > { %2495 = vmatpush1.bf16.xpose.msra.mxu1 %v6110_v36  ;;  %v5919_v36 = vld [vmem:[#allocation7 + $0x220] sm:$0xff]  }
 0x642   : > { %2496 = vmatprep.subr.bf16.mxu1 %v6111_v2  ;;  %v5920_v2 = vld [vmem:[#allocation7 + $0x268] sm:$0xff]  }
 0x649   : > { %2497 = vmatpush1.bf16.xpose.msra.mxu1 %v6112_v37  ;;  %v8021_v37 = vld [vmem:[#allocation47_spill] sm:$0xff] }
 0x64a   : > { %2548 = vmatprep.subr.bf16.mxu1 %v7994_v63  ;;  %v5921_v63 = vld [vmem:[#allocation7 + $0x228] sm:$0xff]  }
 0x650   : > { %2499 = vmatmul.mubr.bf16.vlgmr.msra.gmra.mrb[12].mxu1 %v7450_v46 }
 0x651   : > { %2549 = vmatpush1.bf16.xpose.msra.mxu1 %v7995_v38  ;;  %2580 = vmatprep.mubr.bf16.mxu1 %v7452_v47  ;;  %v5922_v38 = vld [vmem:[#allocation7 + $0x270] sm:$0xff]  }
 0x652   : > { %2550 = vmatprep.subr.bf16.mxu1 %v7996_v39  ;;  %v8022_v39 = vld [vmem:[#allocation48_spill] sm:$0xff] }
 0x659   : > { %2551 = vmatpush1.bf16.xpose.msra.mxu1 %v7997_v40  ;;  %v5923_v40 = vld [vmem:[#allocation7 + $0x230] sm:$0xff]  }
 0x65a   : > { %2552 = vmatprep.subr.bf16.mxu1 %v7998_v41  ;;  %v5924_v41 = vld [vmem:[#allocation7 + $0x278] sm:$0xff]  }
 0x661   : > { %2553 = vmatpush1.bf16.xpose.msra.mxu1 %v7999_v42  ;;  %v8023_v42 = vld [vmem:[#allocation49_spill] sm:$0xff] }
 0x662   : > { %2554 = vmatprep.subr.bf16.mxu1 %v8000_v43  ;;  %v5925_v43 = vld [vmem:[#allocation7 + $0x238] sm:$0xff]  }
 0x669   : > { %2555 = vmatpush1.bf16.xpose.msra.mxu1 %v8001_v44  ;;  %v5926_v44 = vld [vmem:[#allocation7 + $0x340] sm:$0xff]  }
 0x66a   : > { %2556 = vmatprep.subr.bf16.mxu1 %v8002_v45  ;;  %v8024_v45 = vld [vmem:[#allocation50_spill] sm:$0xff] }
 0x671   : > { %2557 = vmatpush1.bf16.xpose.msra.mxu1 %v8003_v48  ;;  %v5927_v48 = vld [vmem:[#allocation7 + $0x300] sm:$0xff]  }
 0x672   : > { %2558 = vmatprep.subr.bf16.mxu1 %v8004_v49  ;;  %v2679_v49 = vpack.c.bf16 %v7548_v55, %v7548_v55  ;;  %v5933_v55 = vld [vmem:[#allocation7 + $0x318] sm:$0xff]  }
 0x679   : > { %2559 = vmatpush1.bf16.xpose.msra.mxu1 %v8005_v50  ;;  %v5928_v50 = vld [vmem:[#allocation7 + $0x348] sm:$0xff]  }
 0x67a   : > { %2560 = vmatprep.subr.bf16.mxu1 %v8006_v51  ;;  %v2684_v51 = vpack.c.bf16 %v7592_v20, %v7592_v20  ;;  %v5934_v20 = vld [vmem:[#allocation7 + $0x360] sm:$0xff]  }
 0x67b   : > { %v5021_v52 = vpop.f32.mrb[12].mxu0 }
 0x67c   : > { %v5022_v53 = vpop.f32.mrb[13].mxu0 }
 0x67d   : > { %v7618_v13 = vadd.f32 %v5022_v53, %v5021_v52  ;;  %v5024_v54 = vpop.f32.mrb[14].mxu0  ;;  %v5929_v52 = vld [vmem:[#allocation7 + $0x308] sm:$0xff]   ;;  %v6113_v53 = vld [vmem:[%s6655_s15 + $0x5f0] ss:$8 sps:$4 sm:$0xff]   ;;  %s7784_s15 = scalar_lea.hbm %s7835_s7, %s5001_s16 }
 0x67e   : > { %v5025_v56 = vpop.f32.mrb[15].mxu0  ;;  %v5930_v54 = vld [vmem:[#allocation7 + $0x350] sm:$0xff]  }
 0x67f   : > { %v8025_v56 = vld [vmem:[#allocation59_spill] sm:$0xff] }
 0x681   : > { %2561 = vmatpush1.bf16.xpose.msra.mxu1 %v8007_v57  ;;  %v5931_v57 = vld [vmem:[#allocation7 + $0x310] sm:$0xff]  }
 0x682   : > { %2562 = vmatprep.subr.bf16.mxu1 %v8008_v62  ;;  %v5932_v62 = vld [vmem:[#allocation7 + $0x358] sm:$0xff]  }
 0x689   : > { %2563 = vmatpush1.bf16.xpose.msra.mxu1 %v8009_v18  ;;  %v8026_v18 = vld [vmem:[#allocation60_spill] sm:$0xff] }
 0x68a   : > { %2564 = vmatprep.subr.bf16.mxu1 %v8010_v19  ;;  %v8027_v19 = vld [vmem:[#allocation61_spill] sm:$0xff] }
 0x691   : > { %2565 = vmatpush1.bf16.xpose.msra.mxu1 %v8011_v17  ;;  %v5935_v17 = vld [vmem:[#allocation7 + $0x320] sm:$0xff]  }
 0x692   : > { %2566 = vmatprep.subr.bf16.mxu1 %v8012_v15  ;;  %v5936_v15 = vld [vmem:[#allocation7 + $0x368] sm:$0xff]  }
 0x699   : > { %2567 = vmatpush1.bf16.xpose.msra.mxu1 %v8013_v14  ;;  %v5937_v14 = vld [vmem:[#allocation7 + $0x328] sm:$0xff]  }
 0x69a   : > { %2568 = vmatprep.subr.bf16.mxu1 %v8014_v12  ;;  %v8028_v12 = vld [vmem:[#allocation62_spill] sm:$0xff] }
 0x6a1   : > { %2569 = vmatpush1.bf16.xpose.msra.mxu1 %v8015_v11  ;;  %v5938_v11 = vld [vmem:[#allocation7 + $0x370] sm:$0xff]  }
 0x6a2   : > { %2570 = vmatprep.subr.bf16.mxu1 %v8016_v10  ;;  %v8029_v10 = vld [vmem:[#allocation63_spill] sm:$0xff] }
 0x6a3   : > { %v2459_v9 = vpop.f32.mrb[8].mxu1 }
 0x6a4   : > { %v2461_v8 = vpop.f32.mrb[9].mxu1  ;;  %v2675_v5 = vpack.c.bf16 %v2459_v9, %v2459_v9  ;;  %v5939_v9 = vld [vmem:[#allocation7 + $0x330] sm:$0xff]  }
 0x6a5   : > { %v2676_v7 = vpack.c.bf16 %v2461_v8, %v2461_v8  ;;  %v2463_v22 = vpop.f32.mrb[10].mxu1  ;;  %v5941_v8 = vld [vmem:[#allocation7 + $0x338] sm:$0xff]  }
 0x6a6   : > { %v2464_v4 = vpop.f32.mrb[11].mxu1  ;;  %v8031_v22 = vld [vmem:[#allocation65_spill] sm:$0xff] }
 0x6a7   : > { %3830 = vmatprep.mubr.bf16.mxu0 %v2676_v7  ;;  %v8030_v7 = vld [vmem:[#allocation64_spill] sm:$0xff]  ;;  %v8033_v4 = vld [vmem:[#allocation67_spill] sm:$0xff] }
 0x6a8   : > { %3831 = vmatmul.mubr.bf16.vlgmr.msra.gmra.mrb[16].mxu0 %v2675_v5  ;;  %v8032_v5 = vld [vmem:[#allocation66_spill] sm:$0xff] }
 0x6a9   : > { %5094 = vmatpush3.bf16.msra.mxu0 %v5911_v6  ;;  %2571 = vmatpush1.bf16.xpose.msra.mxu1 %v8017_v27  ;;  %v2683_v6 = vpack.c.bf16 %v7588_v3, %v7588_v3  ;;  %v8036_v27 = vld [vmem:[#allocation70_spill] sm:$0xff]  ;;  %v8041_v3 = vld [vmem:[#allocation75_spill] sm:$0xff] }
 0x6aa   : > { %3910 = vmatprep.mubr.bf16.mxu0 %v2680_v25  ;;  %5095 = vmatprep.subr.bf16.mxu0 %v5912_v24  ;;  %v8034_v24 = vld [vmem:[#allocation68_spill] sm:$0xff]  ;;  %v8035_v25 = vld [vmem:[#allocation69_spill] sm:$0xff] }
 0x6ab   : > { %2572 = vmatprep.subr.bf16.mxu1 %v8018_v30  ;;  %v8039_v30 = vld [vmem:[#allocation73_spill] sm:$0xff] }
 0x6ad   : > { %5096 = vmatpush3.bf16.msra.mxu0 %v5913_v28  ;;  %v8037_v28 = vld [vmem:[#allocation71_spill] sm:$0xff] }
 0x6ae   : > { %5097 = vmatprep.subr.bf16.mxu0 %v5914_v29  ;;  %v8038_v29 = vld [vmem:[#allocation72_spill] sm:$0xff] }
 0x6b1   : > { %5098 = vmatpush3.bf16.msra.mxu0 %v5915_v31  ;;  %2573 = vmatpush1.bf16.xpose.msra.mxu1 %v8019_v33  ;;  %v8040_v31 = vld [vmem:[#allocation74_spill] sm:$0xff]  ;;  %v8043_v33 = vld [vmem:[#allocation77_spill] sm:$0xff] }
 0x6b2   : > { %5099 = vmatprep.subr.bf16.mxu0 %v5916_v32  ;;  %2574 = vmatprep.subr.bf16.mxu1 %v8020_v35  ;;  %v8042_v32 = vld [vmem:[#allocation76_spill] sm:$0xff] }
 0x6b3   : > { %v8046_v35 = vld [vmem:[#allocation80_spill] sm:$0xff] }
 0x6b5   : > { %5100 = vmatpush3.bf16.msra.mxu0 %v5917_v34  ;;  %v8044_v34 = vld [vmem:[#allocation78_spill] sm:$0xff] }
 0x6b6   : > { %5101 = vmatprep.subr.bf16.mxu0 %v5918_v61  ;;  %v8045_v61 = vld [vmem:[#allocation79_spill] sm:$0xff] }
 0x6b9   : > { %5102 = vmatpush3.bf16.msra.mxu0 %v5919_v36  ;;  %2575 = vmatpush1.bf16.xpose.msra.mxu1 %v8021_v37 }
 0x6ba   : > { %5103 = vmatprep.subr.bf16.mxu0 %v5920_v2  ;;  %2576 = vmatprep.subr.bf16.mxu1 %v8022_v39  ;;  %v8047_v2 = vld [vmem:[#allocation81_spill] sm:$0xff]  ;;  %v8048_v39 = vld [vmem:[#allocation82_spill] sm:$0xff] }
 0x6bd   : > { %5104 = vmatpush3.bf16.msra.mxu0 %v5921_v63 }
 0x6be   : > { %5105 = vmatprep.subr.bf16.mxu0 %v5922_v38 }
 0x6c1   : > { %5106 = vmatpush3.bf16.msra.mxu0 %v5923_v40  ;;  %2577 = vmatpush1.bf16.xpose.msra.mxu1 %v8023_v42  ;;  %v8049_v40 = vld [vmem:[#allocation83_spill] sm:$0xff]  ;;  %v5943_v42 = vld [vmem:[#allocation7 + $0x80] sm:$0xff]  }
 0x6c2   : > { %5107 = vmatprep.subr.bf16.mxu0 %v5924_v41  ;;  %2578 = vmatprep.subr.bf16.mxu1 %v8024_v45  ;;  %v5942_v41 = vld [vmem:[#allocation7 + $0xc0] sm:$0xff]   ;;  %v5952_v45 = vld [vmem:[#allocation7 + $0xe8] sm:$0xff]  }
 0x6c5   : > { %5108 = vmatpush3.bf16.msra.mxu0 %v5925_v43  ;;  %v5944_v43 = vld [vmem:[#allocation7 + $0xc8] sm:$0xff]  }
 0x6c6   : > { %5137 = vmatprep.subr.bf16.mxu0 %v5926_v44  ;;  %v2674_v44 = vpack.c.bf16 %v7590_v58, %v7590_v58  ;;  %v5953_v58 = vld [vmem:[#allocation7 + $0xa8] sm:$0xff]  }
 0x6c8   : > { %3911 = vmatmul.mubr.bf16.vlgmr.msra.gmra.mrb[20].mxu0 %v2679_v49  ;;  %v5956_v49 = vld [vmem:[#allocation7 + $0xf8] sm:$0xff]  }
 0x6c9   : > { %5138 = vmatpush3.bf16.msra.mxu0 %v5927_v48  ;;  %3990 = vmatprep.mubr.bf16.mxu0 %v2684_v51  ;;  %v5955_v48 = vld [vmem:[#allocation7 + $0xb0] sm:$0xff]   ;;  %v5958_v51 = vld [vmem:[#allocation7 + $0x1c0] sm:$0xff]  }
 0x6ca   : > { %2579 = vmatpush1.bf16.xpose.msra.mxu1 %v6113_v53  ;;  %5139 = vmatprep.subr.bf16.mxu0 %v5928_v50  ;;  %v5957_v50 = vld [vmem:[#allocation7 + $0xb8] sm:$0xff]   ;;  %v2673_v53 = vpack.c.bf16 %v7586_v23, %v7586_v23 }
 0x6cb   : > { %2630 = vmatprep.subr.bf16.mxu1 %v8025_v56 }
 0x6cd   : > { %5140 = vmatpush3.bf16.msra.mxu0 %v5929_v52  ;;  %v5959_v52 = vld [vmem:[#allocation7 + $0x180] sm:$0xff]  }
 0x6ce   : > { %5141 = vmatprep.subr.bf16.mxu0 %v5930_v54  ;;  %v5960_v54 = vld [vmem:[#allocation7 + $0x1c8] sm:$0xff]  }
 0x6d1   : > { %2581 = vmatmul.mubr.bf16.vlgmr.msra.gmra.mrb[16].mxu1 %v7450_v46  ;;  %5142 = vmatpush3.bf16.msra.mxu0 %v5931_v57  ;;  %v5961_v57 = vld [vmem:[#allocation7 + $0x188] sm:$0xff]  }
 0x6d2   : > { %2631 = vmatpush1.bf16.xpose.msra.mxu1 %v8026_v18  ;;  %2662 = vmatprep.mubr.bf16.mxu1 %v7452_v47  ;;  %v5940_v47 = vld [vmem:[#allocation7 + $0x378] sm:$0xff]  }
 0x6d3   : > { %5143 = vmatprep.subr.bf16.mxu0 %v5932_v62  ;;  %2632 = vmatprep.subr.bf16.mxu1 %v8027_v19  ;;  %v5962_v62 = vld [vmem:[#allocation7 + $0x1d0] sm:$0xff]   ;;  %v5964_v18 = vld [vmem:[#allocation7 + $0x1d8] sm:$0xff]  }
 0x6d5   : > { %5144 = vmatpush3.bf16.msra.mxu0 %v5933_v55  ;;  %v5963_v55 = vld [vmem:[#allocation7 + $0x190] sm:$0xff]  }
 0x6d6   : > { %5145 = vmatprep.subr.bf16.mxu0 %v5934_v20  ;;  %v5965_v20 = vld [vmem:[#allocation7 + $0x198] sm:$0xff]  }
 0x6d9   : > { %5146 = vmatpush3.bf16.msra.mxu0 %v5935_v17  ;;  %v5966_v17 = vld [vmem:[#allocation7 + $0x1e0] sm:$0xff]  }
 0x6da   : > { %2633 = vmatpush1.bf16.xpose.msra.mxu1 %v8028_v12  ;;  %5147 = vmatprep.subr.bf16.mxu0 %v5936_v15 }
 0x6db   : > { %2634 = vmatprep.subr.bf16.mxu1 %v8029_v10  ;;  %v5968_v10 = vld [vmem:[#allocation7 + $0x1e8] sm:$0xff]  }
 0x6dd   : > { %5148 = vmatpush3.bf16.msra.mxu0 %v5937_v14 }
 0x6de   : > { %5149 = vmatprep.subr.bf16.mxu0 %v5938_v11  ;;  %v5967_v11 = vld [vmem:[#allocation7 + $0x1a0] sm:$0xff]  }
 0x6e1   : > { %5150 = vmatpush3.bf16.msra.mxu0 %v5939_v9  ;;  %v5969_v9 = vld [vmem:[#allocation7 + $0x1a8] sm:$0xff]  }
 0x6e2   : > { %2635 = vmatpush1.bf16.xpose.msra.mxu1 %v8030_v7  ;;  %5151 = vmatprep.subr.bf16.mxu0 %v5940_v47  ;;  %v5970_v47 = vld [vmem:[#allocation7 + $0x1f0] sm:$0xff]   ;;  %v5972_v7 = vld [vmem:[#allocation7 + $0x1f8] sm:$0xff]  }
 0x6e3   : > { %2636 = vmatprep.subr.bf16.mxu1 %v8031_v22  ;;  %v5973_v22 = vld [vmem:[#allocation7 + $0x1b8] sm:$0xff]  }
 0x6e5   : > { %5152 = vmatpush3.bf16.msra.mxu0 %v5941_v8  ;;  %v5971_v8 = vld [vmem:[#allocation7 + $0x1b0] sm:$0xff]  }
 0x6e8   : > { %3991 = vmatmul.mubr.bf16.vlgmr.msra.gmra.mrb[24].mxu0 %v2683_v6  ;;  %v5974_v6 = vld [vmem:[#allocation7 + $0x2c0] sm:$0xff]  }
 0x6ea   : > { %2637 = vmatpush1.bf16.xpose.msra.mxu1 %v8032_v5  ;;  %v5975_v5 = vld [vmem:[#allocation7 + $0x280] sm:$0xff]  }
 0x6eb   : > { %2638 = vmatprep.subr.bf16.mxu1 %v8033_v4 }
 0x6f2   : > { %2639 = vmatpush1.bf16.xpose.msra.mxu1 %v8034_v24  ;;  %v5976_v24 = vld [vmem:[#allocation7 + $0x2c8] sm:$0xff]  }
 0x6f3   : > { %2640 = vmatprep.subr.bf16.mxu1 %v8035_v25  ;;  %v5977_v25 = vld [vmem:[#allocation7 + $0x288] sm:$0xff]  }
 0x6fa   : > { %2641 = vmatpush1.bf16.xpose.msra.mxu1 %v8036_v27  ;;  %v5978_v27 = vld [vmem:[#allocation7 + $0x2d0] sm:$0xff]  }
 0x6fb   : > { %2642 = vmatprep.subr.bf16.mxu1 %v8037_v28  ;;  %v5979_v28 = vld [vmem:[#allocation7 + $0x290] sm:$0xff]  }
 0x702   : > { %2643 = vmatpush1.bf16.xpose.msra.mxu1 %v8038_v29  ;;  %v5980_v29 = vld [vmem:[#allocation7 + $0x2d8] sm:$0xff]  }
 0x703   : > { %2644 = vmatprep.subr.bf16.mxu1 %v8039_v30  ;;  %v5981_v30 = vld [vmem:[#allocation7 + $0x298] sm:$0xff]  }
 0x70a   : > { %2645 = vmatpush1.bf16.xpose.msra.mxu1 %v8040_v31 }
 0x70b   : > { %2646 = vmatprep.subr.bf16.mxu1 %v8041_v3  ;;  %v5982_v3 = vld [vmem:[#allocation7 + $0x2e0] sm:$0xff]  }
 0x712   : > { %2647 = vmatpush1.bf16.xpose.msra.mxu1 %v8042_v32 }
 0x713   : > { %2648 = vmatprep.subr.bf16.mxu1 %v8043_v33 }
 0x71a   : > { %2649 = vmatpush1.bf16.xpose.msra.mxu1 %v8044_v34 }
 0x71b   : > { %2650 = vmatprep.subr.bf16.mxu1 %v8045_v61 }
 0x722   : > { %2651 = vmatpush1.bf16.xpose.msra.mxu1 %v8046_v35  ;;  %v5983_v35 = vld [vmem:[#allocation7 + $0x2a0] sm:$0xff]  }
 0x723   : > { %v7671_v36 = vpop.f32.mrb[12].mxu1  ;;  %2652 = vmatprep.subr.bf16.mxu1 %v8047_v2  ;;  %v5985_v2 = vld [vmem:[#allocation7 + $0x2a8] sm:$0xff]  }
 0x724   : > { %v2502_v37 = vpop.f32.mrb[13].mxu1  ;;  %v2677_v4 = vpack.c.bf16 %v7671_v36, %v7671_v36  ;;  %v5984_v36 = vld [vmem:[#allocation7 + $0x2e8] sm:$0xff]  }
 0x725   : > { %v2504_v63 = vpop.f32.mrb[14].mxu1  ;;  %v2678_v56 = vpack.c.bf16 %v2502_v37, %v2502_v37  ;;  %v5986_v37 = vld [vmem:[#allocation7 + $0x2f0] sm:$0xff]  }
 0x726   : > { %v2505_v38 = vpop.f32.mrb[15].mxu1 }
 0x72a   : > { %2653 = vmatpush1.bf16.xpose.msra.mxu1 %v8048_v39 }
 0x72b   : > { %2654 = vmatprep.subr.bf16.mxu1 %v8049_v40 }
 0x732   : > { %2655 = vmatpush1.bf16.xpose.msra.mxu1 %v7384_v21  ;;  %v5946_v21 = vld [vmem:[#allocation7 + $0xd0] sm:$0xff]  }
 0x733   : > { %2656 = vmatprep.subr.bf16.mxu1 %v7388_v1  ;;  %v5945_v1 = vld [vmem:[#allocation7 + $0x88] sm:$0xff]  }
 0x73a   : > { %2657 = vmatpush1.bf16.xpose.msra.mxu1 %v7392_v59  ;;  %v5951_v59 = vld [vmem:[#allocation7 + $0xa0] sm:$0xff]  }
 0x73b   : > { %2658 = vmatprep.subr.bf16.mxu1 %v7396_v16  ;;  %v5947_v16 = vld [vmem:[#allocation7 + $0x90] sm:$0xff]  }
 0x742   : > { %2659 = vmatpush1.bf16.xpose.msra.mxu1 %v7400_v0  ;;  %v5949_v0 = vld [vmem:[#allocation7 + $0x98] sm:$0xff]  }
 0x743   : > { %2660 = vmatprep.subr.bf16.mxu1 %v7404_v60  ;;  %v5948_v60 = vld [vmem:[#allocation7 + $0xd8] sm:$0xff]  }
 0x74a   : > { %2661 = vmatpush1.bf16.xpose.msra.mxu1 %v7408_v26  ;;  %v5950_v26 = vld [vmem:[#allocation7 + $0xe0] sm:$0xff]  }
 0x74b   : > { %5027 = vmatprep.subr.bf16.mxu1 %v5942_v41  ;;  %v5987_v41 = vld [vmem:[#allocation7 + $0x2b0] sm:$0xff]  }
 0x751   : > { %2663 = vmatmul.mubr.bf16.vlgmr.msra.gmra.mrb[20].mxu1 %v7450_v46  ;;  %v5954_v46 = vld [vmem:[#allocation7 + $0xf0] sm:$0xff]  }
 0x752   : > { %5028 = vmatpush3.bf16.msra.mxu1 %v5943_v42  ;;  %3790 = vmatprep.mubr.bf16.mxu1 %v2674_v44  ;;  %v5989_v44 = vld [vmem:[#allocation7 + $0x2b8] sm:$0xff]  }
 0x753   : > { %5029 = vmatprep.subr.bf16.mxu1 %v5944_v43  ;;  %v5988_v43 = vld [vmem:[#allocation7 + $0x2f8] sm:$0xff]  }
 0x756   : > { %5030 = vmatpush3.bf16.msra.mxu1 %v5945_v1  ;;  %v5990_v1 = vld [vmem:[#allocation7 + $0x3c0] sm:$0xff]  }
 0x757   : > { %5031 = vmatprep.subr.bf16.mxu1 %v5946_v21  ;;  %v5991_v21 = vld [vmem:[#allocation7 + $0x380] sm:$0xff]  }
 0x75a   : > { %5032 = vmatpush3.bf16.msra.mxu1 %v5947_v16 }
 0x75b   : > { %5033 = vmatprep.subr.bf16.mxu1 %v5948_v60  ;;  %v5992_v60 = vld [vmem:[#allocation7 + $0x3c8] sm:$0xff]  }
 0x75e   : > { %5034 = vmatpush3.bf16.msra.mxu1 %v5949_v0  ;;  %v5993_v0 = vld [vmem:[#allocation7 + $0x388] sm:$0xff]  }
 0x75f   : > { %5035 = vmatprep.subr.bf16.mxu1 %v5950_v26  ;;  %v5994_v26 = vld [vmem:[#allocation7 + $0x3d0] sm:$0xff]  }
 0x762   : > { %5036 = vmatpush3.bf16.msra.mxu1 %v5951_v59  ;;  %v5995_v59 = vld [vmem:[#allocation7 + $0x390] sm:$0xff]  }
 0x763   : > { %5037 = vmatprep.subr.bf16.mxu1 %v5952_v45  ;;  %v5996_v45 = vld [vmem:[#allocation7 + $0x3d8] sm:$0xff]  }
 0x766   : > { %5038 = vmatpush3.bf16.msra.mxu1 %v5953_v58  ;;  %v5997_v58 = vld [vmem:[#allocation7 + $0x398] sm:$0xff]  }
 0x767   : > { %5039 = vmatprep.subr.bf16.mxu1 %v5954_v46 }
 0x76a   : > { %5040 = vmatpush3.bf16.msra.mxu1 %v5955_v48  ;;  %v5998_v48 = vld [vmem:[#allocation7 + $0x3e0] sm:$0xff]  }
 0x76b   : > { %5041 = vmatprep.subr.bf16.mxu1 %v5956_v49 }
 0x76e   : > { %5042 = vmatpush3.bf16.msra.mxu1 %v5957_v50 }
 0x76f   : > { %5071 = vmatprep.subr.bf16.mxu1 %v5958_v51 }
 0x771   : > { %3791 = vmatmul.mubr.bf16.vlgmr.msra.gmra.mrb[24].mxu1 %v2673_v53  ;;  %v5999_v53 = vld [vmem:[#allocation7 + $0x3a0] sm:$0xff]  }
 0x772   : > { %5072 = vmatpush3.bf16.msra.mxu1 %v5959_v52  ;;  %3870 = vmatprep.mubr.bf16.mxu1 %v2678_v56  ;;  %v6001_v56 = vld [vmem:[#allocation7 + $0x3a8] sm:$0xff]  }
 0x773   : > { %5073 = vmatprep.subr.bf16.mxu1 %v5960_v54  ;;  %v6000_v54 = vld [vmem:[#allocation7 + $0x3e8] sm:$0xff]  }
 0x776   : > { %5074 = vmatpush3.bf16.msra.mxu1 %v5961_v57  ;;  %v6002_v57 = vld [vmem:[#allocation7 + $0x3f0] sm:$0xff]  }
 0x777   : > { %5075 = vmatprep.subr.bf16.mxu1 %v5962_v62  ;;  %v6003_v62 = vld [vmem:[#allocation7 + $0x3b0] sm:$0xff]  }
 0x77a   : > { %5076 = vmatpush3.bf16.msra.mxu1 %v5963_v55  ;;  %v6004_v55 = vld [vmem:[#allocation7 + $0x3f8] sm:$0xff]  }
 0x77b   : > { %v5065_v19 = vpop.f32.mrb[16].mxu0  ;;  %5077 = vmatprep.subr.bf16.mxu1 %v5964_v18  ;;  %v6005_v18 = vld [vmem:[#allocation7 + $0x3b8] sm:$0xff]  }
 0x77c   : > { %v5066_v15 = vpop.f32.mrb[17].mxu0 }
 0x77d   : > { %v7688_v23 = vadd.f32 %v5066_v15, %v5065_v19  ;;  %v5068_v14 = vpop.f32.mrb[18].mxu0  ;;  %v4108_v19 = vld [vmem:[#allocation10] sm:$0xff] }
 0x77e   : > { %5078 = vmatpush3.bf16.msra.mxu1 %v5965_v20  ;;  %v5069_v12 = vpop.f32.mrb[19].mxu0  ;;  %v6375_v20 = vmov 0.0|0.0  }
 0x77f   : > { %5079 = vmatprep.subr.bf16.mxu1 %v5966_v17  ;;  %v4109_v17 = vld [vmem:[#allocation10 + $0x8] sm:$0xff] }
 0x782   : > { %5080 = vmatpush3.bf16.msra.mxu1 %v5967_v11 }
 0x783   : > { %5081 = vmatprep.subr.bf16.mxu1 %v5968_v10  ;;  %v5307_v10 = vpack.c.bf16 %v4109_v17, %v4108_v19  ;;  %v4197_v17 = vld [vmem:[%s7833_s5 + $0x18] sm:$0xff] }
 0x786   : > { %5082 = vmatpush3.bf16.msra.mxu1 %v5969_v9 }
 0x787   : > { %5083 = vmatprep.subr.bf16.mxu1 %v5970_v47 }
 0x78a   : > { %5084 = vmatpush3.bf16.msra.mxu1 %v5971_v8  ;;  %v4110_v8 = vld [vmem:[#allocation10 + $0x10] sm:$0xff] }
 0x78b   : > { %5085 = vmatprep.subr.bf16.mxu1 %v5972_v7  ;;  %v4111_v7 = vld [vmem:[#allocation10 + $0x18] sm:$0xff] }
 0x78e   : > { %5086 = vmatpush3.bf16.msra.mxu1 %v5973_v22  ;;  %v5310_v22 = vpack.c.bf16 %v4111_v7, %v4110_v8  ;;  %v4202_v8 = vld [vmem:[%s7833_s5 + $0x40] sm:$0xff]  ;;  %v4203_v7 = vld [vmem:[%s7833_s5 + $0x48] sm:$0xff] }
 0x78f   : > { %5115 = vmatprep.subr.bf16.mxu1 %v5974_v6  ;;  %v4112_v6 = vld [vmem:[#allocation10 + $0x20] sm:$0xff] }
 0x791   : > { %3871 = vmatmul.mubr.bf16.vlgmr.msra.gmra.mrb[28].mxu1 %v2677_v4 }
 0x792   : > { %5116 = vmatpush3.bf16.msra.mxu1 %v5975_v5  ;;  %v4113_v5 = vld [vmem:[#allocation10 + $0x28] sm:$0xff] }
 0x793   : > { %5117 = vmatprep.subr.bf16.mxu1 %v5976_v24  ;;  %v5313_v4 = vpack.c.bf16 %v4113_v5, %v4112_v6  ;;  %v4114_v24 = vld [vmem:[#allocation10 + $0x30] sm:$0xff] }
 0x794   : > { %v4204_v6 = vld [vmem:[%s7833_s5 + $0x50] sm:$0xff]  ;;  %v4205_v5 = vld [vmem:[%s7833_s5 + $0x58] sm:$0xff] }
 0x796   : > { %5118 = vmatpush3.bf16.msra.mxu1 %v5977_v25  ;;  %v4115_v25 = vld [vmem:[#allocation10 + $0x38] sm:$0xff] }
 0x797   : > { %5119 = vmatprep.subr.bf16.mxu1 %v5978_v27  ;;  %v5316_v27 = vpack.c.bf16 %v4115_v25, %v4114_v24  ;;  %v4206_v24 = vld [vmem:[%s7833_s5 + $0x60] sm:$0xff]  ;;  %v4207_v25 = vld [vmem:[%s7833_s5 + $0x68] sm:$0xff] }
 0x79a   : > { %5120 = vmatpush3.bf16.msra.mxu1 %v5979_v28  ;;  %v4116_v28 = vld [vmem:[#allocation10 + $0x40] sm:$0xff] }
 0x79b   : > { %v5109_v31 = vpop.f32.mrb[20].mxu0  ;;  %5121 = vmatprep.subr.bf16.mxu1 %v5980_v29  ;;  %v4117_v29 = vld [vmem:[#allocation10 + $0x48] sm:$0xff] }
 0x79c   : > { %v5110_v32 = vpop.f32.mrb[21].mxu0 }
 0x79d   : > { %v7692_v33 = vadd.f32 %v5110_v32, %v5109_v31  ;;  %v5112_v34 = vpop.f32.mrb[22].mxu0  ;;  %v4118_v31 = vld [vmem:[#allocation10 + $0x50] sm:$0xff] }
 0x79e   : > { %v5113_v61 = vpop.f32.mrb[23].mxu0  ;;  %5122 = vmatpush3.bf16.msra.mxu1 %v5981_v30  ;;  %v5319_v30 = vpack.c.bf16 %v4117_v29, %v4116_v28  ;;  %v4120_v34 = vld [vmem:[#allocation10 + $0x60] sm:$0xff]  ;;  %v4208_v28 = vld [vmem:[%s7833_s5 + $0x70] sm:$0xff]  ;;  %v4209_v29 = vld [vmem:[%s7833_s5 + $0x78] sm:$0xff] }
 0x79f   : > { %5123 = vmatprep.subr.bf16.mxu1 %v5982_v3  ;;  %v4119_v3 = vld [vmem:[#allocation10 + $0x58] sm:$0xff]  ;;  %v4121_v61 = vld [vmem:[#allocation10 + $0x68] sm:$0xff] }
 0x7a0   : > { %v5322_v32 = vpack.c.bf16 %v4119_v3, %v4118_v31  ;;  %v6378_v31 = vmov 0  }
 0x7a1   : > { %5488 = vset.pattern.permute.xlu1 %v6378_v31  ;;  %5489 = vset.pattern.permute.xlu0 %v6378_v31 }
 0x7a2   : > { %5124 = vmatpush3.bf16.msra.mxu1 %v5983_v35  ;;  %v5325_v35 = vpack.c.bf16 %v4121_v61, %v4120_v34  ;;  %v4280_v34 = vld [vmem:[#allocation11] sm:$0x1] }
 0x7a3   : > { %5125 = vmatprep.subr.bf16.mxu1 %v5984_v36  ;;  %v4868_v36 = vld [vmem:[#allocation8] ss:$0 sm:$0xff] }
 0x7a4   : > { %v2582_v63 = vpop.f32.mrb[16].mxu1 }
 0x7a5   : > { %v2584_v38 = vpop.f32.mrb[17].mxu1  ;;  %v2681_v16 = vpack.c.bf16 %v2582_v63, %v2582_v63  ;;  %v3753_v63 = vadd.f32 %v7618_v13, %v4868_v36 }
 0x7a6   : > { %v2682_v39 = vpack.c.bf16 %v2584_v38, %v2584_v38  ;;  %v2586_v40 = vpop.f32.mrb[18].mxu1  ;;  %5126 = vmatpush3.bf16.msra.mxu1 %v5985_v2 }
 0x7a7   : > { %v2587_v42 = vpop.f32.mrb[19].mxu1  ;;  %5127 = vmatprep.subr.bf16.mxu1 %v5986_v37 }
 0x7a8   : > { %3950 = vmatprep.mubr.bf16.mxu1 %v2682_v39 }
 0x7aa   : > { %5128 = vmatpush3.bf16.msra.mxu1 %v5987_v41 }
 0x7ab   : > { %5129 = vmatprep.subr.bf16.mxu1 %v5988_v43 }
 0x7ae   : > { %5130 = vmatpush3.bf16.msra.mxu1 %v5989_v44 }
 0x7af   : > { %5159 = vmatprep.subr.bf16.mxu1 %v5990_v1 }
 0x7b1   : > { %3951 = vmatmul.mubr.bf16.vlgmr.msra.gmra.mrb[32].mxu1 %v2681_v16 }
 0x7b2   : > { %5160 = vmatpush3.bf16.msra.mxu1 %v5991_v21 }
 0x7b3   : > { %5161 = vmatprep.subr.bf16.mxu1 %v5992_v60 }
 0x7b6   : > { %5162 = vmatpush3.bf16.msra.mxu1 %v5993_v0 }
 0x7b7   : > { %5163 = vmatprep.subr.bf16.mxu1 %v5994_v26  ;;  %v4122_v26 = vld [vmem:[#allocation10 + $0x70] sm:$0xff] }
 0x7ba   : > { %5164 = vmatpush3.bf16.msra.mxu1 %v5995_v59  ;;  %v4123_v59 = vld [vmem:[#allocation10 + $0x78] sm:$0xff] }
 0x7bb   : > { %v5153_v46 = vpop.f32.mrb[24].mxu0  ;;  %5165 = vmatprep.subr.bf16.mxu1 %v5996_v45  ;;  %v5328_v45 = vpack.c.bf16 %v4123_v59, %v4122_v26 }
 0x7bc   : > { %v5154_v49 = vpop.f32.mrb[25].mxu0 }
 0x7bd   : > { %v7694_v50 = vadd.f32 %v5154_v49, %v5153_v46  ;;  %v5156_v51 = vpop.f32.mrb[26].mxu0 }
 0x7be   : > { %v5157_v52 = vpop.f32.mrb[27].mxu0  ;;  %5166 = vmatpush3.bf16.msra.mxu1 %v5997_v58  ;;  %v6376_v58 = vmov 0.0  }
 0x7bf   : > { %5167 = vmatprep.subr.bf16.mxu1 %v5998_v48  ;;  %5221 = vmatprep.subr.mxu0 %v6376_v58 }
 0x7c0   : > { %5223 = vmatprep.mubr.msk.f32.mxu0 %vm6377_vm1, %v6376_v58 }
 0x7c2   : > { %5168 = vmatpush3.bf16.msra.mxu1 %v5999_v53 }
 0x7c3   : > { %5169 = vmatprep.subr.bf16.mxu1 %v6000_v54 }
 0x7c6   : > { %5170 = vmatpush3.bf16.msra.mxu1 %v6001_v56 }
 0x7c7   : > { %5171 = vmatprep.subr.bf16.mxu1 %v6002_v57 }
 0x7ca   : > { %5172 = vmatpush3.bf16.msra.mxu1 %v6003_v62  ;;  %v4194_v62 = vld [vmem:[%s7833_s5] sm:$0xff] }
 0x7cb   : > { %5173 = vmatprep.subr.bf16.mxu1 %v6004_v55  ;;  %v4195_v55 = vld [vmem:[%s7833_s5 + $0x8] sm:$0xff] }
 0x7cc   : > { %v5331_v19 = vpack.c.bf16 %v4195_v55, %v4194_v62 }
 0x7ce   : > { %5174 = vmatpush3.bf16.msra.mxu1 %v6005_v18 }
 0x7cf   : > { %5306 = vmatprep.subr.bf16.mxu1 %v6375_v20 }
 0x824   : > { %v2664_v15 = vpop.f32.mrb[20].mxu1 }
 0x825   : > { %v2666_v14 = vpop.f32.mrb[21].mxu1  ;;  %v2685_v9 = vpack.c.bf16 %v2664_v15, %v2664_v15 }
 0x826   : > { %v2686_v12 = vpack.c.bf16 %v2666_v14, %v2666_v14  ;;  %v2668_v11 = vpop.f32.mrb[22].mxu1  ;;  %v4198_v14 = vld [vmem:[%s7833_s5 + $0x20] sm:$0xff] }
 0x827   : > { %v2669_v47 = vpop.f32.mrb[23].mxu1 }
 0x828   : > { %4030 = vmatprep.mubr.bf16.mxu1 %v2686_v12  ;;  %v4199_v12 = vld [vmem:[%s7833_s5 + $0x28] sm:$0xff] }
 0x829   : > { %4031 = vmatmul.mubr.bf16.vlgmr.msra.gmra.mrb[36].mxu1 %v2685_v9  ;;  %v5337_v11 = vpack.c.bf16 %v4199_v12, %v4198_v14  ;;  %v4201_v9 = vld [vmem:[%s7833_s5 + $0x38] sm:$0xff] }
 0x82a   : > { %5308 = vmatpush3.bf16.msra.mxu1 %v5307_v10  ;;  %5258 = vmatprep.mubr.msk.f32.mxu1 %vm6377_vm1, %v6376_v58  ;;  %v4200_v10 = vld [vmem:[%s7833_s5 + $0x30] sm:$0xff] }
 0x82b   : > { %5309 = vmatprep.subr.bf16.mxu1 %v6375_v20  ;;  %v5340_v47 = vpack.c.bf16 %v4201_v9, %v4200_v10 }
 0x82e   : > { %5311 = vmatpush3.bf16.msra.mxu1 %v5310_v22  ;;  %v5343_v22 = vpack.c.bf16 %v4203_v7, %v4202_v8 }
 0x82f   : > { %5312 = vmatprep.subr.bf16.mxu1 %v6375_v20 }
 0x832   : > { %5314 = vmatpush3.bf16.msra.mxu1 %v5313_v4  ;;  %v5346_v4 = vpack.c.bf16 %v4205_v5, %v4204_v6 }
 0x833   : > { %5315 = vmatprep.subr.bf16.mxu1 %v6375_v20 }
 0x836   : > { %5317 = vmatpush3.bf16.msra.mxu1 %v5316_v27  ;;  %v5349_v27 = vpack.c.bf16 %v4207_v25, %v4206_v24 }
 0x837   : > { %5318 = vmatprep.subr.bf16.mxu1 %v6375_v20 }
 0x83a   : > { %5320 = vmatpush3.bf16.msra.mxu1 %v5319_v30  ;;  %v5352_v30 = vpack.c.bf16 %v4209_v29, %v4208_v28 }
 0x83b   : > { %5321 = vmatprep.subr.bf16.mxu1 %v6375_v20 }
 0x83e   : > { %5323 = vmatpush3.bf16.msra.mxu1 %v5322_v32 }
 0x83f   : > { %5324 = vmatprep.subr.bf16.mxu1 %v6375_v20 }
 0x842   : > { %5326 = vmatpush3.bf16.msra.mxu1 %v5325_v35 }
 0x843   : > { %5327 = vmatprep.subr.bf16.mxu1 %v6375_v20 }
 0x844   : > { %v5043_v2 = vpop.f32.mrb[24].mxu1 }
 0x845   : > { %v5044_v37 = vpop.f32.mrb[25].mxu1 }
 0x846   : > { %v5045_v38 = vadd.f32 %v5044_v37, %v5043_v2  ;;  %v5046_v39 = vpop.f32.mrb[26].mxu1  ;;  %5329 = vmatpush3.bf16.msra.mxu1 %v5328_v45 }
 0x847   : > { %v5047_v40 = vpop.f32.mrb[27].mxu1  ;;  %5296 = vmatprep.subr.mxu1 %v6376_v58 }
 0x848   : > { %v3793_v41 = vadd.f32 %v5045_v38, %v3753_v63  ;;  %v8050_v63 = vld [vmem:[#allocation19_spill] sm:$0xff] }
 0x849   : > { %v4358_v38 = vsub.s32 0, %v8050_v63 }
 0x84a   : > { %v3833_v42 = vadd.f32 %v7688_v23, %v3793_v41 }
 0x864   : > { %v5087_v43 = vpop.f32.mrb[28].mxu1 }
 0x865   : > { %v5088_v44 = vpop.f32.mrb[29].mxu1 }
 0x866   : > { %v5089_v1 = vadd.f32 %v5088_v44, %v5087_v43  ;;  %v5090_v21 = vpop.f32.mrb[30].mxu1 }
 0x867   : > { %v5091_v16 = vpop.f32.mrb[31].mxu1 }
 0x868   : > { %v3873_v60 = vadd.f32 %v5089_v1, %v3833_v42 }
 0x86a   : > { %v3913_v0 = vadd.f32 %v7692_v33, %v3873_v60 }
 0x884   : > { %v5131_v13 = vpop.f32.mrb[32].mxu1 }
 0x885   : > { %v5132_v23 = vpop.f32.mrb[33].mxu1 }
 0x886   : > { %v5133_v46 = vadd.f32 %v5132_v23, %v5131_v13  ;;  %v5134_v33 = vpop.f32.mrb[34].mxu1 }
 0x887   : > { %v5135_v48 = vpop.f32.mrb[35].mxu1 }
 0x888   : > { %v3953_v49 = vadd.f32 %v5133_v46, %v3913_v0 }
 0x88a   : > { %v3993_v51 = vadd.f32 %v7694_v50, %v3953_v49  ;;  %v4196_v50 = vld [vmem:[%s7833_s5 + $0x10] sm:$0xff] }
 0x88b   : > { %v5334_v15 = vpack.c.bf16 %v4197_v17, %v4196_v50 }
 0x8fc   : > { %v5175_v52 = vpop.f32.mrb[36].mxu1 }
 0x8fd   : > { %v5176_v53 = vpop.f32.mrb[37].mxu1 }
 0x8fe   : > { %v5177_v54 = vadd.f32 %v5176_v53, %v5175_v52  ;;  %v5178_v56 = vpop.f32.mrb[38].mxu1 }
 0x8ff   : > { %v5179_v57 = vpop.f32.mrb[39].mxu1 }
 0x900   : > { %v4033_v18 = vadd.f32 %v5177_v54, %v3993_v51 }
 0x902   : > { %5222 = vmatpush3.xpose.msra.mxu0 %v4033_v18  ;;  %5259 = vmatmul.mubr.f32.vlgmr.msra.gmra.mrb[40].mxu1 %v4033_v18 }
 0x903   : > { %5330 = vmatprep.subr.bf16.mxu0 %v6375_v20  ;;  %5298 = vmatprep.mubr.msk.f32.mxu1 %vm6377_vm1, %v6376_v58 }
 0x905   : > { %5224 = vmatmul.mubr.f32.vlgmr.msra.gmra.mrb[28].mxu0 %v4033_v18 }
 0x906   : > { %5332 = vmatpush3.bf16.msra.mxu0 %v5331_v19  ;;  %5293 = vmatprep.mubr.msk.f32.mxu0 %vm6377_vm1, %v6376_v58 }
 0x907   : > { %5333 = vmatprep.subr.bf16.mxu0 %v6375_v20 }
 0x90a   : > { %5335 = vmatpush3.bf16.msra.mxu0 %v5334_v15 }
 0x90b   : > { %5336 = vmatprep.subr.bf16.mxu0 %v6375_v20 }
 0x90e   : > { %5338 = vmatpush3.bf16.msra.mxu0 %v5337_v11 }
 0x90f   : > { %5339 = vmatprep.subr.bf16.mxu0 %v6375_v20 }
 0x912   : > { %5341 = vmatpush3.bf16.msra.mxu0 %v5340_v47 }
 0x913   : > { %5342 = vmatprep.subr.bf16.mxu0 %v6375_v20 }
 0x916   : > { %5344 = vmatpush3.bf16.msra.mxu0 %v5343_v22 }
 0x917   : > { %5345 = vmatprep.subr.bf16.mxu0 %v6375_v20 }
 0x91a   : > { %5347 = vmatpush3.bf16.msra.mxu0 %v5346_v4 }
 0x91b   : > { %5348 = vmatprep.subr.bf16.mxu0 %v6375_v20 }
 0x91e   : > { %5350 = vmatpush3.bf16.msra.mxu0 %v5349_v27 }
 0x91f   : > { %5351 = vmatprep.subr.bf16.mxu0 %v6375_v20 }
 0x922   : > { %5353 = vmatpush3.bf16.msra.mxu0 %v5352_v30 }
 0x9d5   : > { %v4190_v3 = vpop.f32.mrb[40].mxu1 }
 0x9d6   : > { %v5260_v32 = vpop.f32.mrb[41].mxu1  ;;  %5294 = vmatmul.mubr.f32.vlgmr.msra.gmra.mrb[30].mxu0 %v4190_v3  ;;  %5297 = vmatpush3.xpose.msra.mxu1 %v4190_v3 }
 0x9d7   : > { %5301 = vmatprep.subr.mxu1 %v6376_v58 }
 0x9d8   : > { %v4104_v61 = vpop.f32.mrb[28].mxu0 }
 0x9d9   : > { %v5225_v35 = vpop.f32.mrb[29].mxu0  ;;  %5299 = vmatmul.mubr.f32.vlgmr.msra.gmra.mrb[42].mxu1 %v4280_v34  ;;  %vm4364_vm4 = vcmp.gt.f32.partialorder %v4104_v61, 0.0 }
 0x9da   : > { %5302 = vmatpush3.msk.msra.mxu1 %vm2321_vm0, %v4190_v3  ;;  %5303 = vmatprep.mubr.msk.f32.mxu1 %vm6377_vm1, %v6376_v58 }
 0xaa9   : > { %v4276_v20 = vpop.f32.mrb[30].mxu0 }
 0xaaa   : > { %4353 = vperm.xlu1 %5488, %v4276_v20   ;;  %v5295_v36 = vpop.f32.mrb[31].mxu0 }
 0xaac   : > { %v4347_v2 = vpop.f32.mrb[42].mxu1 }
 0xaad   : > { %v5300_v37 = vpop.f32.mrb[43].mxu1  ;;  %v4359_v39 = vrot.slane %v4347_v2, %v4358_v38 }
 0xb29   : > { %v4354_v40 = vpop.permute.xlu1 %4353 }
 0xb2a   : > { %v4360_v41 = vadd.f32 %v4359_v39, %v4354_v40 }
 0xb2c   : > { %v4362_v42 = vmul.f32 0.2, %v4360_v41  ;;  %vm4361_vm2 = vcmp.gt.f32.partialorder %v4360_v41, 0.0 }
 0xb2e   : > { %v4363_v43 = vsel %vm4361_vm2, %v4360_v41, %v4362_v42 }
 0xb2f   : > { %v4365_v44 = vsel %vm4364_vm4, %v4363_v43, -9e+15 }
 0xb30   : > { %v4367_v1 = vsel %vm4366_vm3, %v4365_v44, -inf }
 0xb31   : > { %4368 = vmax.xlane.f32.xlu1 %v4367_v1 }
 0xbbe   : > { %v4369_v21 = vpop.xlane.xlu1 %4368 }
 0xbbf   : > { %v4370_v16 = vsub.f32 %v4365_v44, %v4369_v21 }
 0xbc1   : > { %v4371_v60 = vmul.f32 1.442695, %v4370_v16 }
 0xbc3   : > { %6012 = vpow2.f32 %v4371_v60 }
 0xbcd   : > { %v6013_v0 = vpop.eup %6012 }
 0xbce   : > { %v4373_v26 = vsel %vm4366_vm3, %v6013_v0, 0.0 }
 0xbcf   : > { %4374 = vadd.xlane.f32.xlu0 %v4373_v26 }
 0xc5c   : > { %v4375_v59 = vpop.xlane.xlu0 %4374 }
 0xc5d   : > { %6014 = vrcp.f32 %v4375_v59 }
 0xc67   : > { %v6015_v45 = vpop.eup %6014 }
 0xc68   : > { %v4377_v58 = vmul.f32 %v6015_v45, %v6013_v0 }
 0xc6a   : > { %5304 = vmatmul.mubr.msk.f32.vlgmr.msra.gmra.mrb[44].mxu1 %vm4378_vm5, %v4377_v58 }
 0xd3d   : > { %v4451_v13 = vpop.f32.mrb[44].mxu1 }
 0xd3e   : > { %v4456_v23 = vmul.f32 1.442695, %v4451_v13  ;;  %v5305_v46 = vpop.f32.mrb[45].mxu1  ;;  %vm4455_vm6 = vcmp.gt.f32.partialorder %v4451_v13, 0.0 }
 0xd40   : > { %6016 = vpow2.f32 %v4456_v23 }
 0xd4a   : > { %v6017_v33 = vpop.eup %6016 }
 0xd4b   : > { %v4999_v48 = vadd.f32 -1.0, %v6017_v33 }
 0xd4d   : > { %v4459_v49 = vsel %vm4455_vm6, %v4451_v13, %v4999_v48 }
 0xd4e   : > { %4460 = vst [vmem:[%s363_s12] sm:$0xf] %v4459_v49 }
 0xd4f   : > { %6297 = shalt.err (!%p6294_p8)
}
 0xd50   : > { %s6298_s22 = scalar_lea.hbm %s7784_s15, 64  ;;  %s6302_s23 = scalar_lea.hbm %s7835_s7, 128 }
 0xd51   : > { %p6299_p6 = scmp.ne.s32.totalorder %s7784_s15, %s6298_s22  ;;  %p6303_p9 = scmp.lt.u32.totalorder %s7784_s15, %s7835_s7 }
 0xd52   : > { %p6304_p10 = scmp.lt.u32.totalorder %s6302_s23, %s6298_s22  ;;  %p6306_p11 = scmp.lt.u32.totalorder %s6298_s22, %s7784_s15 }
 0xd53   : > { %p6300_p0 = pnand %p6299_p6, %p8051_p13 }
 0xd54   : > { %p6305_p12 = por %p6304_p10, %p6303_p9 }
 0xd55   : > { %p6301_p2 = pneg %p6300_p0 }
 0xd56   : > { %p6307_p5 = por %p6306_p11, %p6305_p12 }
 0xd58   : > { %p6308_p7 = pnand %p6307_p5, %p6301_p2 }
 0xd5a   : > { %6311 = shalt.err (!%p6308_p7)
}
 0xd5b   : > { %5404 = dma.vmem_to_hbm [thread:$0]  (%p8051_p13), %s7786_s10, 64, %s7784_s15, %s4462_s8  }
 0xd5c PF: > { %s4487_s29 = sand.u32 1, %s6350_s24   ;;  %p8052_p4 = scmp.ne.s32.totalorder %s7911_s14, 0 }
 0xd5d   : > { %p8053_p1 = scmp.ge.s32.totalorder %s6362_s27, 2  ;;  %s4488_s11 = scalar_lea.sflag [#allocation4], %s4487_s29 }
 0xd5f   : > { %p5427_p3 = pnand %p8053_p1, %p8052_p4 }
 0xd61   : > { %6345 = dma.done.wait (!%p5427_p3), %s4488_s11, 64  }
 0xd62   : > { %6347 = vsyncadd (!%p5427_p3), %s4488_s11, 4294967232  ;;  %p23_p8 = scmp.ge.s32.totalorder %s6575_s13, 4   ;;  %s8054_s24 = smov %s6354_s25 }
 0xd63   : > { %s8055_s25 = smov %s6358_s26  ;;  %s8056_s26 = smov %s6587_s28 }
 0xd64   : > { %s8057_s27 = smov %s6575_s13  ;;  %25 = sbr.rel (!%p23_p8) target bundleno = 8 (0x8), region = 113 }
 0xd6b   :  { %4493 = vsyncpa [#allocation3], 1 }
 0xd6c   :  { %4495 = vsyncpa [#allocation3 + $0x1], 1 }
 0xd6d   :  { %4496 = vsyncpa [#allocation6], 1 }
 0xd6e   :  { %4497 = vsyncpa [#allocation9], 1 }
 0xd6f   :  { %4498 = vsyncpa [#allocation12], 1 }
 0xd70   :  { %4499 = vsyncpa [#allocation4], 1 }
 0xd71   :  { %4501 = vsyncpa [#allocation4 + $0x1], 1 }

</bundles_post_ra>
